<compile_context>
chip_gen: v7x
topology: tpu7x:2x2x1
jax: 0.10.0
libtpu: 0.0.40
codegen_flags: <defaults>
</compile_context>

<pallas_src>
import functools
import math

import jax
import jax.numpy as jnp
from jax.experimental import pallas as pl
from jax.experimental.pallas import tpu as pltpu


# -----------------------------------------------------------------------------
# Fused decoder kernel: one grid step = (batch block b, layer l)
# -----------------------------------------------------------------------------

def _decoder_kernel(
    # per-batch-block inputs (resident across the layer axis)
    x_ref, enc_ref, tmask_ref, mmask_ref,
    # per-layer weights (bf16, streamed once per batch block per layer)
    wqkv_ref, wo_s_ref, wq_c_ref, wkv_c_ref, wo_c_ref, w1_ref, w2_ref,
    # packed per-layer biases / LN params (f32) and shared final LN
    sp_ref, lnf_ref,
    # output block: resident activation carrier across the layer axis
    o_ref,
    *, num_heads, d_model, d_ff):
  H, D, F = num_heads, d_model, d_ff
  dk = D // H
  scale = 1.0 / math.sqrt(dk)
  layer = pl.program_id(1)
  last = pl.num_programs(1) - 1

  Bt, T, _ = o_ref.shape
  S = enc_ref.shape[1]
  N = Bt * T

  # Layer 0: load this batch block's input activations into the resident block.
  @pl.when(layer == 0)
  def _():
    o_ref[...] = x_ref[...]

  x = o_ref[...].reshape(N, D)                       # f32, carried in VMEM
  enc2 = enc_ref[...].reshape(Bt * S, D)             # f32

  # Unpack the per-layer small params (one DMA'd [16, W] block).
  sp = sp_ref[0]
  bqkv = sp[0:1, :3 * D]
  bo_s = sp[1:2, :D]
  ln1g, ln1b = sp[2:3, :D], sp[3:4, :D]
  bq_c = sp[4:5, :D]
  bkv_c = sp[5:6, :2 * D]
  bo_c = sp[6:7, :D]
  ln2g, ln2b = sp[7:8, :D], sp[8:9, :D]
  b1 = sp[9:10, :F]
  b2 = sp[10:11, :D]
  ln3g, ln3b = sp[11:12, :D], sp[12:13, :D]

  tmask = tmask_ref[...].astype(jnp.float32)         # [Bt, T, T] additive
  mmask = mmask_ref[...].astype(jnp.float32)         # [Bt, T, S] additive

  def ln(z, g, b):
    # LayerNorm over last axis, eps = 1e-5 (PyTorch default), f32 math.
    mean = jnp.mean(z, axis=-1, keepdims=True)
    var = jnp.mean((z - mean) ** 2, axis=-1, keepdims=True)
    return (z - mean) * jax.lax.rsqrt(var + 1e-5) * g + b

  def proj(a, w, b):
    # [N', d] f32 @ [d, f] bf16 -> f32 accumulate, f32 bias.
    return jnp.dot(a.astype(jnp.bfloat16), w,
                   preferred_element_type=jnp.float32) + b

  def attend(q, k, v, wo, bo, mask):
    # q [Bt, Tq, D], k/v [Bt, Sk, D] f32; wo [D, D] bf16; bo [1, D] f32;
    # mask [Bt, Tq, Sk] f32 additive (broadcast over heads).
    qb = q.astype(jnp.bfloat16)
    kb = k.astype(jnp.bfloat16)
    vb = v.astype(jnp.bfloat16)
    heads = []
    # TODO(synk): for large H/T use lax.fori_loop + a VMEM scratch slice.
    for h in range(H):
      sl = slice(h * dk, (h + 1) * dk)
      s = jnp.einsum('bqd,bkd->bqk', qb[:, :, sl], kb[:, :, sl],
                     preferred_element_type=jnp.float32) * scale + mask
      m = jnp.max(s, axis=-1, keepdims=True)
      p = jnp.exp(s - m)
      p = p * pl.reciprocal(jnp.sum(p, axis=-1, keepdims=True), approx=True)
      heads.append(jnp.einsum('bqk,bkd->bqd', p.astype(jnp.bfloat16),
                              vb[:, :, sl],
                              preferred_element_type=jnp.float32))
    ctx = jnp.concatenate(heads, axis=-1)            # [Bt, Tq, D] f32
    # Single output projection with contraction depth D (fills the MXU).
    out = jnp.dot(ctx.reshape(-1, D).astype(jnp.bfloat16), wo,
                  preferred_element_type=jnp.float32)
    return out + bo

  # ---- self-attention + add & norm (fused QKV projection) ----
  qkv = proj(x, wqkv_ref[0], bqkv)                   # [N, 3D]
  sa = attend(qkv[:, :D].reshape(Bt, T, D),
              qkv[:, D:2 * D].reshape(Bt, T, D),
              qkv[:, 2 * D:].reshape(Bt, T, D),
              wo_s_ref[0], bo_s, tmask)              # [N, D]
  x = ln(x + sa, ln1g, ln1b)

  # ---- cross-attention + add & norm (fused KV projection) ----
  q = proj(x, wq_c_ref[0], bq_c)                     # [N, D]
  kv = proj(enc2, wkv_c_ref[0], bkv_c).reshape(Bt, S, 2 * D)
  ca = attend(q.reshape(Bt, T, D), kv[:, :, :D], kv[:, :, D:],
              wo_c_ref[0], bo_c, mmask)
  x = ln(x + ca, ln2g, ln2b)

  # ---- feed-forward + add & norm ----
  h1 = jnp.maximum(proj(x, w1_ref[0], b1), 0.0)      # [N, F]
  ff = proj(h1, w2_ref[0], b2)                       # [N, D]
  x = ln(x + ff, ln3g, ln3b)

  # Store the carried activation; on the last layer store the final LayerNorm
  # directly (no redundant extra store).
  @pl.when(layer != last)
  def _():
    o_ref[...] = x.reshape(Bt, T, D)

  @pl.when(layer == last)
  def _():
    o_ref[...] = ln(x, lnf_ref[0:1, :], lnf_ref[1:2, :]).reshape(Bt, T, D)


# -----------------------------------------------------------------------------
# Wrapper
# -----------------------------------------------------------------------------

def decoder_forward(params, x, encoder_output, tgt_mask=None, memory_mask=None,
                    *, num_heads, batch_block=None):
  """x: [B, T, D] f32, encoder_output: [B, S, D] f32; optional 0/1 masks
  tgt_mask [B, T, T] and memory_mask [B, T, S] (1 = attend, 0 = masked)."""
  B, T, D = x.shape
  S = encoder_output.shape[1]
  L = params["wqkv_s"].shape[0]
  F = params["w1"].shape[-1]
  W = params["smallp"].shape[-1]
  H = num_heads
  assert D % H == 0

  # Batch block size: amortizes per-layer weight DMA over Bt rows.
  Bt = batch_block if batch_block is not None else min(B, 8)
  Bt = max(1, min(Bt, B))
  while B % Bt:
    Bt -= 1

  def to_additive(mask, k_len):
    if mask is None:
      return jnp.zeros((B, T, k_len), jnp.bfloat16)
    return jnp.where(mask != 0, 0.0, -1e9).astype(jnp.bfloat16)

  tgt_add = to_additive(tgt_mask, T)        # compact bf16 [B, T, T]
  mem_add = to_additive(memory_mask, S)     # compact bf16 [B, T, S]

  def per_batch(shape):
    return pl.BlockSpec(shape, lambda b, l: (b,) + (0,) * (len(shape) - 1))

  def per_layer(shape):
    return pl.BlockSpec(shape, lambda b, l: (l,) + (0,) * (len(shape) - 1))

  in_specs = [
      per_batch((Bt, T, D)),          # x
      per_batch((Bt, S, D)),          # encoder_output
      per_batch((Bt, T, T)),          # tgt additive mask (bf16)
      per_batch((Bt, T, S)),          # memory additive mask (bf16)
      per_layer((1, D, 3 * D)),       # wqkv_self (bf16)
      per_layer((1, D, D)),           # wo_self (bf16)
      per_layer((1, D, D)),           # wq_cross (bf16)
      per_layer((1, D, 2 * D)),       # wkv_cross (bf16)
      per_layer((1, D, D)),           # wo_cross (bf16)
      per_layer((1, D, F)),           # w1 (bf16)
      per_layer((1, F, D)),           # w2 (bf16)
      per_layer((1, 16, W)),          # packed biases + LN gamma/beta (f32)
      pl.BlockSpec((2, D), lambda b, l: (0, 0)),   # final LN gamma/beta
  ]

  kernel = functools.partial(_decoder_kernel, num_heads=H, d_model=D, d_ff=F)

  # Raise the scoped VMEM limit toward physical capacity when queryable.
  try:
    vmem_limit = min(int(pltpu.get_tpu_info().vmem_capacity_bytes * 0.8),
                     100 * 1024 * 1024)
  except Exception:
    vmem_limit = None

  out = pl.pallas_call(
      kernel,
      out_shape=jax.ShapeDtypeStruct((B, T, D), jnp.float32),
      grid=(B // Bt, L),
      in_specs=in_specs,
      out_specs=pl.BlockSpec((Bt, T, D), lambda b, l: (b, 0, 0)),
      compiler_params=pltpu.CompilerParams(
          dimension_semantics=("parallel", "arbitrary"),
          vmem_limit_bytes=vmem_limit),
  )(x, encoder_output, tgt_add, mem_add,
    params["wqkv_s"], params["wo_s"], params["wq_c"], params["wkv_c"],
    params["wo_c"], params["w1"], params["w2"], params["smallp"],
    params["lnf"])
  return out


# -----------------------------------------------------------------------------
# Deterministic parameter construction (stacked per-layer weights)
# -----------------------------------------------------------------------------

def init_params(key, num_layers, d_model, num_heads, d_ff):
  D, F, L = d_model, d_ff, num_layers
  W = ((max(3 * D, F) + 127) // 128) * 128   # packed small-param row width

  def dense(k, fan_in, fan_out):
    kw, kb = jax.random.split(k)
    lim = 1.0 / math.sqrt(fan_in)
    w = jax.random.uniform(kw, (fan_in, fan_out), jnp.float32, -lim, lim)
    b = jax.random.uniform(kb, (fan_out,), jnp.float32, -lim, lim)
    return w, b

  def pad_row(v):
    return jnp.pad(v, (0, W - v.shape[0]))

  ones = jnp.ones((D,), jnp.float32)
  zeros = jnp.zeros((D,), jnp.float32)

  wqkv_s, wo_s, wq_c, wkv_c, wo_c, w1s, w2s, smalls = ([] for _ in range(8))
  for li in range(L):
    lk = jax.random.fold_in(key, li)
    ks = jax.random.split(lk, 10)
    wq, bq = dense(ks[0], D, D)
    wk, bk = dense(ks[1], D, D)
    wv, bv = dense(ks[2], D, D)
    wo, bo = dense(ks[3], D, D)
    wqc, bqc = dense(ks[4], D, D)
    wkc, bkc = dense(ks[5], D, D)
    wvc, bvc = dense(ks[6], D, D)
    woc, boc = dense(ks[7], D, D)
    w1, b1 = dense(ks[8], D, F)
    w2, b2 = dense(ks[9], F, D)

    wqkv_s.append(jnp.concatenate([wq, wk, wv], axis=1))     # [D, 3D]
    wo_s.append(wo)
    wq_c.append(wqc)
    wkv_c.append(jnp.concatenate([wkc, wvc], axis=1))        # [D, 2D]
    wo_c.append(woc)
    w1s.append(w1)
    w2s.append(w2)

    rows = [
        jnp.concatenate([bq, bk, bv]),   # 0: bqkv_self
        bo,                              # 1: bo_self
        ones, zeros,                     # 2,3: ln1 gamma/beta
        bqc,                             # 4: bq_cross
        jnp.concatenate([bkc, bvc]),     # 5: bkv_cross
        boc,                             # 6: bo_cross
        ones, zeros,                     # 7,8: ln2 gamma/beta
        b1,                              # 9
        b2,                              # 10
        ones, zeros,                     # 11,12: ln3 gamma/beta
    ]
    rows = [pad_row(r) for r in rows] + [jnp.zeros((W,), jnp.float32)] * 3
    smalls.append(jnp.stack(rows, axis=0))                   # [16, W]

  return {
      # MXU operands live in HBM as bf16 (half the DMA bytes, MXU-native).
      "wqkv_s": jnp.stack(wqkv_s).astype(jnp.bfloat16),
      "wo_s":   jnp.stack(wo_s).astype(jnp.bfloat16),
      "wq_c":   jnp.stack(wq_c).astype(jnp.bfloat16),
      "wkv_c":  jnp.stack(wkv_c).astype(jnp.bfloat16),
      "wo_c":   jnp.stack(wo_c).astype(jnp.bfloat16),
      "w1":     jnp.stack(w1s).astype(jnp.bfloat16),
      "w2":     jnp.stack(w2s).astype(jnp.bfloat16),
      "smallp": jnp.stack(smalls),                           # [L, 16, W] f32
      "lnf":    jnp.stack([jnp.ones((D,), jnp.float32),
                           jnp.zeros((D,), jnp.float32)]),   # [2, D]
  }


# -----------------------------------------------------------------------------
# Pure-JAX reference (same bf16-rounded weights, f32 math) for validation
# -----------------------------------------------------------------------------

def reference_forward(params, x, encoder_output, tgt_mask=None,
                      memory_mask=None, *, num_heads):
  B, T, D = x.shape
  S = encoder_output.shape[1]
  H = num_heads
  dk = D // H
  L = params["wqkv_s"].shape[0]
  F = params["w1"].shape[-1]
  f32 = lambda a: a.astype(jnp.float32)
  sp = params["smallp"]

  def to_add(mask, k_len):
    if mask is None:
      return jnp.zeros((B, T, k_len), jnp.float32)
    return jnp.where(mask != 0, 0.0, -1e9).astype(jnp.float32)

  tgt_add = to_add(tgt_mask, T)
  mem_add = to_add(memory_mask, S)

  def ln(z, g, b):
    mean = jnp.mean(z, -1, keepdims=True)
    var = jnp.mean((z - mean) ** 2, -1, keepdims=True)
    return (z - mean) * jax.lax.rsqrt(var + 1e-5) * g + b

  def mha(q, k, v, wo, bo, mask):
    qh = q.reshape(B, -1, H, dk).transpose(0, 2, 1, 3)
    kh = k.reshape(B, -1, H, dk).transpose(0, 2, 1, 3)
    vh = v.reshape(B, -1, H, dk).transpose(0, 2, 1, 3)
    s = jnp.einsum("bhtd,bhsd->bhts", qh, kh) / math.sqrt(dk) + mask[:, None]
    p = jax.nn.softmax(s, axis=-1)
    o = jnp.einsum("bhts,bhsd->bhtd", p, vh)
    o = o.transpose(0, 2, 1, 3).reshape(B, -1, D)
    return o @ wo + bo

  h = x
  for l in range(L):
    bqkv = sp[l, 0, :3 * D]; bo_s = sp[l, 1, :D]
    ln1g, ln1b = sp[l, 2, :D], sp[l, 3, :D]
    bq_c = sp[l, 4, :D]; bkv_c = sp[l, 5, :2 * D]; bo_c = sp[l, 6, :D]
    ln2g, ln2b = sp[l, 7, :D], sp[l, 8, :D]
    b1 = sp[l, 9, :F]; b2 = sp[l, 10, :D]
    ln3g, ln3b = sp[l, 11, :D], sp[l, 12, :D]

    qkv = h @ f32(params["wqkv_s"][l]) + bqkv
    sa = mha(qkv[..., :D], qkv[..., D:2 * D], qkv[..., 2 * D:],
             f32(params["wo_s"][l]), bo_s, tgt_add)
    h = ln(h + sa, ln1g, ln1b)

    q = h @ f32(params["wq_c"][l]) + bq_c
    kv = encoder_output @ f32(params["wkv_c"][l]) + bkv_c
    ca = mha(q, kv[..., :D], kv[..., D:],
             f32(params["wo_c"][l]), bo_c, mem_add)
    h = ln(h + ca, ln2g, ln2b)

    ff = jnp.maximum(h @ f32(params["w1"][l]) + b1, 0.0)
    ff = ff @ f32(params["w2"][l]) + b2
    h = ln(h + ff, ln3g, ln3b)

  return ln(h, params["lnf"][0], params["lnf"][1])


# -----------------------------------------------------------------------------
# Main
# -----------------------------------------------------------------------------

if __name__ == "__main__":
  num_layers = 2
  d_model = 32
  num_heads = 4
  d_ff = 64
  B, T, S = 2, 8, 8

  key = jax.random.PRNGKey(0)
  k_params, k_x, k_enc = jax.random.split(key, 3)

  params = init_params(k_params, num_layers, d_model, num_heads, d_ff)
  x = jax.random.normal(k_x, (B, T, d_model), jnp.float32)
  encoder_output = jax.random.normal(k_enc, (B, S, d_model), jnp.float32)

  # causal target mask [B, T, T] (1 = attend), no memory mask
  tgt_mask = jnp.broadcast_to(
      jnp.tril(jnp.ones((T, T), jnp.float32))[None, :, :], (B, T, T))

  out = decoder_forward(params, x, encoder_output, tgt_mask=tgt_mask,
                        memory_mask=None, num_heads=num_heads)
  out = jax.block_until_ready(out)

  ref = reference_forward(params, x, encoder_output, tgt_mask=tgt_mask,
                          memory_mask=None, num_heads=num_heads)

  assert out.shape == (B, T, d_model)
  assert jnp.all(jnp.isfinite(out))
  max_err = float(jnp.max(jnp.abs(out - ref)))
  assert max_err < 0.1, f"mismatch vs reference: max abs err {max_err}"
  print("KERNEL_OK")
</pallas_src>

<mosaic_0001>
module attributes {stable_mosaic.version = 11 : i64} {
  func.func @_decoder_kernel(%arg0: i32, %arg1: i32, %arg2: memref<2x8x32xf32, #tpu.memory_space<vmem>>, %arg3: memref<2x8x32xf32, #tpu.memory_space<vmem>>, %arg4: memref<2x8x8xbf16, #tpu.memory_space<vmem>>, %arg5: memref<2x8x8xbf16, #tpu.memory_space<vmem>>, %arg6: memref<1x32x96xbf16, #tpu.memory_space<vmem>>, %arg7: memref<1x32x32xbf16, #tpu.memory_space<vmem>>, %arg8: memref<1x32x32xbf16, #tpu.memory_space<vmem>>, %arg9: memref<1x32x64xbf16, #tpu.memory_space<vmem>>, %arg10: memref<1x32x32xbf16, #tpu.memory_space<vmem>>, %arg11: memref<1x32x64xbf16, #tpu.memory_space<vmem>>, %arg12: memref<1x64x32xbf16, #tpu.memory_space<vmem>>, %arg13: memref<1x16x128xf32, #tpu.memory_space<vmem>>, %arg14: memref<2x32xf32, #tpu.memory_space<vmem>>, %arg15: memref<2x8x32xf32, #tpu.memory_space<vmem>>) attributes {dimension_semantics = [#tpu.dimension_semantics<parallel>, #tpu.dimension_semantics<arbitrary>], iteration_bounds = array<i64: 1, 2>, scalar_prefetch = 0 : i64, scratch_operands = 0 : i64, tpu.core_type = #tpu.core_type<tc>, window_params = [{transform_indices = @transform_0, window_bounds = array<i64: 2, 8, 32>}, {transform_indices = @transform_1, window_bounds = array<i64: 2, 8, 32>}, {transform_indices = @transform_2, window_bounds = array<i64: 2, 8, 8>}, {transform_indices = @transform_3, window_bounds = array<i64: 2, 8, 8>}, {transform_indices = @transform_4, window_bounds = array<i64: 1, 32, 96>}, {transform_indices = @transform_5, window_bounds = array<i64: 1, 32, 32>}, {transform_indices = @transform_6, window_bounds = array<i64: 1, 32, 32>}, {transform_indices = @transform_7, window_bounds = array<i64: 1, 32, 64>}, {transform_indices = @transform_8, window_bounds = array<i64: 1, 32, 32>}, {transform_indices = @transform_9, window_bounds = array<i64: 1, 32, 64>}, {transform_indices = @transform_10, window_bounds = array<i64: 1, 64, 32>}, {transform_indices = @transform_11, window_bounds = array<i64: 1, 16, 128>}, {pipeline_mode = #tpu.pipeline_mode<synchronous>, transform_indices = @transform_12, window_bounds = array<i64: 2, 32>}, {transform_indices = @transform_13, window_bounds = array<i64: 2, 8, 32>}]} {
    %c0_i32 = arith.constant 0 : i32
    %0 = arith.cmpi eq, %arg1, %c0_i32 : i32
    %1 = arith.extui %0 : i1 to i32
    %c0_i32_0 = arith.constant 0 : i32
    %2 = arith.cmpi ne, %1, %c0_i32_0 : i32
    scf.if %2 {
      %c0_101 = arith.constant 0 : index
      %c0_102 = arith.constant 0 : index
      %c0_103 = arith.constant 0 : index
      %317 = vector.load %arg2[%c0_101, %c0_102, %c0_103] : memref<2x8x32xf32, #tpu.memory_space<vmem>>, vector<2x8x32xf32>
      %c0_104 = arith.constant 0 : index
      %c0_105 = arith.constant 0 : index
      %c0_106 = arith.constant 0 : index
      %318 = vector.load %arg15[%c0_104, %c0_105, %c0_106] : memref<2x8x32xf32, #tpu.memory_space<vmem>>, vector<2x8x32xf32>
      tpu.vector_store %arg15[%c0_104, %c0_105, %c0_106], %317 {strides = array<i32>} : memref<2x8x32xf32, #tpu.memory_space<vmem>>, vector<2x8x32xf32>,
    } else {
    }
    %c0 = arith.constant 0 : index
    %c0_1 = arith.constant 0 : index
    %c0_2 = arith.constant 0 : index
    %3 = vector.load %arg15[%c0, %c0_1, %c0_2] : memref<2x8x32xf32, #tpu.memory_space<vmem>>, vector<2x8x32xf32>
    %4 = vector.shape_cast %3 : vector<2x8x32xf32> to vector<16x32xf32>
    %c0_3 = arith.constant 0 : index
    %c0_4 = arith.constant 0 : index
    %c0_5 = arith.constant 0 : index
    %5 = vector.load %arg3[%c0_3, %c0_4, %c0_5] : memref<2x8x32xf32, #tpu.memory_space<vmem>>, vector<2x8x32xf32>
    %6 = vector.shape_cast %5 : vector<2x8x32xf32> to vector<16x32xf32>
    %c0_6 = arith.constant 0 : index
    %c0_7 = arith.constant 0 : index
    %c0_8 = arith.constant 0 : index
    %7 = vector.load %arg13[%c0_6, %c0_7, %c0_8] : memref<1x16x128xf32, #tpu.memory_space<vmem>>, vector<1x16x128xf32>
    %8 = vector.shape_cast %7 : vector<1x16x128xf32> to vector<16x128xf32>
    %9 = vector.extract_strided_slice %8 {offsets = [0, 0], sizes = [1, 96], strides = [1, 1]} : vector<16x128xf32> to vector<1x96xf32>
    %10 = vector.extract_strided_slice %8 {offsets = [1, 0], sizes = [1, 32], strides = [1, 1]} : vector<16x128xf32> to vector<1x32xf32>
    %11 = vector.extract_strided_slice %8 {offsets = [2, 0], sizes = [1, 32], strides = [1, 1]} : vector<16x128xf32> to vector<1x32xf32>
    %12 = vector.extract_strided_slice %8 {offsets = [3, 0], sizes = [1, 32], strides = [1, 1]} : vector<16x128xf32> to vector<1x32xf32>
    %13 = vector.extract_strided_slice %8 {offsets = [4, 0], sizes = [1, 32], strides = [1, 1]} : vector<16x128xf32> to vector<1x32xf32>
    %14 = vector.extract_strided_slice %8 {offsets = [5, 0], sizes = [1, 64], strides = [1, 1]} : vector<16x128xf32> to vector<1x64xf32>
    %15 = vector.extract_strided_slice %8 {offsets = [6, 0], sizes = [1, 32], strides = [1, 1]} : vector<16x128xf32> to vector<1x32xf32>
    %16 = vector.extract_strided_slice %8 {offsets = [7, 0], sizes = [1, 32], strides = [1, 1]} : vector<16x128xf32> to vector<1x32xf32>
    %17 = vector.extract_strided_slice %8 {offsets = [8, 0], sizes = [1, 32], strides = [1, 1]} : vector<16x128xf32> to vector<1x32xf32>
    %18 = vector.extract_strided_slice %8 {offsets = [9, 0], sizes = [1, 64], strides = [1, 1]} : vector<16x128xf32> to vector<1x64xf32>
    %19 = vector.extract_strided_slice %8 {offsets = [10, 0], sizes = [1, 32], strides = [1, 1]} : vector<16x128xf32> to vector<1x32xf32>
    %20 = vector.extract_strided_slice %8 {offsets = [11, 0], sizes = [1, 32], strides = [1, 1]} : vector<16x128xf32> to vector<1x32xf32>
    %21 = vector.extract_strided_slice %8 {offsets = [12, 0], sizes = [1, 32], strides = [1, 1]} : vector<16x128xf32> to vector<1x32xf32>
    %c0_9 = arith.constant 0 : index
    %c0_10 = arith.constant 0 : index
    %c0_11 = arith.constant 0 : index
    %22 = vector.load %arg4[%c0_9, %c0_10, %c0_11] : memref<2x8x8xbf16, #tpu.memory_space<vmem>>, vector<2x8x8xbf16>
    %23 = arith.extf %22 : vector<2x8x8xbf16> to vector<2x8x8xf32>
    %c0_12 = arith.constant 0 : index
    %c0_13 = arith.constant 0 : index
    %c0_14 = arith.constant 0 : index
    %24 = vector.load %arg5[%c0_12, %c0_13, %c0_14] : memref<2x8x8xbf16, #tpu.memory_space<vmem>>, vector<2x8x8xbf16>
    %25 = arith.extf %24 : vector<2x8x8xbf16> to vector<2x8x8xf32>
    %c0_15 = arith.constant 0 : index
    %c0_16 = arith.constant 0 : index
    %c0_17 = arith.constant 0 : index
    %26 = vector.load %arg6[%c0_15, %c0_16, %c0_17] : memref<1x32x96xbf16, #tpu.memory_space<vmem>>, vector<1x32x96xbf16>
    %27 = vector.shape_cast %26 : vector<1x32x96xbf16> to vector<32x96xbf16>
    %28 = arith.truncf %4 : vector<16x32xf32> to vector<16x32xbf16>
    %cst = arith.constant dense<0.000000e+00> : vector<16x96xf32>
    %29 = tpu.matmul %28, %27, %cst {dimension_numbers = #tpu.dot_dimension_numbers<[1], [0], [0], [1], [0, 0, 1, 1], [], []>} : vector<16x32xbf16>, vector<32x96xbf16>, vector<16x96xf32> -> vector<16x96xf32>
    %30 = vector.broadcast %9 : vector<1x96xf32> to vector<16x96xf32>
    %31 = arith.addf %29, %30 : vector<16x96xf32>
    %32 = vector.extract_strided_slice %31 {offsets = [0, 0], sizes = [16, 32], strides = [1, 1]} : vector<16x96xf32> to vector<16x32xf32>
    %33 = vector.shape_cast %32 : vector<16x32xf32> to vector<2x8x32xf32>
    %34 = vector.extract_strided_slice %31 {offsets = [0, 32], sizes = [16, 32], strides = [1, 1]} : vector<16x96xf32> to vector<16x32xf32>
    %35 = vector.shape_cast %34 : vector<16x32xf32> to vector<2x8x32xf32>
    %36 = vector.extract_strided_slice %31 {offsets = [0, 64], sizes = [16, 32], strides = [1, 1]} : vector<16x96xf32> to vector<16x32xf32>
    %37 = vector.shape_cast %36 : vector<16x32xf32> to vector<2x8x32xf32>
    %c0_18 = arith.constant 0 : index
    %c0_19 = arith.constant 0 : index
    %c0_20 = arith.constant 0 : index
    %38 = vector.load %arg7[%c0_18, %c0_19, %c0_20] : memref<1x32x32xbf16, #tpu.memory_space<vmem>>, vector<1x32x32xbf16>
    %39 = vector.shape_cast %38 : vector<1x32x32xbf16> to vector<32x32xbf16>
    %40 = arith.truncf %33 : vector<2x8x32xf32> to vector<2x8x32xbf16>
    %41 = arith.truncf %35 : vector<2x8x32xf32> to vector<2x8x32xbf16>
    %42 = arith.truncf %37 : vector<2x8x32xf32> to vector<2x8x32xbf16>
    %43 = vector.extract_strided_slice %40 {offsets = [0, 0, 0], sizes = [2, 8, 8], strides = [1, 1, 1]} : vector<2x8x32xbf16> to vector<2x8x8xbf16>
    %44 = vector.extract_strided_slice %41 {offsets = [0, 0, 0], sizes = [2, 8, 8], strides = [1, 1, 1]} : vector<2x8x32xbf16> to vector<2x8x8xbf16>
    "tpu.trace_start"() <{level = 10 : i32, message = "bqd,bkd->bqk"}> : () -> ()
    %cst_21 = arith.constant dense<0.000000e+00> : vector<2x8x8xf32>
    %45 = tpu.matmul %43, %44, %cst_21 {dimension_numbers = #tpu.dot_dimension_numbers<[2], [2], [1], [1], [0, 0, 0, 1, 1, 1], [0], [0]>} : vector<2x8x8xbf16>, vector<2x8x8xbf16>, vector<2x8x8xf32> -> vector<2x8x8xf32>
    "tpu.trace_stop"() : () -> ()
    %cst_22 = arith.constant 0.353553385 : f32
    %46 = vector.broadcast %cst_22 : f32 to vector<2x8x8xf32>
    %47 = arith.mulf %45, %46 : vector<2x8x8xf32>
    %48 = arith.addf %47, %23 : vector<2x8x8xf32>
    %cst_23 = arith.constant dense<0xFF800000> : vector<2x8xf32>
    %49 = vector.multi_reduction <maximumf>, %48, %cst_23 [2] : vector<2x8x8xf32> to vector<2x8xf32>
    %50 = vector.shape_cast %49 : vector<2x8xf32> to vector<2x8x1xf32>
    %51 = vector.broadcast %50 : vector<2x8x1xf32> to vector<2x8x8xf32>
    %52 = arith.subf %48, %51 : vector<2x8x8xf32>
    %53 = math.exp %52 : vector<2x8x8xf32>
    %cst_24 = arith.constant dense<0.000000e+00> : vector<2x8xf32>
    %54 = vector.multi_reduction <add>, %53, %cst_24 [2] : vector<2x8x8xf32> to vector<2x8xf32>
    %55 = vector.shape_cast %54 : vector<2x8xf32> to vector<2x8x1xf32>
    %56 = tpu.reciprocal %55 {approx = true} : vector<2x8x1xf32> -> vector<2x8x1xf32>
    %57 = vector.broadcast %56 : vector<2x8x1xf32> to vector<2x8x8xf32>
    %58 = arith.mulf %53, %57 : vector<2x8x8xf32>
    %59 = arith.truncf %58 : vector<2x8x8xf32> to vector<2x8x8xbf16>
    %60 = vector.extract_strided_slice %42 {offsets = [0, 0, 0], sizes = [2, 8, 8], strides = [1, 1, 1]} : vector<2x8x32xbf16> to vector<2x8x8xbf16>
    "tpu.trace_start"() <{level = 10 : i32, message = "bqk,bkd->bqd"}> : () -> ()
    %cst_25 = arith.constant dense<0.000000e+00> : vector<2x8x8xf32>
    %61 = tpu.matmul %59, %60, %cst_25 {dimension_numbers = #tpu.dot_dimension_numbers<[2], [1], [1], [2], [0, 0, 0, 1, 1, 2], [0], [0]>} : vector<2x8x8xbf16>, vector<2x8x8xbf16>, vector<2x8x8xf32> -> vector<2x8x8xf32>
    "tpu.trace_stop"() : () -> ()
    %62 = vector.extract_strided_slice %40 {offsets = [0, 0, 8], sizes = [2, 8, 8], strides = [1, 1, 1]} : vector<2x8x32xbf16> to vector<2x8x8xbf16>
    %63 = vector.extract_strided_slice %41 {offsets = [0, 0, 8], sizes = [2, 8, 8], strides = [1, 1, 1]} : vector<2x8x32xbf16> to vector<2x8x8xbf16>
    "tpu.trace_start"() <{level = 10 : i32, message = "bqd,bkd->bqk"}> : () -> ()
    %cst_26 = arith.constant dense<0.000000e+00> : vector<2x8x8xf32>
    %64 = tpu.matmul %62, %63, %cst_26 {dimension_numbers = #tpu.dot_dimension_numbers<[2], [2], [1], [1], [0, 0, 0, 1, 1, 1], [0], [0]>} : vector<2x8x8xbf16>, vector<2x8x8xbf16>, vector<2x8x8xf32> -> vector<2x8x8xf32>
    "tpu.trace_stop"() : () -> ()
    %cst_27 = arith.constant 0.353553385 : f32
    %65 = vector.broadcast %cst_27 : f32 to vector<2x8x8xf32>
    %66 = arith.mulf %64, %65 : vector<2x8x8xf32>
    %67 = arith.addf %66, %23 : vector<2x8x8xf32>
    %cst_28 = arith.constant dense<0xFF800000> : vector<2x8xf32>
    %68 = vector.multi_reduction <maximumf>, %67, %cst_28 [2] : vector<2x8x8xf32> to vector<2x8xf32>
    %69 = vector.shape_cast %68 : vector<2x8xf32> to vector<2x8x1xf32>
    %70 = vector.broadcast %69 : vector<2x8x1xf32> to vector<2x8x8xf32>
    %71 = arith.subf %67, %70 : vector<2x8x8xf32>
    %72 = math.exp %71 : vector<2x8x8xf32>
    %cst_29 = arith.constant dense<0.000000e+00> : vector<2x8xf32>
    %73 = vector.multi_reduction <add>, %72, %cst_29 [2] : vector<2x8x8xf32> to vector<2x8xf32>
    %74 = vector.shape_cast %73 : vector<2x8xf32> to vector<2x8x1xf32>
    %75 = tpu.reciprocal %74 {approx = true} : vector<2x8x1xf32> -> vector<2x8x1xf32>
    %76 = vector.broadcast %75 : vector<2x8x1xf32> to vector<2x8x8xf32>
    %77 = arith.mulf %72, %76 : vector<2x8x8xf32>
    %78 = arith.truncf %77 : vector<2x8x8xf32> to vector<2x8x8xbf16>
    %79 = vector.extract_strided_slice %42 {offsets = [0, 0, 8], sizes = [2, 8, 8], strides = [1, 1, 1]} : vector<2x8x32xbf16> to vector<2x8x8xbf16>
    "tpu.trace_start"() <{level = 10 : i32, message = "bqk,bkd->bqd"}> : () -> ()
    %cst_30 = arith.constant dense<0.000000e+00> : vector<2x8x8xf32>
    %80 = tpu.matmul %78, %79, %cst_30 {dimension_numbers = #tpu.dot_dimension_numbers<[2], [1], [1], [2], [0, 0, 0, 1, 1, 2], [0], [0]>} : vector<2x8x8xbf16>, vector<2x8x8xbf16>, vector<2x8x8xf32> -> vector<2x8x8xf32>
    "tpu.trace_stop"() : () -> ()
    %81 = vector.extract_strided_slice %40 {offsets = [0, 0, 16], sizes = [2, 8, 8], strides = [1, 1, 1]} : vector<2x8x32xbf16> to vector<2x8x8xbf16>
    %82 = vector.extract_strided_slice %41 {offsets = [0, 0, 16], sizes = [2, 8, 8], strides = [1, 1, 1]} : vector<2x8x32xbf16> to vector<2x8x8xbf16>
    "tpu.trace_start"() <{level = 10 : i32, message = "bqd,bkd->bqk"}> : () -> ()
    %cst_31 = arith.constant dense<0.000000e+00> : vector<2x8x8xf32>
    %83 = tpu.matmul %81, %82, %cst_31 {dimension_numbers = #tpu.dot_dimension_numbers<[2], [2], [1], [1], [0, 0, 0, 1, 1, 1], [0], [0]>} : vector<2x8x8xbf16>, vector<2x8x8xbf16>, vector<2x8x8xf32> -> vector<2x8x8xf32>
    "tpu.trace_stop"() : () -> ()
    %cst_32 = arith.constant 0.353553385 : f32
    %84 = vector.broadcast %cst_32 : f32 to vector<2x8x8xf32>
    %85 = arith.mulf %83, %84 : vector<2x8x8xf32>
    %86 = arith.addf %85, %23 : vector<2x8x8xf32>
    %cst_33 = arith.constant dense<0xFF800000> : vector<2x8xf32>
    %87 = vector.multi_reduction <maximumf>, %86, %cst_33 [2] : vector<2x8x8xf32> to vector<2x8xf32>
    %88 = vector.shape_cast %87 : vector<2x8xf32> to vector<2x8x1xf32>
    %89 = vector.broadcast %88 : vector<2x8x1xf32> to vector<2x8x8xf32>
    %90 = arith.subf %86, %89 : vector<2x8x8xf32>
    %91 = math.exp %90 : vector<2x8x8xf32>
    %cst_34 = arith.constant dense<0.000000e+00> : vector<2x8xf32>
    %92 = vector.multi_reduction <add>, %91, %cst_34 [2] : vector<2x8x8xf32> to vector<2x8xf32>
    %93 = vector.shape_cast %92 : vector<2x8xf32> to vector<2x8x1xf32>
    %94 = tpu.reciprocal %93 {approx = true} : vector<2x8x1xf32> -> vector<2x8x1xf32>
    %95 = vector.broadcast %94 : vector<2x8x1xf32> to vector<2x8x8xf32>
    %96 = arith.mulf %91, %95 : vector<2x8x8xf32>
    %97 = arith.truncf %96 : vector<2x8x8xf32> to vector<2x8x8xbf16>
    %98 = vector.extract_strided_slice %42 {offsets = [0, 0, 16], sizes = [2, 8, 8], strides = [1, 1, 1]} : vector<2x8x32xbf16> to vector<2x8x8xbf16>
    "tpu.trace_start"() <{level = 10 : i32, message = "bqk,bkd->bqd"}> : () -> ()
    %cst_35 = arith.constant dense<0.000000e+00> : vector<2x8x8xf32>
    %99 = tpu.matmul %97, %98, %cst_35 {dimension_numbers = #tpu.dot_dimension_numbers<[2], [1], [1], [2], [0, 0, 0, 1, 1, 2], [0], [0]>} : vector<2x8x8xbf16>, vector<2x8x8xbf16>, vector<2x8x8xf32> -> vector<2x8x8xf32>
    "tpu.trace_stop"() : () -> ()
    %100 = vector.extract_strided_slice %40 {offsets = [0, 0, 24], sizes = [2, 8, 8], strides = [1, 1, 1]} : vector<2x8x32xbf16> to vector<2x8x8xbf16>
    %101 = vector.extract_strided_slice %41 {offsets = [0, 0, 24], sizes = [2, 8, 8], strides = [1, 1, 1]} : vector<2x8x32xbf16> to vector<2x8x8xbf16>
    "tpu.trace_start"() <{level = 10 : i32, message = "bqd,bkd->bqk"}> : () -> ()
    %cst_36 = arith.constant dense<0.000000e+00> : vector<2x8x8xf32>
    %102 = tpu.matmul %100, %101, %cst_36 {dimension_numbers = #tpu.dot_dimension_numbers<[2], [2], [1], [1], [0, 0, 0, 1, 1, 1], [0], [0]>} : vector<2x8x8xbf16>, vector<2x8x8xbf16>, vector<2x8x8xf32> -> vector<2x8x8xf32>
    "tpu.trace_stop"() : () -> ()
    %cst_37 = arith.constant 0.353553385 : f32
    %103 = vector.broadcast %cst_37 : f32 to vector<2x8x8xf32>
    %104 = arith.mulf %102, %103 : vector<2x8x8xf32>
    %105 = arith.addf %104, %23 : vector<2x8x8xf32>
    %cst_38 = arith.constant dense<0xFF800000> : vector<2x8xf32>
    %106 = vector.multi_reduction <maximumf>, %105, %cst_38 [2] : vector<2x8x8xf32> to vector<2x8xf32>
    %107 = vector.shape_cast %106 : vector<2x8xf32> to vector<2x8x1xf32>
    %108 = vector.broadcast %107 : vector<2x8x1xf32> to vector<2x8x8xf32>
    %109 = arith.subf %105, %108 : vector<2x8x8xf32>
    %110 = math.exp %109 : vector<2x8x8xf32>
    %cst_39 = arith.constant dense<0.000000e+00> : vector<2x8xf32>
    %111 = vector.multi_reduction <add>, %110, %cst_39 [2] : vector<2x8x8xf32> to vector<2x8xf32>
    %112 = vector.shape_cast %111 : vector<2x8xf32> to vector<2x8x1xf32>
    %113 = tpu.reciprocal %112 {approx = true} : vector<2x8x1xf32> -> vector<2x8x1xf32>
    %114 = vector.broadcast %113 : vector<2x8x1xf32> to vector<2x8x8xf32>
    %115 = arith.mulf %110, %114 : vector<2x8x8xf32>
    %116 = arith.truncf %115 : vector<2x8x8xf32> to vector<2x8x8xbf16>
    %117 = vector.extract_strided_slice %42 {offsets = [0, 0, 24], sizes = [2, 8, 8], strides = [1, 1, 1]} : vector<2x8x32xbf16> to vector<2x8x8xbf16>
    "tpu.trace_start"() <{level = 10 : i32, message = "bqk,bkd->bqd"}> : () -> ()
    %cst_40 = arith.constant dense<0.000000e+00> : vector<2x8x8xf32>
    %118 = tpu.matmul %116, %117, %cst_40 {dimension_numbers = #tpu.dot_dimension_numbers<[2], [1], [1], [2], [0, 0, 0, 1, 1, 2], [0], [0]>} : vector<2x8x8xbf16>, vector<2x8x8xbf16>, vector<2x8x8xf32> -> vector<2x8x8xf32>
    "tpu.trace_stop"() : () -> ()
    %119 = tpu.concatenate %61, %80, %99, %118 in 2 : vector<2x8x8xf32>, vector<2x8x8xf32>, vector<2x8x8xf32>, vector<2x8x8xf32> -> vector<2x8x32xf32>
    %120 = vector.shape_cast %119 : vector<2x8x32xf32> to vector<16x32xf32>
    %121 = arith.truncf %120 : vector<16x32xf32> to vector<16x32xbf16>
    %cst_41 = arith.constant dense<0.000000e+00> : vector<16x32xf32>
    %122 = tpu.matmul %121, %39, %cst_41 {dimension_numbers = #tpu.dot_dimension_numbers<[1], [0], [0], [1], [0, 0, 1, 1], [], []>} : vector<16x32xbf16>, vector<32x32xbf16>, vector<16x32xf32> -> vector<16x32xf32>
    %123 = vector.broadcast %10 : vector<1x32xf32> to vector<16x32xf32>
    %124 = arith.addf %122, %123 : vector<16x32xf32>
    %125 = arith.addf %4, %124 : vector<16x32xf32>
    %cst_42 = arith.constant dense<0.000000e+00> : vector<16xf32>
    %126 = vector.multi_reduction <add>, %125, %cst_42 [1] : vector<16x32xf32> to vector<16xf32>
    %127 = vector.shape_cast %126 : vector<16xf32> to vector<16x1xf32>
    %cst_43 = arith.constant 3.200000e+01 : f32
    %128 = vector.broadcast %cst_43 : f32 to vector<16x1xf32>
    %129 = arith.divf %127, %128 : vector<16x1xf32>
    %130 = vector.broadcast %129 : vector<16x1xf32> to vector<16x32xf32>
    %131 = arith.subf %125, %130 : vector<16x32xf32>
    %132 = arith.mulf %131, %131 : vector<16x32xf32>
    %cst_44 = arith.constant dense<0.000000e+00> : vector<16xf32>
    %133 = vector.multi_reduction <add>, %132, %cst_44 [1] : vector<16x32xf32> to vector<16xf32>
    %134 = vector.shape_cast %133 : vector<16xf32> to vector<16x1xf32>
    %cst_45 = arith.constant 3.200000e+01 : f32
    %135 = vector.broadcast %cst_45 : f32 to vector<16x1xf32>
    %136 = arith.divf %134, %135 : vector<16x1xf32>
    %137 = vector.broadcast %129 : vector<16x1xf32> to vector<16x32xf32>
    %138 = arith.subf %125, %137 : vector<16x32xf32>
    %cst_46 = arith.constant 9.99999974E-6 : f32
    %139 = vector.broadcast %cst_46 : f32 to vector<16x1xf32>
    %140 = arith.addf %136, %139 : vector<16x1xf32>
    %141 = math.rsqrt %140 : vector<16x1xf32>
    %142 = vector.broadcast %141 : vector<16x1xf32> to vector<16x32xf32>
    %143 = arith.mulf %138, %142 : vector<16x32xf32>
    %144 = vector.broadcast %11 : vector<1x32xf32> to vector<16x32xf32>
    %145 = arith.mulf %143, %144 : vector<16x32xf32>
    %146 = vector.broadcast %12 : vector<1x32xf32> to vector<16x32xf32>
    %147 = arith.addf %145, %146 : vector<16x32xf32>
    %c0_47 = arith.constant 0 : index
    %c0_48 = arith.constant 0 : index
    %c0_49 = arith.constant 0 : index
    %148 = vector.load %arg8[%c0_47, %c0_48, %c0_49] : memref<1x32x32xbf16, #tpu.memory_space<vmem>>, vector<1x32x32xbf16>
    %149 = vector.shape_cast %148 : vector<1x32x32xbf16> to vector<32x32xbf16>
    %150 = arith.truncf %147 : vector<16x32xf32> to vector<16x32xbf16>
    %cst_50 = arith.constant dense<0.000000e+00> : vector<16x32xf32>
    %151 = tpu.matmul %150, %149, %cst_50 {dimension_numbers = #tpu.dot_dimension_numbers<[1], [0], [0], [1], [0, 0, 1, 1], [], []>} : vector<16x32xbf16>, vector<32x32xbf16>, vector<16x32xf32> -> vector<16x32xf32>
    %152 = vector.broadcast %13 : vector<1x32xf32> to vector<16x32xf32>
    %153 = arith.addf %151, %152 : vector<16x32xf32>
    %c0_51 = arith.constant 0 : index
    %c0_52 = arith.constant 0 : index
    %c0_53 = arith.constant 0 : index
    %154 = vector.load %arg9[%c0_51, %c0_52, %c0_53] : memref<1x32x64xbf16, #tpu.memory_space<vmem>>, vector<1x32x64xbf16>
    %155 = vector.shape_cast %154 : vector<1x32x64xbf16> to vector<32x64xbf16>
    %156 = arith.truncf %6 : vector<16x32xf32> to vector<16x32xbf16>
    %cst_54 = arith.constant dense<0.000000e+00> : vector<16x64xf32>
    %157 = tpu.matmul %156, %155, %cst_54 {dimension_numbers = #tpu.dot_dimension_numbers<[1], [0], [0], [1], [0, 0, 1, 1], [], []>} : vector<16x32xbf16>, vector<32x64xbf16>, vector<16x64xf32> -> vector<16x64xf32>
    %158 = vector.broadcast %14 : vector<1x64xf32> to vector<16x64xf32>
    %159 = arith.addf %157, %158 : vector<16x64xf32>
    %160 = vector.shape_cast %159 : vector<16x64xf32> to vector<2x8x64xf32>
    %161 = vector.shape_cast %153 : vector<16x32xf32> to vector<2x8x32xf32>
    %162 = vector.extract_strided_slice %160 {offsets = [0, 0, 0], sizes = [2, 8, 32], strides = [1, 1, 1]} : vector<2x8x64xf32> to vector<2x8x32xf32>
    %163 = vector.extract_strided_slice %160 {offsets = [0, 0, 32], sizes = [2, 8, 32], strides = [1, 1, 1]} : vector<2x8x64xf32> to vector<2x8x32xf32>
    %c0_55 = arith.constant 0 : index
    %c0_56 = arith.constant 0 : index
    %c0_57 = arith.constant 0 : index
    %164 = vector.load %arg10[%c0_55, %c0_56, %c0_57] : memref<1x32x32xbf16, #tpu.memory_space<vmem>>, vector<1x32x32xbf16>
    %165 = vector.shape_cast %164 : vector<1x32x32xbf16> to vector<32x32xbf16>
    %166 = arith.truncf %161 : vector<2x8x32xf32> to vector<2x8x32xbf16>
    %167 = arith.truncf %162 : vector<2x8x32xf32> to vector<2x8x32xbf16>
    %168 = arith.truncf %163 : vector<2x8x32xf32> to vector<2x8x32xbf16>
    %169 = vector.extract_strided_slice %166 {offsets = [0, 0, 0], sizes = [2, 8, 8], strides = [1, 1, 1]} : vector<2x8x32xbf16> to vector<2x8x8xbf16>
    %170 = vector.extract_strided_slice %167 {offsets = [0, 0, 0], sizes = [2, 8, 8], strides = [1, 1, 1]} : vector<2x8x32xbf16> to vector<2x8x8xbf16>
    "tpu.trace_start"() <{level = 10 : i32, message = "bqd,bkd->bqk"}> : () -> ()
    %cst_58 = arith.constant dense<0.000000e+00> : vector<2x8x8xf32>
    %171 = tpu.matmul %169, %170, %cst_58 {dimension_numbers = #tpu.dot_dimension_numbers<[2], [2], [1], [1], [0, 0, 0, 1, 1, 1], [0], [0]>} : vector<2x8x8xbf16>, vector<2x8x8xbf16>, vector<2x8x8xf32> -> vector<2x8x8xf32>
    "tpu.trace_stop"() : () -> ()
    %cst_59 = arith.constant 0.353553385 : f32
    %172 = vector.broadcast %cst_59 : f32 to vector<2x8x8xf32>
    %173 = arith.mulf %171, %172 : vector<2x8x8xf32>
    %174 = arith.addf %173, %25 : vector<2x8x8xf32>
    %cst_60 = arith.constant dense<0xFF800000> : vector<2x8xf32>
    %175 = vector.multi_reduction <maximumf>, %174, %cst_60 [2] : vector<2x8x8xf32> to vector<2x8xf32>
    %176 = vector.shape_cast %175 : vector<2x8xf32> to vector<2x8x1xf32>
    %177 = vector.broadcast %176 : vector<2x8x1xf32> to vector<2x8x8xf32>
    %178 = arith.subf %174, %177 : vector<2x8x8xf32>
    %179 = math.exp %178 : vector<2x8x8xf32>
    %cst_61 = arith.constant dense<0.000000e+00> : vector<2x8xf32>
    %180 = vector.multi_reduction <add>, %179, %cst_61 [2] : vector<2x8x8xf32> to vector<2x8xf32>
    %181 = vector.shape_cast %180 : vector<2x8xf32> to vector<2x8x1xf32>
    %182 = tpu.reciprocal %181 {approx = true} : vector<2x8x1xf32> -> vector<2x8x1xf32>
    %183 = vector.broadcast %182 : vector<2x8x1xf32> to vector<2x8x8xf32>
    %184 = arith.mulf %179, %183 : vector<2x8x8xf32>
    %185 = arith.truncf %184 : vector<2x8x8xf32> to vector<2x8x8xbf16>
    %186 = vector.extract_strided_slice %168 {offsets = [0, 0, 0], sizes = [2, 8, 8], strides = [1, 1, 1]} : vector<2x8x32xbf16> to vector<2x8x8xbf16>
    "tpu.trace_start"() <{level = 10 : i32, message = "bqk,bkd->bqd"}> : () -> ()
    %cst_62 = arith.constant dense<0.000000e+00> : vector<2x8x8xf32>
    %187 = tpu.matmul %185, %186, %cst_62 {dimension_numbers = #tpu.dot_dimension_numbers<[2], [1], [1], [2], [0, 0, 0, 1, 1, 2], [0], [0]>} : vector<2x8x8xbf16>, vector<2x8x8xbf16>, vector<2x8x8xf32> -> vector<2x8x8xf32>
    "tpu.trace_stop"() : () -> ()
    %188 = vector.extract_strided_slice %166 {offsets = [0, 0, 8], sizes = [2, 8, 8], strides = [1, 1, 1]} : vector<2x8x32xbf16> to vector<2x8x8xbf16>
    %189 = vector.extract_strided_slice %167 {offsets = [0, 0, 8], sizes = [2, 8, 8], strides = [1, 1, 1]} : vector<2x8x32xbf16> to vector<2x8x8xbf16>
    "tpu.trace_start"() <{level = 10 : i32, message = "bqd,bkd->bqk"}> : () -> ()
    %cst_63 = arith.constant dense<0.000000e+00> : vector<2x8x8xf32>
    %190 = tpu.matmul %188, %189, %cst_63 {dimension_numbers = #tpu.dot_dimension_numbers<[2], [2], [1], [1], [0, 0, 0, 1, 1, 1], [0], [0]>} : vector<2x8x8xbf16>, vector<2x8x8xbf16>, vector<2x8x8xf32> -> vector<2x8x8xf32>
    "tpu.trace_stop"() : () -> ()
    %cst_64 = arith.constant 0.353553385 : f32
    %191 = vector.broadcast %cst_64 : f32 to vector<2x8x8xf32>
    %192 = arith.mulf %190, %191 : vector<2x8x8xf32>
    %193 = arith.addf %192, %25 : vector<2x8x8xf32>
    %cst_65 = arith.constant dense<0xFF800000> : vector<2x8xf32>
    %194 = vector.multi_reduction <maximumf>, %193, %cst_65 [2] : vector<2x8x8xf32> to vector<2x8xf32>
    %195 = vector.shape_cast %194 : vector<2x8xf32> to vector<2x8x1xf32>
    %196 = vector.broadcast %195 : vector<2x8x1xf32> to vector<2x8x8xf32>
    %197 = arith.subf %193, %196 : vector<2x8x8xf32>
    %198 = math.exp %197 : vector<2x8x8xf32>
    %cst_66 = arith.constant dense<0.000000e+00> : vector<2x8xf32>
    %199 = vector.multi_reduction <add>, %198, %cst_66 [2] : vector<2x8x8xf32> to vector<2x8xf32>
    %200 = vector.shape_cast %199 : vector<2x8xf32> to vector<2x8x1xf32>
    %201 = tpu.reciprocal %200 {approx = true} : vector<2x8x1xf32> -> vector<2x8x1xf32>
    %202 = vector.broadcast %201 : vector<2x8x1xf32> to vector<2x8x8xf32>
    %203 = arith.mulf %198, %202 : vector<2x8x8xf32>
    %204 = arith.truncf %203 : vector<2x8x8xf32> to vector<2x8x8xbf16>
    %205 = vector.extract_strided_slice %168 {offsets = [0, 0, 8], sizes = [2, 8, 8], strides = [1, 1, 1]} : vector<2x8x32xbf16> to vector<2x8x8xbf16>
    "tpu.trace_start"() <{level = 10 : i32, message = "bqk,bkd->bqd"}> : () -> ()
    %cst_67 = arith.constant dense<0.000000e+00> : vector<2x8x8xf32>
    %206 = tpu.matmul %204, %205, %cst_67 {dimension_numbers = #tpu.dot_dimension_numbers<[2], [1], [1], [2], [0, 0, 0, 1, 1, 2], [0], [0]>} : vector<2x8x8xbf16>, vector<2x8x8xbf16>, vector<2x8x8xf32> -> vector<2x8x8xf32>
    "tpu.trace_stop"() : () -> ()
    %207 = vector.extract_strided_slice %166 {offsets = [0, 0, 16], sizes = [2, 8, 8], strides = [1, 1, 1]} : vector<2x8x32xbf16> to vector<2x8x8xbf16>
    %208 = vector.extract_strided_slice %167 {offsets = [0, 0, 16], sizes = [2, 8, 8], strides = [1, 1, 1]} : vector<2x8x32xbf16> to vector<2x8x8xbf16>
    "tpu.trace_start"() <{level = 10 : i32, message = "bqd,bkd->bqk"}> : () -> ()
    %cst_68 = arith.constant dense<0.000000e+00> : vector<2x8x8xf32>
    %209 = tpu.matmul %207, %208, %cst_68 {dimension_numbers = #tpu.dot_dimension_numbers<[2], [2], [1], [1], [0, 0, 0, 1, 1, 1], [0], [0]>} : vector<2x8x8xbf16>, vector<2x8x8xbf16>, vector<2x8x8xf32> -> vector<2x8x8xf32>
    "tpu.trace_stop"() : () -> ()
    %cst_69 = arith.constant 0.353553385 : f32
    %210 = vector.broadcast %cst_69 : f32 to vector<2x8x8xf32>
    %211 = arith.mulf %209, %210 : vector<2x8x8xf32>
    %212 = arith.addf %211, %25 : vector<2x8x8xf32>
    %cst_70 = arith.constant dense<0xFF800000> : vector<2x8xf32>
    %213 = vector.multi_reduction <maximumf>, %212, %cst_70 [2] : vector<2x8x8xf32> to vector<2x8xf32>
    %214 = vector.shape_cast %213 : vector<2x8xf32> to vector<2x8x1xf32>
    %215 = vector.broadcast %214 : vector<2x8x1xf32> to vector<2x8x8xf32>
    %216 = arith.subf %212, %215 : vector<2x8x8xf32>
    %217 = math.exp %216 : vector<2x8x8xf32>
    %cst_71 = arith.constant dense<0.000000e+00> : vector<2x8xf32>
    %218 = vector.multi_reduction <add>, %217, %cst_71 [2] : vector<2x8x8xf32> to vector<2x8xf32>
    %219 = vector.shape_cast %218 : vector<2x8xf32> to vector<2x8x1xf32>
    %220 = tpu.reciprocal %219 {approx = true} : vector<2x8x1xf32> -> vector<2x8x1xf32>
    %221 = vector.broadcast %220 : vector<2x8x1xf32> to vector<2x8x8xf32>
    %222 = arith.mulf %217, %221 : vector<2x8x8xf32>
    %223 = arith.truncf %222 : vector<2x8x8xf32> to vector<2x8x8xbf16>
    %224 = vector.extract_strided_slice %168 {offsets = [0, 0, 16], sizes = [2, 8, 8], strides = [1, 1, 1]} : vector<2x8x32xbf16> to vector<2x8x8xbf16>
    "tpu.trace_start"() <{level = 10 : i32, message = "bqk,bkd->bqd"}> : () -> ()
    %cst_72 = arith.constant dense<0.000000e+00> : vector<2x8x8xf32>
    %225 = tpu.matmul %223, %224, %cst_72 {dimension_numbers = #tpu.dot_dimension_numbers<[2], [1], [1], [2], [0, 0, 0, 1, 1, 2], [0], [0]>} : vector<2x8x8xbf16>, vector<2x8x8xbf16>, vector<2x8x8xf32> -> vector<2x8x8xf32>
    "tpu.trace_stop"() : () -> ()
    %226 = vector.extract_strided_slice %166 {offsets = [0, 0, 24], sizes = [2, 8, 8], strides = [1, 1, 1]} : vector<2x8x32xbf16> to vector<2x8x8xbf16>
    %227 = vector.extract_strided_slice %167 {offsets = [0, 0, 24], sizes = [2, 8, 8], strides = [1, 1, 1]} : vector<2x8x32xbf16> to vector<2x8x8xbf16>
    "tpu.trace_start"() <{level = 10 : i32, message = "bqd,bkd->bqk"}> : () -> ()
    %cst_73 = arith.constant dense<0.000000e+00> : vector<2x8x8xf32>
    %228 = tpu.matmul %226, %227, %cst_73 {dimension_numbers = #tpu.dot_dimension_numbers<[2], [2], [1], [1], [0, 0, 0, 1, 1, 1], [0], [0]>} : vector<2x8x8xbf16>, vector<2x8x8xbf16>, vector<2x8x8xf32> -> vector<2x8x8xf32>
    "tpu.trace_stop"() : () -> ()
    %cst_74 = arith.constant 0.353553385 : f32
    %229 = vector.broadcast %cst_74 : f32 to vector<2x8x8xf32>
    %230 = arith.mulf %228, %229 : vector<2x8x8xf32>
    %231 = arith.addf %230, %25 : vector<2x8x8xf32>
    %cst_75 = arith.constant dense<0xFF800000> : vector<2x8xf32>
    %232 = vector.multi_reduction <maximumf>, %231, %cst_75 [2] : vector<2x8x8xf32> to vector<2x8xf32>
    %233 = vector.shape_cast %232 : vector<2x8xf32> to vector<2x8x1xf32>
    %234 = vector.broadcast %233 : vector<2x8x1xf32> to vector<2x8x8xf32>
    %235 = arith.subf %231, %234 : vector<2x8x8xf32>
    %236 = math.exp %235 : vector<2x8x8xf32>
    %cst_76 = arith.constant dense<0.000000e+00> : vector<2x8xf32>
    %237 = vector.multi_reduction <add>, %236, %cst_76 [2] : vector<2x8x8xf32> to vector<2x8xf32>
    %238 = vector.shape_cast %237 : vector<2x8xf32> to vector<2x8x1xf32>
    %239 = tpu.reciprocal %238 {approx = true} : vector<2x8x1xf32> -> vector<2x8x1xf32>
    %240 = vector.broadcast %239 : vector<2x8x1xf32> to vector<2x8x8xf32>
    %241 = arith.mulf %236, %240 : vector<2x8x8xf32>
    %242 = arith.truncf %241 : vector<2x8x8xf32> to vector<2x8x8xbf16>
    %243 = vector.extract_strided_slice %168 {offsets = [0, 0, 24], sizes = [2, 8, 8], strides = [1, 1, 1]} : vector<2x8x32xbf16> to vector<2x8x8xbf16>
    "tpu.trace_start"() <{level = 10 : i32, message = "bqk,bkd->bqd"}> : () -> ()
    %cst_77 = arith.constant dense<0.000000e+00> : vector<2x8x8xf32>
    %244 = tpu.matmul %242, %243, %cst_77 {dimension_numbers = #tpu.dot_dimension_numbers<[2], [1], [1], [2], [0, 0, 0, 1, 1, 2], [0], [0]>} : vector<2x8x8xbf16>, vector<2x8x8xbf16>, vector<2x8x8xf32> -> vector<2x8x8xf32>
    "tpu.trace_stop"() : () -> ()
    %245 = tpu.concatenate %187, %206, %225, %244 in 2 : vector<2x8x8xf32>, vector<2x8x8xf32>, vector<2x8x8xf32>, vector<2x8x8xf32> -> vector<2x8x32xf32>
    %246 = vector.shape_cast %245 : vector<2x8x32xf32> to vector<16x32xf32>
    %247 = arith.truncf %246 : vector<16x32xf32> to vector<16x32xbf16>
    %cst_78 = arith.constant dense<0.000000e+00> : vector<16x32xf32>
    %248 = tpu.matmul %247, %165, %cst_78 {dimension_numbers = #tpu.dot_dimension_numbers<[1], [0], [0], [1], [0, 0, 1, 1], [], []>} : vector<16x32xbf16>, vector<32x32xbf16>, vector<16x32xf32> -> vector<16x32xf32>
    %249 = vector.broadcast %15 : vector<1x32xf32> to vector<16x32xf32>
    %250 = arith.addf %248, %249 : vector<16x32xf32>
    %251 = arith.addf %147, %250 : vector<16x32xf32>
    %cst_79 = arith.constant dense<0.000000e+00> : vector<16xf32>
    %252 = vector.multi_reduction <add>, %251, %cst_79 [1] : vector<16x32xf32> to vector<16xf32>
    %253 = vector.shape_cast %252 : vector<16xf32> to vector<16x1xf32>
    %cst_80 = arith.constant 3.200000e+01 : f32
    %254 = vector.broadcast %cst_80 : f32 to vector<16x1xf32>
    %255 = arith.divf %253, %254 : vector<16x1xf32>
    %256 = vector.broadcast %255 : vector<16x1xf32> to vector<16x32xf32>
    %257 = arith.subf %251, %256 : vector<16x32xf32>
    %258 = arith.mulf %257, %257 : vector<16x32xf32>
    %cst_81 = arith.constant dense<0.000000e+00> : vector<16xf32>
    %259 = vector.multi_reduction <add>, %258, %cst_81 [1] : vector<16x32xf32> to vector<16xf32>
    %260 = vector.shape_cast %259 : vector<16xf32> to vector<16x1xf32>
    %cst_82 = arith.constant 3.200000e+01 : f32
    %261 = vector.broadcast %cst_82 : f32 to vector<16x1xf32>
    %262 = arith.divf %260, %261 : vector<16x1xf32>
    %263 = vector.broadcast %255 : vector<16x1xf32> to vector<16x32xf32>
    %264 = arith.subf %251, %263 : vector<16x32xf32>
    %cst_83 = arith.constant 9.99999974E-6 : f32
    %265 = vector.broadcast %cst_83 : f32 to vector<16x1xf32>
    %266 = arith.addf %262, %265 : vector<16x1xf32>
    %267 = math.rsqrt %266 : vector<16x1xf32>
    %268 = vector.broadcast %267 : vector<16x1xf32> to vector<16x32xf32>
    %269 = arith.mulf %264, %268 : vector<16x32xf32>
    %270 = vector.broadcast %16 : vector<1x32xf32> to vector<16x32xf32>
    %271 = arith.mulf %269, %270 : vector<16x32xf32>
    %272 = vector.broadcast %17 : vector<1x32xf32> to vector<16x32xf32>
    %273 = arith.addf %271, %272 : vector<16x32xf32>
    %c0_84 = arith.constant 0 : index
    %c0_85 = arith.constant 0 : index
    %c0_86 = arith.constant 0 : index
    %274 = vector.load %arg11[%c0_84, %c0_85, %c0_86] : memref<1x32x64xbf16, #tpu.memory_space<vmem>>, vector<1x32x64xbf16>
    %275 = vector.shape_cast %274 : vector<1x32x64xbf16> to vector<32x64xbf16>
    %276 = arith.truncf %273 : vector<16x32xf32> to vector<16x32xbf16>
    %cst_87 = arith.constant dense<0.000000e+00> : vector<16x64xf32>
    %277 = tpu.matmul %276, %275, %cst_87 {dimension_numbers = #tpu.dot_dimension_numbers<[1], [0], [0], [1], [0, 0, 1, 1], [], []>} : vector<16x32xbf16>, vector<32x64xbf16>, vector<16x64xf32> -> vector<16x64xf32>
    %278 = vector.broadcast %18 : vector<1x64xf32> to vector<16x64xf32>
    %279 = arith.addf %277, %278 : vector<16x64xf32>
    %cst_88 = arith.constant 0.000000e+00 : f32
    %280 = vector.broadcast %cst_88 : f32 to vector<16x64xf32>
    %281 = arith.maximumf %279, %280 : vector<16x64xf32>
    %c0_89 = arith.constant 0 : index
    %c0_90 = arith.constant 0 : index
    %c0_91 = arith.constant 0 : index
    %282 = vector.load %arg12[%c0_89, %c0_90, %c0_91] : memref<1x64x32xbf16, #tpu.memory_space<vmem>>, vector<1x64x32xbf16>
    %283 = vector.shape_cast %282 : vector<1x64x32xbf16> to vector<64x32xbf16>
    %284 = arith.truncf %281 : vector<16x64xf32> to vector<16x64xbf16>
    %cst_92 = arith.constant dense<0.000000e+00> : vector<16x32xf32>
    %285 = tpu.matmul %284, %283, %cst_92 {dimension_numbers = #tpu.dot_dimension_numbers<[1], [0], [0], [1], [0, 0, 1, 1], [], []>} : vector<16x64xbf16>, vector<64x32xbf16>, vector<16x32xf32> -> vector<16x32xf32>
    %286 = vector.broadcast %19 : vector<1x32xf32> to vector<16x32xf32>
    %287 = arith.addf %285, %286 : vector<16x32xf32>
    %288 = arith.addf %273, %287 : vector<16x32xf32>
    %cst_93 = arith.constant dense<0.000000e+00> : vector<16xf32>
    %289 = vector.multi_reduction <add>, %288, %cst_93 [1] : vector<16x32xf32> to vector<16xf32>
    %290 = vector.shape_cast %289 : vector<16xf32> to vector<16x1xf32>
    %cst_94 = arith.constant 3.200000e+01 : f32
    %291 = vector.broadcast %cst_94 : f32 to vector<16x1xf32>
    %292 = arith.divf %290, %291 : vector<16x1xf32>
    %293 = vector.broadcast %292 : vector<16x1xf32> to vector<16x32xf32>
    %294 = arith.subf %288, %293 : vector<16x32xf32>
    %295 = arith.mulf %294, %294 : vector<16x32xf32>
    %cst_95 = arith.constant dense<0.000000e+00> : vector<16xf32>
    %296 = vector.multi_reduction <add>, %295, %cst_95 [1] : vector<16x32xf32> to vector<16xf32>
    %297 = vector.shape_cast %296 : vector<16xf32> to vector<16x1xf32>
    %cst_96 = arith.constant 3.200000e+01 : f32
    %298 = vector.broadcast %cst_96 : f32 to vector<16x1xf32>
    %299 = arith.divf %297, %298 : vector<16x1xf32>
    %300 = vector.broadcast %292 : vector<16x1xf32> to vector<16x32xf32>
    %301 = arith.subf %288, %300 : vector<16x32xf32>
    %cst_97 = arith.constant 9.99999974E-6 : f32
    %302 = vector.broadcast %cst_97 : f32 to vector<16x1xf32>
    %303 = arith.addf %299, %302 : vector<16x1xf32>
    %304 = math.rsqrt %303 : vector<16x1xf32>
    %305 = vector.broadcast %304 : vector<16x1xf32> to vector<16x32xf32>
    %306 = arith.mulf %301, %305 : vector<16x32xf32>
    %307 = vector.broadcast %20 : vector<1x32xf32> to vector<16x32xf32>
    %308 = arith.mulf %306, %307 : vector<16x32xf32>
    %309 = vector.broadcast %21 : vector<1x32xf32> to vector<16x32xf32>
    %310 = arith.addf %308, %309 : vector<16x32xf32>
    %c1_i32 = arith.constant 1 : i32
    %311 = arith.cmpi ne, %arg1, %c1_i32 : i32
    %312 = arith.extui %311 : i1 to i32
    %c0_i32_98 = arith.constant 0 : i32
    %313 = arith.cmpi ne, %312, %c0_i32_98 : i32
    scf.if %313 {
      %317 = vector.shape_cast %310 : vector<16x32xf32> to vector<2x8x32xf32>
      %c0_101 = arith.constant 0 : index
      %c0_102 = arith.constant 0 : index
      %c0_103 = arith.constant 0 : index
      %318 = vector.load %arg15[%c0_101, %c0_102, %c0_103] : memref<2x8x32xf32, #tpu.memory_space<vmem>>, vector<2x8x32xf32>
      tpu.vector_store %arg15[%c0_101, %c0_102, %c0_103], %317 {strides = array<i32>} : memref<2x8x32xf32, #tpu.memory_space<vmem>>, vector<2x8x32xf32>,
    } else {
    }
    %c1_i32_99 = arith.constant 1 : i32
    %314 = arith.cmpi eq, %arg1, %c1_i32_99 : i32
    %315 = arith.extui %314 : i1 to i32
    %c0_i32_100 = arith.constant 0 : i32
    %316 = arith.cmpi ne, %315, %c0_i32_100 : i32
    scf.if %316 {
      %c0_101 = arith.constant 0 : index
      %c0_102 = arith.constant 0 : index
      %317 = vector.load %arg14[%c0_101, %c0_102] : memref<2x32xf32, #tpu.memory_space<vmem>>, vector<1x32xf32>
      %c1 = arith.constant 1 : index
      %c0_103 = arith.constant 0 : index
      %318 = vector.load %arg14[%c1, %c0_103] : memref<2x32xf32, #tpu.memory_space<vmem>>, vector<1x32xf32>
      %cst_104 = arith.constant dense<0.000000e+00> : vector<16xf32>
      %319 = vector.multi_reduction <add>, %310, %cst_104 [1] : vector<16x32xf32> to vector<16xf32>
      %320 = vector.shape_cast %319 : vector<16xf32> to vector<16x1xf32>
      %cst_105 = arith.constant 3.200000e+01 : f32
      %321 = vector.broadcast %cst_105 : f32 to vector<16x1xf32>
      %322 = arith.divf %320, %321 : vector<16x1xf32>
      %323 = vector.broadcast %322 : vector<16x1xf32> to vector<16x32xf32>
      %324 = arith.subf %310, %323 : vector<16x32xf32>
      %325 = arith.mulf %324, %324 : vector<16x32xf32>
      %cst_106 = arith.constant dense<0.000000e+00> : vector<16xf32>
      %326 = vector.multi_reduction <add>, %325, %cst_106 [1] : vector<16x32xf32> to vector<16xf32>
      %327 = vector.shape_cast %326 : vector<16xf32> to vector<16x1xf32>
      %cst_107 = arith.constant 3.200000e+01 : f32
      %328 = vector.broadcast %cst_107 : f32 to vector<16x1xf32>
      %329 = arith.divf %327, %328 : vector<16x1xf32>
      %330 = vector.broadcast %322 : vector<16x1xf32> to vector<16x32xf32>
      %331 = arith.subf %310, %330 : vector<16x32xf32>
      %cst_108 = arith.constant 9.99999974E-6 : f32
      %332 = vector.broadcast %cst_108 : f32 to vector<16x1xf32>
      %333 = arith.addf %329, %332 : vector<16x1xf32>
      %334 = math.rsqrt %333 : vector<16x1xf32>
      %335 = vector.broadcast %334 : vector<16x1xf32> to vector<16x32xf32>
      %336 = arith.mulf %331, %335 : vector<16x32xf32>
      %337 = vector.broadcast %317 : vector<1x32xf32> to vector<16x32xf32>
      %338 = arith.mulf %336, %337 : vector<16x32xf32>
      %339 = vector.broadcast %318 : vector<1x32xf32> to vector<16x32xf32>
      %340 = arith.addf %338, %339 : vector<16x32xf32>
      %341 = vector.shape_cast %340 : vector<16x32xf32> to vector<2x8x32xf32>
      %c0_109 = arith.constant 0 : index
      %c0_110 = arith.constant 0 : index
      %c0_111 = arith.constant 0 : index
      %342 = vector.load %arg15[%c0_109, %c0_110, %c0_111] : memref<2x8x32xf32, #tpu.memory_space<vmem>>, vector<2x8x32xf32>
      tpu.vector_store %arg15[%c0_109, %c0_110, %c0_111], %341 {strides = array<i32>} : memref<2x8x32xf32, #tpu.memory_space<vmem>>, vector<2x8x32xf32>,
    } else {
    }
    return
  }
  func.func @transform_0(%arg0: i32, %arg1: i32) -> (i32, i32, i32) {
    %c0_i32 = arith.constant 0 : i32
    %c0_i32_0 = arith.constant 0 : i32
    %c0_i32_1 = arith.constant 0 : i32
    return %arg0, %c0_i32, %c0_i32_0 : i32, i32, i32
  }
  func.func @transform_1(%arg0: i32, %arg1: i32) -> (i32, i32, i32) {
    %c0_i32 = arith.constant 0 : i32
    %c0_i32_0 = arith.constant 0 : i32
    %c0_i32_1 = arith.constant 0 : i32
    return %arg0, %c0_i32, %c0_i32_0 : i32, i32, i32
  }
  func.func @transform_2(%arg0: i32, %arg1: i32) -> (i32, i32, i32) {
    %c0_i32 = arith.constant 0 : i32
    %c0_i32_0 = arith.constant 0 : i32
    %c0_i32_1 = arith.constant 0 : i32
    return %arg0, %c0_i32, %c0_i32_0 : i32, i32, i32
  }
  func.func @transform_3(%arg0: i32, %arg1: i32) -> (i32, i32, i32) {
    %c0_i32 = arith.constant 0 : i32
    %c0_i32_0 = arith.constant 0 : i32
    %c0_i32_1 = arith.constant 0 : i32
    return %arg0, %c0_i32, %c0_i32_0 : i32, i32, i32
  }
  func.func @transform_4(%arg0: i32, %arg1: i32) -> (i32, i32, i32) {
    %c0_i32 = arith.constant 0 : i32
    %c0_i32_0 = arith.constant 0 : i32
    %c0_i32_1 = arith.constant 0 : i32
    return %arg1, %c0_i32, %c0_i32_0 : i32, i32, i32
  }
  func.func @transform_5(%arg0: i32, %arg1: i32) -> (i32, i32, i32) {
    %c0_i32 = arith.constant 0 : i32
    %c0_i32_0 = arith.constant 0 : i32
    %c0_i32_1 = arith.constant 0 : i32
    return %arg1, %c0_i32, %c0_i32_0 : i32, i32, i32
  }
  func.func @transform_6(%arg0: i32, %arg1: i32) -> (i32, i32, i32) {
    %c0_i32 = arith.constant 0 : i32
    %c0_i32_0 = arith.constant 0 : i32
    %c0_i32_1 = arith.constant 0 : i32
    return %arg1, %c0_i32, %c0_i32_0 : i32, i32, i32
  }
  func.func @transform_7(%arg0: i32, %arg1: i32) -> (i32, i32, i32) {
    %c0_i32 = arith.constant 0 : i32
    %c0_i32_0 = arith.constant 0 : i32
    %c0_i32_1 = arith.constant 0 : i32
    return %arg1, %c0_i32, %c0_i32_0 : i32, i32, i32
  }
  func.func @transform_8(%arg0: i32, %arg1: i32) -> (i32, i32, i32) {
    %c0_i32 = arith.constant 0 : i32
    %c0_i32_0 = arith.constant 0 : i32
    %c0_i32_1 = arith.constant 0 : i32
    return %arg1, %c0_i32, %c0_i32_0 : i32, i32, i32
  }
  func.func @transform_9(%arg0: i32, %arg1: i32) -> (i32, i32, i32) {
    %c0_i32 = arith.constant 0 : i32
    %c0_i32_0 = arith.constant 0 : i32
    %c0_i32_1 = arith.constant 0 : i32
    return %arg1, %c0_i32, %c0_i32_0 : i32, i32, i32
  }
  func.func @transform_10(%arg0: i32, %arg1: i32) -> (i32, i32, i32) {
    %c0_i32 = arith.constant 0 : i32
    %c0_i32_0 = arith.constant 0 : i32
    %c0_i32_1 = arith.constant 0 : i32
    return %arg1, %c0_i32, %c0_i32_0 : i32, i32, i32
  }
  func.func @transform_11(%arg0: i32, %arg1: i32) -> (i32, i32, i32) {
    %c0_i32 = arith.constant 0 : i32
    %c0_i32_0 = arith.constant 0 : i32
    %c0_i32_1 = arith.constant 0 : i32
    return %arg1, %c0_i32, %c0_i32_0 : i32, i32, i32
  }
  func.func @transform_12(%arg0: i32, %arg1: i32) -> (i32, i32) {
    %c0_i32 = arith.constant 0 : i32
    %c0_i32_0 = arith.constant 0 : i32
    %c0_i32_1 = arith.constant 0 : i32
    return %c0_i32, %c0_i32_0 : i32, i32
  }
  func.func @transform_13(%arg0: i32, %arg1: i32) -> (i32, i32, i32) {
    %c0_i32 = arith.constant 0 : i32
    %c0_i32_0 = arith.constant 0 : i32
    %c0_i32_1 = arith.constant 0 : i32
    return %arg0, %c0_i32, %c0_i32_0 : i32, i32, i32
  }
}

</mosaic_0001>

<bundles_post_ra>
// kernel: tpu_custom_call.1
= control target key start
LH: loop header
LB: loop body
LE: loop exit
PB: predicated region body
PF: predicated region fallthrough
CT: control target
= control target key end

     0   :  { %s5567_s0 = inlined_call_operand.hbm [shape: f32[2,8,32], index: 0, kind: input, shape index: {}]   ;;  %s5568_s1 = inlined_call_operand.hbm [shape: f32[2,8,32], index: 1, kind: input, shape index: {}]   ;;  %s5569_s2 = inlined_call_operand.hbm [shape: bf16[2,8,8], index: 2, kind: input, shape index: {}]   ;;  %s5570_s3 = inlined_call_operand.hbm [shape: bf16[2,8,8], index: 3, kind: input, shape index: {}]   ;;  %s5571_s4 = inlined_call_operand.vmem [shape: bf16[2,32,96], index: 4, kind: input, shape index: {}]   ;;  %s5572_s5 = inlined_call_operand.vmem [shape: bf16[2,32,32], index: 5, kind: input, shape index: {}]   ;;  %s5573_s6 = inlined_call_operand.vmem [shape: bf16[2,32,32], index: 6, kind: input, shape index: {}]   ;;  %s5574_s7 = inlined_call_operand.hbm [shape: bf16[2,32,64], index: 7, kind: input, shape index: {}]   ;;  %s5575_s8 = inlined_call_operand.hbm [shape: bf16[2,32,32], index: 8, kind: input, shape index: {}]   ;;  %s5576_s9 = inlined_call_operand.hbm [shape: bf16[2,32,64], index: 9, kind: input, shape index: {}]   ;;  %s5577_s10 = inlined_call_operand.vmem [shape: bf16[2,64,32], index: 10, kind: input, shape index: {}]   ;;  %s5578_s11 = inlined_call_operand.hbm [shape: f32[2,16,128], index: 11, kind: input, shape index: {}]   ;;  %s5579_s12 = inlined_call_operand.vmem [shape: f32[2,32], index: 12, kind: input, shape index: {}]   ;;  %s5580_s13 = inlined_call_operand.hbm [shape: f32[2,8,32], index: 13, kind: output, shape index: {}]  }
   0x1   :  { %5607 = sst [smem:[#allocation26_spill]] %s5567_s0 }
   0x2   :  { %5608 = sst [smem:[#allocation27_spill]] %s5568_s1 }
   0x3   :  { %5609 = sst [smem:[#allocation28_spill]] %s5571_s4 }
   0x4   :  { %5610 = sst [smem:[#allocation29_spill]] %s5572_s5 }
   0x5   :  { %5611 = sst [smem:[#allocation30_spill]] %s5573_s6 }
   0x6   :  { %5612 = sst [smem:[#allocation31_spill]] %s5574_s7 }
   0x7   :  { %5613 = sst [smem:[#allocation32_spill]] %s5575_s8 }
   0x8   :  { %5614 = sst [smem:[#allocation33_spill]] %s5576_s9 }
   0x9   :  { %5615 = sst [smem:[#allocation34_spill]] %s5577_s10 }
   0xa   :  { %5616 = sst [smem:[#allocation35_spill]] %s5579_s12 }
   0xb   :  { %5617 = sst [smem:[#allocation36_spill]] %s5580_s13 }
   0xc   :  { %18 = vsyncpa [#allocation3], 0 }
   0xd   :  { %19 = vsyncpa [#allocation6], 0 }
   0xe   :  { %20 = vsyncpa [#allocation9], 0 }
   0xf   :  { %21 = vsyncpa [#allocation4], 0  ;;  %s4650_s25 = smov 0   ;;  %s4652_s26 = smov 0  }
  0x10   :  { %s4654_s27 = smov 0   ;;  %s4656_s28 = smov 0  }
  0x11   :  { %s4658_s29 = smov 0   ;;  %s4660_s30 = smov 0  }
  0x12 LB: > { %5618 = sst [smem:[#allocation20_spill]] %s4536_s27  ;;  %s4679_s14 = sadd.s32 4294967295, %s4548_s30   ;;  %s4548_s30 = sphi %s4660_s30, %s27_s30   ;;  %s4544_s29 = sphi %s4658_s29, %s5671_s29   ;;  %s4540_s28 = sphi %s4656_s28, %s5670_s28   ;;  %s4536_s27 = sphi %s4654_s27, %s5674_s27   ;;  %s4532_s26 = sphi %s4652_s26, %s5673_s26   ;;  %s4528_s25 = sphi %s4650_s25, %s5672_s25  }
  0x13   : > { %5619 = sst [smem:[#allocation21_spill]] %s4540_s28  ;;  %p235_p0 = scmp.ne.s32.totalorder %s4536_s27, %s4532_s26 }
  0x14   : > { %5620 = sst [smem:[#allocation22_spill]] %s4544_s29  ;;  %p236_p1 = scmp.eq.s32.totalorder %s4548_s30, 0 }
  0x15   : > { %5621 = sst [smem:[#allocation23_spill]] %s4548_s30  ;;  %p241_p2 = scmp.ne.s32.totalorder %s4532_s26, %s4528_s25 }
  0x16   : > { %p5583_p3 = scmp.eq.s32.totalorder %s4679_s14, 0  ;;  %p3504_p4 = scmp.ge.s32.totalorder %s4548_s30, 1 }
  0x17   : > { %p4687_p5 = por %p236_p1, %p235_p0  ;;  %p403_p6 = scmp.lt.s32.totalorder %s4548_s30, 3 }
  0x18   : > { %p4694_p7 = por %p5583_p3, %p241_p2  ;;  %s4550_s18 = smov [#allocation2]  }
  0x19   : > { %s5622_s15 = scalar_select %p4687_p5, 1, 0 }
  0x1a   : > { %s5623_s16 = scalar_select %p4694_p7, 1, 0 }
  0x1b   : > { %p4698_p8 = pnand %p3504_p4, %p403_p6  ;;  %s418_s19 = sshll.u32 %s4550_s18, 4  ;;  %s419_s19 = int_to_ptr.vmem [resolvable:$true] %s418_s19 }
  0x1c   : > { %s36_s22 = sadd.s32 1, %s4544_s29  ;;  %s5626_s0 = sld [smem:[#allocation26_spill]] }
  0x1d   : > { %s5624_s17 = scalar_select %p4698_p8, 1, 0 }
  0x1e   : > { %p3986_p9 = pneg %p4698_p8 }
  0x20   : > { %p4706_p10 = pnand %p3986_p9, %p5583_p3 }
  0x22   : > { %s5625_s20 = scalar_select %p4706_p10, 1, 0 }
  0x23   : > { %s4224_s25 = scalar_lea.hbm %s5626_s0, 256  ;;  %p4720_p12 = pneg %p4706_p10 }
  0x24   : > { %p4225_p11 = scmp.ne.s32.totalorder %s5626_s0, %s4224_s25  ;;  %p4231_p1 = scmp.lt.u32.totalorder %s4224_s25, %s5626_s0 }
  0x25   : > { %s5627_s18 = scalar_select %p4720_p12, 1, 0 }
  0x26   : > { %p4227_p13 = pnand %p4720_p12, %p4225_p11 }
  0x28   : > { %p4228_p0 = pneg %p4227_p13 }
  0x2a   : > { %p4233_p2 = pnand %p4231_p1, %p4228_p0 }
  0x2c   : > { %4236 = shalt.err (!%p4233_p2)
}
  0x2d   : > { %s4237_s23 = scalar_lea.vmem %s419_s19, 256  ;;  %p4245_p3 = scmp.lt.s32.totalorder %s419_s19, %s419_s19 }
  0x2e   : > { %p4238_p4 = scmp.ne.s32.totalorder %s419_s19, %s4237_s23  ;;  %p4246_p7 = scmp.lt.s32.totalorder %s4237_s23, %s4237_s23 }
  0x30   : > { %p4240_p6 = pnand %p4238_p4, %p4720_p12  ;;  %p4247_p8 = por %p4246_p7, %p4245_p3 }
  0x32   : > { %p4241_p9 = pneg %p4240_p6 }
  0x34   : > { %p4248_p5 = pnand %p4247_p8, %p4241_p9 }
  0x36   : > { %4251 = shalt.err (!%p4248_p5)
}
  0x37   : > { %s5586_s12 = smov 128   ;;  %s5588_s10 = smov 8  }
  0x38   : > { %3989 = dma.hbm_to_vmem [thread:$0]  (!%p4706_p10), %s5626_s0, 256, %s419_s19, [#allocation3], %s5586_s12, %s5586_s12, %s5588_s10  }
  0x39   : > { %p37_p3 = scmp.ge.s32.totalorder %s36_s22, 2  ;;  %p4016_p5 = scmp.lt.s32.totalorder %s4548_s30, 2 }
  0x3a   : > { %s507_s24 = sand.u32 1, %s4548_s30   ;;  %s509_s25 = sand.u32 1, %s4536_s27  }
  0x3b   : > { %s5676_s22 = smov (%p37_p3, %s36_s22), 0  ;;  %s4746_s6 = sshll.u32 %s509_s25, 4 }
  0x3c   : > { %5628 = sst [smem:[#allocation24_spill]] %s5676_s22  ;;  %s225_s23 = ssub.s32 %s4544_s29, %s5676_s22 }
  0x3d   : > { %p226_p7 = scmp.eq.s32.totalorder %s225_s23, 0  ;;  %s4749_s5 = sshll.u32 %s4544_s29, 8 }
  0x3e   : > { %s5629_s4 = sadd.s32 1, %s4536_s27  ;;  %s5631_s7 = sld [smem:[#allocation31_spill]] }
  0x3f   : > { %s4754_s13 = scalar_select %p226_p7, %s4536_s27, %s5629_s4  }
  0x40   : > { %s511_s23 = scalar_lea.vmem [#allocation10], %s4746_s6  ;;  %p5632_p8 = scmp.ne.s32.totalorder %s5622_s15, 0 }
  0x41   : > { %5630 = sst [smem:[#allocation25_spill]] %s4754_s13  ;;  %s518_s25 = sshll.u32 %s511_s23, 4  ;;  %s4763_s25 = int_to_ptr.vmem [resolvable:$true] %s518_s25 }
  0x42   : > { %p4769_p11 = pnand %p4016_p5, %p5632_p8  ;;  %s5634_s8 = sld [smem:[#allocation32_spill]] }
  0x43   : > { %s532_s21 = scalar_lea.vmem [#allocation11], %s4746_s6  ;;  %s4782_s29 = scalar_lea.sflag [#allocation3], %s507_s24 }
  0x44   : > { %s4760_s12 = scalar_lea.hbm %s5631_s7, %s4749_s5  ;;  %s4780_s22 = sshll.u32 %s532_s21, 4  ;;  %s4816_s22 = int_to_ptr.vmem [resolvable:$true] %s4780_s22 }
  0x45   : > { %s5633_s10 = scalar_select %p4769_p11, 1, 0 }
  0x46   : > { %s4252_s23 = scalar_lea.hbm %s4760_s12, 256  ;;  %p4788_p0 = pneg %p4769_p11 }
  0x47   : > { %p4253_p13 = scmp.ne.s32.totalorder %s4760_s12, %s4252_s23  ;;  %s4257_s13 = scalar_lea.hbm %s5631_s7, 512 }
  0x48   : > { %s4777_s19 = scalar_lea.hbm %s5634_s8, %s4749_s5  ;;  %p4258_p4 = scmp.lt.u32.totalorder %s4760_s12, %s5631_s7 }
  0x49   : > { %s5635_s15 = scalar_select %p4788_p0, 1, 0 }
  0x4a   : > { %p4255_p1 = pnand %p4788_p0, %p4253_p13  ;;  %p4259_p6 = scmp.lt.u32.totalorder %s4257_s13, %s4252_s23 }
  0x4b   : > { %p4261_p3 = scmp.lt.u32.totalorder %s4252_s23, %s4760_s12 }
  0x4c   : > { %p4256_p2 = pneg %p4255_p1  ;;  %p4260_p9 = por %p4259_p6, %p4258_p4 }
  0x4e   : > { %p4262_p5 = por %p4261_p3, %p4260_p9 }
  0x50   : > { %p4263_p7 = pnand %p4262_p5, %p4256_p2 }
  0x52   : > { %4266 = shalt.err (!%p4263_p7)
}
  0x53   : > { %s4267_s24 = scalar_lea.vmem %s4763_s25, 256  ;;  %s4553_s0 = smov [#allocation10]  }
  0x54   : > { %p4268_p8 = scmp.ne.s32.totalorder %s4763_s25, %s4267_s24  ;;  %s4272_s4 = sshll.u32 %s4553_s0, 4  ;;  %s4273_s4 = int_to_ptr.vmem [resolvable:$false] %s4272_s4 }
  0x55   : > { %s4274_s27 = scalar_lea.vmem %s4273_s4, 512  ;;  %p4275_p10 = scmp.lt.s32.totalorder %s4763_s25, %s4273_s4 }
  0x56   : > { %p4270_p13 = pnand %p4268_p8, %p4788_p0  ;;  %p4276_p12 = scmp.lt.s32.totalorder %s4274_s27, %s4267_s24 }
  0x58   : > { %p4271_p1 = pneg %p4270_p13  ;;  %p4277_p4 = por %p4276_p12, %p4275_p10 }
  0x5a   : > { %p4278_p6 = pnand %p4277_p4, %p4271_p1 }
  0x5c   : > { %4281 = shalt.err (!%p4278_p6)
}
  0x5d   : > { %s5600_s13 = smov 64   ;;  %s5602_s23 = smov 4  }
  0x5e   : > { %4002 = dma.hbm_to_vmem [thread:$0]  (!%p4769_p11), %s4760_s12, 256, %s4763_s25, %s4782_s29, %s5600_s13, %s5600_s13, %s5602_s23  }
  0x5f   : > { %s4282_s21 = scalar_lea.hbm %s4777_s19, 256  ;;  %s4287_s4 = scalar_lea.hbm %s5634_s8, 512 }
  0x60   : > { %p4283_p10 = scmp.ne.s32.totalorder %s4777_s19, %s4282_s21  ;;  %p4288_p9 = scmp.lt.u32.totalorder %s4777_s19, %s5634_s8 }
  0x61   : > { %p4289_p3 = scmp.lt.u32.totalorder %s4287_s4, %s4282_s21  ;;  %p4291_p7 = scmp.lt.u32.totalorder %s4282_s21, %s4777_s19 }
  0x62   : > { %p4285_p12 = pnand %p4283_p10, %p4788_p0 }
  0x63   : > { %p4290_p5 = por %p4289_p3, %p4288_p9 }
  0x64   : > { %p4286_p2 = pneg %p4285_p12 }
  0x65   : > { %p4292_p8 = por %p4291_p7, %p4290_p5 }
  0x67   : > { %p4293_p13 = pnand %p4292_p8, %p4286_p2 }
  0x69   : > { %4296 = shalt.err (!%p4293_p13)
}
  0x6a   : > { %s4297_s12 = scalar_lea.vmem %s4816_s22, 256  ;;  %s4556_s25 = smov [#allocation11]  }
  0x6b   : > { %p4298_p1 = scmp.ne.s32.totalorder %s4816_s22, %s4297_s12  ;;  %s4302_s24 = sshll.u32 %s4556_s25, 4  ;;  %s4303_s24 = int_to_ptr.vmem [resolvable:$false] %s4302_s24 }
  0x6c   : > { %s4304_s7 = scalar_lea.vmem %s4303_s24, 512  ;;  %p4305_p10 = scmp.lt.s32.totalorder %s4816_s22, %s4303_s24 }
  0x6d   : > { %p4300_p4 = pnand %p4298_p1, %p4788_p0  ;;  %p4306_p12 = scmp.lt.s32.totalorder %s4304_s7, %s4297_s12 }
  0x6f   : > { %p4301_p6 = pneg %p4300_p4  ;;  %p4307_p9 = por %p4306_p12, %p4305_p10 }
  0x71   : > { %p4308_p3 = pnand %p4307_p9, %p4301_p6 }
  0x73   : > { %4311 = shalt.err (!%p4308_p3)
}
  0x74   : > { %4005 = dma.hbm_to_vmem [thread:$0]  (!%p4769_p11), %s4777_s19, 256, %s4816_s22, %s4782_s29, %s5600_s13, %s5600_s13, %s5602_s23  }
  0x75   : > { %s4557_s21 = smov [#allocation5]   ;;  %s5636_s9 = sld [smem:[#allocation33_spill]] }
  0x76   : > { %s434_s0 = sshll.u32 %s4557_s21, 4  ;;  %s5637_s1 = sld [smem:[#allocation27_spill]]  ;;  %s435_s0 = int_to_ptr.vmem [resolvable:$true] %s434_s0 }
  0x77   : > { %p5638_p5 = scmp.ne.s32.totalorder %s5627_s18, 0 }
  0x7b   : > { %s4847_s12 = scalar_lea.hbm %s5636_s9, %s4749_s5 }
  0x7c   : > { %s4312_s7 = scalar_lea.hbm %s5637_s1, 256 }
  0x7d   : > { %p4313_p2 = scmp.ne.s32.totalorder %s5637_s1, %s4312_s7  ;;  %p4319_p13 = scmp.lt.u32.totalorder %s4312_s7, %s5637_s1 }
  0x7f   : > { %p4315_p7 = pnand %p4313_p2, %p5638_p5 }
  0x81   : > { %p4316_p8 = pneg %p4315_p7 }
  0x83   : > { %p4321_p1 = pnand %p4319_p13, %p4316_p8 }
  0x85   : > { %4324 = shalt.err (!%p4321_p1)
}
  0x86   : > { %s4325_s21 = scalar_lea.vmem %s435_s0, 256  ;;  %p4333_p12 = scmp.lt.s32.totalorder %s435_s0, %s435_s0 }
  0x87   : > { %p4326_p4 = scmp.ne.s32.totalorder %s435_s0, %s4325_s21  ;;  %p4334_p9 = scmp.lt.s32.totalorder %s4325_s21, %s4325_s21 }
  0x89   : > { %p4328_p6 = pnand %p4326_p4, %p5638_p5  ;;  %p4335_p3 = por %p4334_p9, %p4333_p12 }
  0x8b   : > { %p4329_p10 = pneg %p4328_p6 }
  0x8d   : > { %p4336_p11 = pnand %p4335_p3, %p4329_p10 }
  0x8f   : > { %4339 = shalt.err (!%p4336_p11)
}
  0x90   : > { %p5639_p2 = scmp.ne.s32.totalorder %s5625_s20, 0  ;;  %s5640_s8 = smov 8  }
  0x91   : > { %s5641_s30 = smov 128   ;;  %s553_s25 = scalar_lea.vmem [#allocation12], %s4746_s6 }
  0x92   : > { %3992 = dma.hbm_to_vmem [thread:$0]  (!%p5639_p2), %s5637_s1, 256, %s435_s0, [#allocation6], %s5641_s30, %s5641_s30, %s5640_s8  }
  0x93   : > { %s560_s24 = sshll.u32 %s553_s25, 4  ;;  %s4558_s7 = smov [#allocation7]   ;;  %s4871_s24 = int_to_ptr.vmem [resolvable:$true] %s560_s24 }
  0x94   : > { %s4873_s22 = sshll.u32 %s4558_s7, 4  ;;  %s4340_s19 = scalar_lea.hbm %s4847_s12, 256  ;;  %s451_s22 = int_to_ptr.vmem [resolvable:$true] %s4873_s22 }
  0x95   : > { %p4341_p11 = scmp.ne.s32.totalorder %s4847_s12, %s4340_s19  ;;  %s4345_s27 = scalar_lea.hbm %s5636_s9, 512 }
  0x96   : > { %p4346_p13 = scmp.lt.u32.totalorder %s4847_s12, %s5636_s9  ;;  %p4347_p1 = scmp.lt.u32.totalorder %s4345_s27, %s4340_s19 }
  0x97   : > { %p4343_p7 = pnand %p4341_p11, %p4788_p0  ;;  %p4349_p6 = scmp.lt.u32.totalorder %s4340_s19, %s4847_s12 }
  0x98   : > { %p4348_p4 = por %p4347_p1, %p4346_p13 }
  0x99   : > { %p4344_p8 = pneg %p4343_p7 }
  0x9a   : > { %p4350_p10 = por %p4349_p6, %p4348_p4 }
  0x9c   : > { %p4351_p12 = pnand %p4350_p10, %p4344_p8 }
  0x9e   : > { %4354 = shalt.err (!%p4351_p12)
}
  0x9f   : > { %s4355_s0 = scalar_lea.vmem %s4871_s24, 256  ;;  %s4559_s25 = smov [#allocation12]  }
  0xa0   : > { %p4356_p9 = scmp.ne.s32.totalorder %s4871_s24, %s4355_s0  ;;  %s4360_s7 = sshll.u32 %s4559_s25, 4  ;;  %s4361_s7 = int_to_ptr.vmem [resolvable:$false] %s4360_s7 }
  0xa1   : > { %s4362_s13 = scalar_lea.vmem %s4361_s7, 512  ;;  %p4363_p7 = scmp.lt.s32.totalorder %s4871_s24, %s4361_s7 }
  0xa2   : > { %p4358_p3 = pnand %p4356_p9, %p4788_p0  ;;  %p4364_p2 = scmp.lt.s32.totalorder %s4362_s13, %s4355_s0 }
  0xa4   : > { %p4359_p11 = pneg %p4358_p3  ;;  %p4365_p13 = por %p4364_p2, %p4363_p7 }
  0xa6   : > { %p4366_p1 = pnand %p4365_p13, %p4359_p11 }
  0xa8   : > { %4369 = shalt.err (!%p4366_p1)
}
  0xa9   : > { %p5642_p8 = scmp.ne.s32.totalorder %s5633_s10, 0  ;;  %s5643_s23 = smov 4  }
  0xaa   : > { %s5644_s19 = smov 64   ;;  %s4370_s27 = scalar_lea.hbm %s5569_s2, 128 }
  0xab   : > { %4008 = dma.hbm_to_vmem [thread:$0]  (!%p5642_p8), %s4847_s12, 256, %s4871_s24, %s4782_s29, %s5644_s19, %s5644_s19, %s5643_s23  }
  0xac   : > { %p4371_p2 = scmp.ne.s32.totalorder %s5569_s2, %s4370_s27  ;;  %p4377_p10 = scmp.lt.u32.totalorder %s4370_s27, %s5569_s2 }
  0xae   : > { %p4373_p4 = pnand %p4371_p2, %p5638_p5 }
  0xb0   : > { %p4374_p6 = pneg %p4373_p4 }
  0xb2   : > { %p4379_p12 = pnand %p4377_p10, %p4374_p6 }
  0xb4   : > { %4382 = shalt.err (!%p4379_p12)
}
  0xb5   : > { %s4383_s1 = scalar_lea.vmem %s451_s22, 128  ;;  %p4391_p7 = scmp.lt.s32.totalorder %s451_s22, %s451_s22 }
  0xb6   : > { %p4384_p9 = scmp.ne.s32.totalorder %s451_s22, %s4383_s1  ;;  %p4392_p13 = scmp.lt.s32.totalorder %s4383_s1, %s4383_s1 }
  0xb8   : > { %p4386_p3 = pnand %p4384_p9, %p5638_p5  ;;  %p4393_p1 = por %p4392_p13, %p4391_p7 }
  0xba   : > { %p4387_p11 = pneg %p4386_p3 }
  0xbc   : > { %p4394_p8 = pnand %p4393_p1, %p4387_p11 }
  0xbe   : > { %4397 = shalt.err (!%p4394_p8)
}
  0xbf   : > { %p5645_p2 = scmp.ne.s32.totalorder %s5625_s20, 0  ;;  %s4560_s21 = smov [#allocation8]  }
  0xc0   : > { %s466_s4 = sshll.u32 %s4560_s21, 4  ;;  %s4926_s1 = scalar_lea.hbm %s5578_s11, %s4749_s5  ;;  %s467_s4 = int_to_ptr.vmem [resolvable:$true] %s466_s4 }
  0xc1   : > { %3995 = dma.hbm_to_vmem [thread:$0]  (!%p5645_p2), %s5569_s2, 128, %s451_s22, [#allocation6], %s5644_s19, %s5644_s19, %s5643_s23  }
  0xc2   : > { %s4398_s13 = scalar_lea.hbm %s5570_s3, 128 }
  0xc3   : > { %p4399_p8 = scmp.ne.s32.totalorder %s5570_s3, %s4398_s13  ;;  %p4405_p10 = scmp.lt.u32.totalorder %s4398_s13, %s5570_s3 }
  0xc5   : > { %p4401_p4 = pnand %p4399_p8, %p5638_p5 }
  0xc7   : > { %p4402_p6 = pneg %p4401_p4 }
  0xc9   : > { %p4407_p12 = pnand %p4405_p10, %p4402_p6 }
  0xcb   : > { %4410 = shalt.err (!%p4407_p12)
}
  0xcc   : > { %s4411_s24 = scalar_lea.vmem %s467_s4, 128  ;;  %p4419_p7 = scmp.lt.s32.totalorder %s467_s4, %s467_s4 }
  0xcd   : > { %p4412_p9 = scmp.ne.s32.totalorder %s467_s4, %s4411_s24  ;;  %p4420_p13 = scmp.lt.s32.totalorder %s4411_s24, %s4411_s24 }
  0xcf   : > { %p4414_p3 = pnand %p4412_p9, %p5638_p5  ;;  %p4421_p1 = por %p4420_p13, %p4419_p7 }
  0xd1   : > { %p4415_p11 = pneg %p4414_p3 }
  0xd3   : > { %p4422_p0 = pnand %p4421_p1, %p4415_p11 }
  0xd5   : > { %4425 = shalt.err (!%p4422_p0)
}
  0xd6   : > { %3998 = dma.hbm_to_vmem [thread:$0]  (!%p5645_p2), %s5570_s3, 128, %s467_s4, [#allocation9], %s5644_s19, %s5644_s19, %s5643_s23  }
  0xd7   : > { %s582_s28 = scalar_lea.vmem [#allocation13], %s4746_s6  ;;  %s4426_s21 = scalar_lea.hbm %s4926_s1, 256 }
  0xd8   : > { %s589_s18 = sshll.u32 %s582_s28, 4  ;;  %p4427_p0 = scmp.ne.s32.totalorder %s4926_s1, %s4426_s21  ;;  %s4950_s18 = int_to_ptr.vmem [resolvable:$true] %s589_s18 }
  0xd9   : > { %p5646_p5 = scmp.ne.s32.totalorder %s5635_s15, 0  ;;  %s4431_s0 = scalar_lea.hbm %s5578_s11, 512 }
  0xda   : > { %p4432_p6 = scmp.lt.u32.totalorder %s4926_s1, %s5578_s11  ;;  %p4433_p10 = scmp.lt.u32.totalorder %s4431_s0, %s4426_s21 }
  0xdb   : > { %p4429_p8 = pnand %p4427_p0, %p5646_p5  ;;  %p4435_p2 = scmp.lt.u32.totalorder %s4426_s21, %s4926_s1 }
  0xdc   : > { %p4434_p12 = por %p4433_p10, %p4432_p6 }
  0xdd   : > { %p4430_p4 = pneg %p4429_p8 }
  0xde   : > { %p4436_p9 = por %p4435_p2, %p4434_p12 }
  0xe0   : > { %p4437_p3 = pnand %p4436_p9, %p4430_p4 }
  0xe2   : > { %4440 = shalt.err (!%p4437_p3)
}
  0xe3   : > { %s4441_s6 = scalar_lea.vmem %s4950_s18, 256  ;;  %s4561_s23 = smov [#allocation13]  }
  0xe4   : > { %p4442_p11 = scmp.ne.s32.totalorder %s4950_s18, %s4441_s6  ;;  %s4446_s19 = sshll.u32 %s4561_s23, 4  ;;  %s4447_s19 = int_to_ptr.vmem [resolvable:$false] %s4446_s19 }
  0xe5   : > { %s4448_s4 = scalar_lea.vmem %s4447_s19, 512  ;;  %p4449_p1 = scmp.lt.s32.totalorder %s4950_s18, %s4447_s19 }
  0xe6   : > { %p4444_p7 = pnand %p4442_p11, %p5646_p5  ;;  %p4450_p0 = scmp.lt.s32.totalorder %s4448_s4, %s4441_s6 }
  0xe8   : > { %p4445_p13 = pneg %p4444_p7  ;;  %p4451_p8 = por %p4450_p0, %p4449_p1 }
  0xea   : > { %p4452_p6 = pnand %p4451_p8, %p4445_p13 }
  0xec   : > { %4455 = shalt.err (!%p4452_p6)
}
  0xed   : > { %p5647_p4 = scmp.ne.s32.totalorder %s5633_s10, 0  ;;  %p5648_p5 = scmp.ne.s32.totalorder %s5624_s17, 0 }
  0xee   : > { %p5649_p10 = scmp.eq.s32.totalorder (!%p5648_p5), %s4679_s14, 0 }
  0xef   : > { %4011 = dma.hbm_to_vmem [thread:$0]  (!%p5647_p4), %s4926_s1, 256, %s4950_s18, %s4782_s29, %s5641_s30, %s5641_s30, %s5640_s8  }
  0xf0   : > { %601 = sbr.rel (%p5648_p5) target bundleno = 7994 (0x1f3a), region = 72 }
  0xf7   : > { %4507 = dma.done.wait (%p5649_p10), [#allocation3], 256   ;;  %p5650_p12 = pmov %p5649_p10 }
  0xf8   : > { %p5651_p2 = pmov %p5649_p10 }
  0xf9   : > { %4509 = vsyncadd (%p5650_p12), [#allocation3], 4294967040 }
  0xfa   : > { %4511 = dma.done.wait (%p5651_p2), [#allocation6], 384   ;;  %p5652_p9 = pmov %p5651_p2 }
  0xfb   : > { %p5653_p3 = pmov %p5651_p2 }
  0xfc   : > { %4513 = vsyncadd (%p5652_p9), [#allocation6], 4294966912 }
  0xfd   : > { %4515 = dma.done.wait (%p5653_p3), [#allocation9], 128   ;;  %p5654_p11 = pmov %p5651_p2 }
  0xfe   : > { %s619_s29 = sand.u32 1, %s4679_s14   ;;  %s621_s17 = sand.u32 1, %s4532_s26  }
  0xff   : > { %4517 = vsyncadd (%p5654_p11), [#allocation9], 4294967168  ;;  %s4993_s10 = sshll.u32 %s621_s17, 4  ;;  %s620_s15 = scalar_lea.sflag [#allocation3], %s619_s29 }
 0x100   : > { %s623_s8 = scalar_lea.vmem [#allocation10], %s4993_s10  ;;  %p5655_p7 = scmp.ne.s32.totalorder %s5623_s16, 0 }
 0x102   : > { %4519 = dma.done.wait (%p5655_p7), %s620_s15, 1024  }
 0x103   : > { %4521 = vsyncadd (%p5655_p7), %s620_s15, 4294966272  ;;  %s5656_s30 = sld [smem:[#allocation21_spill]]  ;;  %s5657_s5 = sld [smem:[#allocation28_spill]] }
 0x104   : > { %s5658_s21 = sld [smem:[#allocation29_spill]]  ;;  %s5659_s0 = sld [smem:[#allocation30_spill]] }
 0x105   : > { %s5660_s23 = sld [smem:[#allocation34_spill]]  ;;  %s632_s4 = scalar_lea.vmem [#allocation11], %s4993_s10 }
 0x106   : > { %s641_s29 = scalar_lea.vmem [#allocation12], %s4993_s10  ;;  %s5023_s17 = scalar_lea.vmem [#allocation13], %s4993_s10 }
 0x109   : > { %p727_p13 = scmp.lt.s32.totalorder %s5656_s30, 1  ;;  %p3539_p1 = scmp.ne.s32.totalorder %s5656_s30, 0 }
 0x10a   : > { %v753_v0 = vld [vmem:[#allocation2] sm:$0xff] (!%p3539_p1)  ;;  %vm755_vm0 = vcmask (!%p3539_p1), 261120   ;;  %v754_v1 = vld [vmem:[#allocation2 + $0x8] sm:$0xff] (!%p3539_p1) }
 0x10b   : > { %s728_s1 = scalar_select %p727_p13, %s5656_s30, 1 }
 0x10c   : > { %752 = sbr.rel (%p3539_p1) target bundleno = 275 (0x113), region = 108  ;;  %756 = vst.msk [vmem:[#allocation14] sm:$0xff] (!%p3539_p1), %vm755_vm0, %v753_v0  ;;  %757 = vst.msk [vmem:[#allocation14 + $0x8] sm:$0xff] (!%p3539_p1), %vm755_vm0, %v754_v1 }
 0x10d   : > { %s3607_s13 = sshll.u32 %s728_s1, 4  ;;  %s3610_s22 = sshll.u32 %s728_s1, 5 }
 0x10e   : > { %s731_s9 = scalar_lea.vmem %s5657_s5, %s3607_s13  ;;  %s5008_s20 = scalar_lea.vmem %s5658_s21, %s3607_s13 }
 0x10f   : > { %s5013_s25 = scalar_lea.vmem %s5659_s0, %s3607_s13  ;;  %s5018_s19 = scalar_lea.vmem %s5660_s23, %s3610_s22 }
 0x113 PF: > { %v4127_v2 = vld [vmem:[%s731_s9] sm:$0xff]   ;;  %v4562_v3 = vmov 0.0   ;;  %v4128_v4 = vld [vmem:[%s731_s9 + $0x8] sm:$0xff]   ;;  %vm4563_vm1 = vmmov 0   ;;  %v5030_v5 = vld [vmem:[#allocation14] sm:$0xff]  ;;  %vm793_vm2 = vcmask 261120   ;;  %v777_v8 = vlaneseq }
 0x114   : > { %3706 = vmatprep.subr.bf16.mxu1 %v4562_v3  ;;  %3720 = vmatprep.subr.bf16.mxu0 %v4562_v3  ;;  %v5032_v6 = vld [vmem:[#allocation14 + $0x8] sm:$0xff]  ;;  %v5047_v11 = vld [vmem:[%s5023_s17] sm:$0xff]  ;;  %s4564_s15 = smov 96   ;;  %vm847_vm3 = vcmask 64512   ;;  %s4565_s30 = smov 64   ;;  %vm976_vm4 = vcmask 1043456  }
 0x115   : > { %3707 = vmatpush3.bf16.msra.mxu1 %v4127_v2  ;;  %3710 = vmatprep.mubr.msk.bf16.mxu1 %vm4563_vm1, %v4562_v3  ;;  %v776_v7 = vpack.c.bf16 %v5032_v6, %v5030_v5  ;;  %v5043_v9 = vshrl.u32 %v777_v8, 7  ;;  %v3612_v25 = vld [vmem:[#allocation7] sm:$0xff]   ;;  %s4566_s1 = smov 88   ;;  %s4567_s13 = smov 120   ;;  %vm1766_vm5 = vcmask 130048   ;;  %vm1769_vm6 = vcmask 195584  }
 0x116   : > { %3708 = vmatprep.subr.bf16.mxu1 %v4562_v3  ;;  %3722 = vmatprep.mubr.msk.bf16.mxu0 %vm4563_vm1, %v4562_v3  ;;  %v5072_v26 = vunpack.c.l.bf16 %v3612_v25  ;;  %v5075_v33 = vunpack.c.h.bf16 %v3612_v25  ;;  %s4568_s22 = smov 56   ;;  %s4569_s12 = smov 80   ;;  %vm3139_vm7 = vcmask 523264  }
 0x117   : > { %v779_v10 = vsub.s32 0, %v5043_v9  ;;  %s4570_s24 = smov 112   ;;  %s4571_s5 = smov 48  }
 0x118   : > { %s4572_s9 = smov 72   ;;  %s4573_s28 = smov 104  }
 0x119   : > { %3709 = vmatpush3.bf16.msra.mxu1 %v4128_v4  ;;  %v780_v12 = vrot.slane %v5047_v11, %v779_v10  ;;  %s4574_s18 = smov 40   ;;  %s4575_s21 = smov 8  }
 0x11a   : > { %3714 = vmatprep.subr.bf16.mxu1 %v4562_v3  ;;  %s4576_s16 = smov 16   ;;  %s4577_s27 = smov 24  }
 0x11b   : > { %s5661_s10 = sld [smem:[#allocation21_spill]] }
 0x11c   : > { %3711 = vmatmul.mubr.msk.bf16.vlgmr.msra.gmra.mrb[0].mxu1 %vm793_vm2, %v776_v7 }
 0x11d   : > { %3716 = vmatprep.mubr.msk.bf16.mxu1 %vm4563_vm1, %v4562_v3 }
 0x121   : > { %p3595_p0 = scmp.eq.s32.totalorder %s5661_s10, 1 }
 0x1ef   : > { %v831_v13 = vpop.f32.mrb[0].mxu1 }
 0x1f0   : > { %v832_v14 = vadd.f32 %v831_v13, %v780_v12  ;;  %v3712_v15 = vpop.f32.mrb[1].mxu1 }
 0x1f1   : > { %v834_v16 = vpop.f32.mrb[2].mxu1 }
 0x1f2   : > { %v5052_v17 = vpack.c.bf16 %v832_v14, %v832_v14  ;;  %v835_v18 = vadd.f32 %v834_v16, %v780_v12  ;;  %v3713_v19 = vpop.f32.mrb[3].mxu1 }
 0x1f4   : > { %845 = vrot.lane.b32.xlu0 %v5052_v17, %s4564_s15  ;;  %v5056_v20 = vpack.c.bf16 %v835_v18, %v835_v18 }
 0x1f8   : > { %895 = vrot.lane.b32.xlu0 %v5056_v20, %s4564_s15 }
 0x266   : > { %v846_v21 = vpop.permute.xlu0 %845 }
 0x267   : > { %v852_v22 = vsel %vm847_vm3, %v846_v21, 0 }
 0x268   : > { %3715 = vmatpush3.bf16.xpose.msra.mxu1 %v852_v22 }
 0x269   : > { %3726 = vmatprep.subr.bf16.mxu1 %v4562_v3 }
 0x26a   : > { %v896_v23 = vpop.permute.xlu0 %895 }
 0x26b   : > { %v901_v24 = vsel %vm847_vm3, %v896_v23, 0 }
 0x26c   : > { %3721 = vmatpush3.bf16.xpose.msra.mxu0 %v901_v24 }
 0x26d   : > { %3732 = vmatprep.subr.bf16.mxu0 %v4562_v3 }
 0x26f   : > { %3717 = vmatmul.mubr.msk.bf16.vlgmr.msra.gmra.mrb[4].mxu1 %vm847_vm3, %v5052_v17 }
 0x270   : > { %3728 = vmatprep.mubr.msk.bf16.mxu1 %vm4563_vm1, %v4562_v3 }
 0x273   : > { %3723 = vmatmul.mubr.msk.bf16.vlgmr.msra.gmra.mrb[0].mxu0 %vm847_vm3, %v5056_v20 }
 0x274   : > { %3734 = vmatprep.mubr.msk.bf16.mxu0 %vm4563_vm1, %v4562_v3 }
 0x342   : > { %v888_v27 = vpop.f32.mrb[4].mxu1 }
 0x343   : > { %v943_v28 = vmul.f32 0.35355338, %v888_v27  ;;  %v3718_v29 = vpop.f32.mrb[5].mxu1 }
 0x344   : > { %v891_v30 = vpop.f32.mrb[6].mxu1 }
 0x345   : > { %v3719_v31 = vpop.f32.mrb[7].mxu1  ;;  %v945_v32 = vadd.f32 %v5072_v26, %v943_v28 }
 0x346   : > { %v937_v34 = vpop.f32.mrb[0].mxu0 }
 0x347   : > { %v944_v35 = vmul.f32 0.35355338, %v937_v34  ;;  %v3724_v36 = vpop.f32.mrb[1].mxu0  ;;  %v947_v37 = vsel %vm847_vm3, %v945_v32, -inf }
 0x348   : > { %v940_v38 = vpop.f32.mrb[2].mxu0  ;;  %948 = vmax.xlane.f32.xlu1 %v947_v37 }
 0x349   : > { %v3725_v39 = vpop.f32.mrb[3].mxu0  ;;  %v946_v40 = vadd.f32 %v5075_v33, %v944_v35 }
 0x34b   : > { %v950_v41 = vsel %vm847_vm3, %v946_v40, -inf }
 0x34c   : > { %951 = vmax.xlane.f32.xlu1 %v950_v41 }
 0x35d   : > { %971 = vrot.lane.b32.xlu1 %v5052_v17, %s4565_s30 }
 0x361   : > { %1020 = vrot.lane.b32.xlu1 %v5056_v20, %s4565_s30 }
 0x365   : > { %1070 = vrot.lane.b32.xlu1 %v5052_v17, %s4566_s1 }
 0x3d5   : > { %v949_v42 = vpop.xlane.xlu1 %948 }
 0x3d6   : > { %v953_v43 = vsub.f32 %v945_v32, %v949_v42 }
 0x3d8   : > { %v955_v44 = vmul.f32 1.442695, %v953_v43 }
 0x3d9   : > { %v952_v45 = vpop.xlane.xlu1 %951 }
 0x3da   : > { %4143 = vpow2.f32 %v955_v44  ;;  %v954_v46 = vsub.f32 %v946_v40, %v952_v45 }
 0x3dc   : > { %v957_v47 = vmul.f32 1.442695, %v954_v46 }
 0x3dd   : > { %v972_v48 = vpop.permute.xlu1 %971 }
 0x3de   : > { %4145 = vpow2.f32 %v957_v47  ;;  %v978_v49 = vsel %vm976_vm4, %v972_v48, 0 }
 0x3df   : > { %3727 = vmatpush3.bf16.msra.mxu1 %v978_v49 }
 0x3e0   : > { %3738 = vmatprep.subr.bf16.mxu1 %v4562_v3 }
 0x3e1   : > { %v1021_v50 = vpop.permute.xlu1 %1020 }
 0x3e2   : > { %v1026_v51 = vsel %vm976_vm4, %v1021_v50, 0 }
 0x3e3   : > { %3733 = vmatpush3.bf16.msra.mxu0 %v1026_v51 }
 0x3e4   : > { %v4144_v52 = vpop.eup %4143  ;;  %3744 = vmatprep.subr.bf16.mxu0 %v4562_v3 }
 0x3e5   : > { %v959_v53 = vsel %vm847_vm3, %v4144_v52, 0.0  ;;  %v1071_v56 = vpop.permute.xlu1 %1070 }
 0x3e6   : > { %960 = vadd.xlane.f32.xlu0 %v959_v53  ;;  %v1076_v63 = vsel %vm847_vm3, %v1071_v56, 0 }
 0x3e8   : > { %v4146_v54 = vpop.eup %4145 }
 0x3e9   : > { %v962_v55 = vsel %vm847_vm3, %v4146_v54, 0.0 }
 0x3ea   : > { %963 = vadd.xlane.f32.xlu1 %v962_v55 }
 0x3fb   : > { %1120 = vrot.lane.b32.xlu1 %v5056_v20, %s4566_s1 }
 0x3fc   : > { %1068 = vrot.lane.b32.xlu0 %v5052_v17, %s4567_s13 }
 0x3ff   : > { %1118 = vrot.lane.b32.xlu1 %v5056_v20, %s4567_s13 }
 0x473   : > { %v961_v57 = vpop.xlane.xlu0 %960 }
 0x474   : > { %4147 = vrcp.f32 %v961_v57 }
 0x477   : > { %v964_v58 = vpop.xlane.xlu1 %963  ;;  %v1069_v7 = vpop.permute.xlu0 %1068 }
 0x478   : > { %4149 = vrcp.f32 %v964_v58 }
 0x47b   : > { %v1121_v1 = vpop.permute.xlu1 %1120 }
 0x47c   : > { %v1126_v4 = vsel %vm847_vm3, %v1121_v1, 0 }
 0x47e   : > { %v4148_v59 = vpop.eup %4147 }
 0x47f   : > { %v967_v60 = vmul.f32 %v4148_v59, %v4144_v52  ;;  %v1119_v8 = vpop.permute.xlu1 %1118 }
 0x481   : > { %v969_v61 = vpack.c.bf16 %v967_v60, %v967_v60 }
 0x482   : > { %v4150_v62 = vpop.eup %4149 }
 0x483   : > { %v968_v0 = vmul.f32 %v4150_v62, %v4146_v54  ;;  %3729 = vmatmul.mubr.msk.bf16.vlgmr.msra.gmra.mrb[8].mxu1 %vm847_vm3, %v969_v61 }
 0x484   : > { %3739 = vmatpush3.bf16.xpose.msra.mxu1 %v1076_v63  ;;  %3740 = vmatprep.mubr.msk.bf16.mxu1 %vm4563_vm1, %v4562_v3 }
 0x485   : > { %v970_v2 = vpack.c.bf16 %v968_v0, %v968_v0  ;;  %3750 = vmatprep.subr.bf16.mxu1 %v4562_v3 }
 0x487   : > { %3735 = vmatmul.mubr.msk.bf16.vlgmr.msra.gmra.mrb[4].mxu0 %vm847_vm3, %v970_v2 }
 0x488   : > { %3745 = vmatpush3.bf16.xpose.msra.mxu0 %v1126_v4  ;;  %3746 = vmatprep.mubr.msk.bf16.mxu0 %vm4563_vm1, %v4562_v3 }
 0x489   : > { %3756 = vmatprep.subr.bf16.mxu0 %v4562_v3 }
 0x48b   : > { %3741 = vmatmul.mubr.msk.bf16.vlgmr.msra.gmra.mrb[12].mxu1 %vm847_vm3, %v1069_v7 }
 0x48c   : > { %3752 = vmatprep.mubr.msk.bf16.mxu1 %vm4563_vm1, %v4562_v3 }
 0x48f   : > { %3747 = vmatmul.mubr.msk.bf16.vlgmr.msra.gmra.mrb[8].mxu0 %vm847_vm3, %v1119_v8 }
 0x490   : > { %3758 = vmatprep.mubr.msk.bf16.mxu0 %vm4563_vm1, %v4562_v3 }
 0x556   : > { %v5112_v12 = vpop.f32.mrb[8].mxu1 }
 0x557   : > { %v3730_v13 = vpop.f32.mrb[9].mxu1 }
 0x558   : > { %v1017_v14 = vpop.f32.mrb[10].mxu1 }
 0x559   : > { %v3731_v15 = vpop.f32.mrb[11].mxu1 }
 0x55a   : > { %v5114_v16 = vpop.f32.mrb[4].mxu0 }
 0x55b   : > { %v3736_v18 = vpop.f32.mrb[5].mxu0 }
 0x55c   : > { %v1065_v19 = vpop.f32.mrb[6].mxu0 }
 0x55d   : > { %v3737_v21 = vpop.f32.mrb[7].mxu0 }
 0x55e   : > { %v1112_v22 = vpop.f32.mrb[12].mxu1 }
 0x55f   : > { %v1168_v23 = vmul.f32 0.35355338, %v1112_v22  ;;  %v3742_v24 = vpop.f32.mrb[13].mxu1 }
 0x560   : > { %v1115_v25 = vpop.f32.mrb[14].mxu1 }
 0x561   : > { %v3743_v27 = vpop.f32.mrb[15].mxu1  ;;  %v1170_v28 = vadd.f32 %v5072_v26, %v1168_v23 }
 0x562   : > { %v1162_v29 = vpop.f32.mrb[8].mxu0 }
 0x563   : > { %v1169_v30 = vmul.f32 0.35355338, %v1162_v29  ;;  %v3748_v31 = vpop.f32.mrb[9].mxu0  ;;  %v1172_v32 = vsel %vm847_vm3, %v1170_v28, -inf }
 0x564   : > { %v1165_v34 = vpop.f32.mrb[10].mxu0  ;;  %1173 = vmax.xlane.f32.xlu1 %v1172_v32 }
 0x565   : > { %v3749_v35 = vpop.f32.mrb[11].mxu0  ;;  %v1171_v36 = vadd.f32 %v5075_v33, %v1169_v30 }
 0x567   : > { %v1175_v37 = vsel %vm847_vm3, %v1171_v36, -inf }
 0x568   : > { %1176 = vmax.xlane.f32.xlu0 %v1175_v37 }
 0x575   : > { %1196 = vrot.lane.b32.xlu1 %v5052_v17, %s4568_s22 }
 0x579   : > { %1294 = vrot.lane.b32.xlu1 %v5052_v17, %s4569_s12 }
 0x57e   : > { %1244 = vrot.lane.b32.xlu0 %v5056_v20, %s4568_s22 }
 0x582   : > { %1292 = vrot.lane.b32.xlu0 %v5052_v17, %s4570_s24 }
 0x5f1   : > { %v1174_v38 = vpop.xlane.xlu1 %1173 }
 0x5f2   : > { %v1178_v39 = vsub.f32 %v1170_v28, %v1174_v38 }
 0x5f4   : > { %v1180_v40 = vmul.f32 1.442695, %v1178_v39 }
 0x5f5   : > { %v1177_v41 = vpop.xlane.xlu0 %1176  ;;  %v1197_v42 = vpop.permute.xlu1 %1196 }
 0x5f6   : > { %4151 = vpow2.f32 %v1180_v40  ;;  %v1179_v43 = vsub.f32 %v1171_v36, %v1177_v41  ;;  %v1202_v44 = vsel %vm976_vm4, %v1197_v42, 0 }
 0x5f7   : > { %3751 = vmatpush3.bf16.msra.mxu1 %v1202_v44 }
 0x5f8   : > { %v1182_v45 = vmul.f32 1.442695, %v1179_v43  ;;  %3762 = vmatprep.subr.bf16.mxu1 %v4562_v3 }
 0x5f9   : > { %v1245_v46 = vpop.permute.xlu0 %1244  ;;  %v1295_v52 = vpop.permute.xlu1 %1294 }
 0x5fa   : > { %4153 = vpow2.f32 %v1182_v45  ;;  %v1250_v47 = vsel %vm976_vm4, %v1245_v46, 0  ;;  %v1300_v59 = vsel %vm847_vm3, %v1295_v52, 0 }
 0x5fb   : > { %3757 = vmatpush3.bf16.msra.mxu0 %v1250_v47 }
 0x5fc   : > { %3768 = vmatprep.subr.bf16.mxu0 %v4562_v3 }
 0x5fd   : > { %v1293_v0 = vpop.permute.xlu0 %1292 }
 0x600   : > { %v4152_v48 = vpop.eup %4151 }
 0x601   : > { %v1184_v49 = vsel %vm847_vm3, %v4152_v48, 0.0 }
 0x602   : > { %1185 = vadd.xlane.f32.xlu1 %v1184_v49 }
 0x604   : > { %v4154_v50 = vpop.eup %4153 }
 0x605   : > { %v1187_v51 = vsel %vm847_vm3, %v4154_v50, 0.0 }
 0x606   : > { %1188 = vadd.xlane.f32.xlu1 %v1187_v51 }
 0x617   : > { %1344 = vrot.lane.b32.xlu1 %v5056_v20, %s4569_s12 }
 0x61b   : > { %1342 = vrot.lane.b32.xlu1 %v5056_v20, %s4570_s24 }
 0x68f   : > { %v1186_v53 = vpop.xlane.xlu1 %1185 }
 0x690   : > { %4155 = vrcp.f32 %v1186_v53 }
 0x693   : > { %v1189_v54 = vpop.xlane.xlu1 %1188 }
 0x694   : > { %4157 = vrcp.f32 %v1189_v54 }
 0x697   : > { %v1345_v61 = vpop.permute.xlu1 %1344 }
 0x698   : > { %v1350_v63 = vsel %vm847_vm3, %v1345_v61, 0 }
 0x69a   : > { %v4156_v55 = vpop.eup %4155 }
 0x69b   : > { %v1192_v56 = vmul.f32 %v4156_v55, %v4152_v48  ;;  %v1343_v1 = vpop.permute.xlu1 %1342 }
 0x69d   : > { %v1194_v57 = vpack.c.bf16 %v1192_v56, %v1192_v56 }
 0x69e   : > { %v4158_v58 = vpop.eup %4157 }
 0x69f   : > { %v1193_v60 = vmul.f32 %v4158_v58, %v4154_v50  ;;  %3753 = vmatmul.mubr.msk.bf16.vlgmr.msra.gmra.mrb[16].mxu1 %vm847_vm3, %v1194_v57 }
 0x6a0   : > { %3763 = vmatpush3.bf16.xpose.msra.mxu1 %v1300_v59  ;;  %3764 = vmatprep.mubr.msk.bf16.mxu1 %vm4563_vm1, %v4562_v3 }
 0x6a1   : > { %v1195_v62 = vpack.c.bf16 %v1193_v60, %v1193_v60  ;;  %3774 = vmatprep.subr.bf16.mxu1 %v4562_v3 }
 0x6a3   : > { %3759 = vmatmul.mubr.msk.bf16.vlgmr.msra.gmra.mrb[12].mxu0 %vm847_vm3, %v1195_v62 }
 0x6a4   : > { %3769 = vmatpush3.bf16.xpose.msra.mxu0 %v1350_v63  ;;  %3770 = vmatprep.mubr.msk.bf16.mxu0 %vm4563_vm1, %v4562_v3 }
 0x6a5   : > { %3780 = vmatprep.subr.bf16.mxu0 %v4562_v3 }
 0x6a7   : > { %3765 = vmatmul.mubr.msk.bf16.vlgmr.msra.gmra.mrb[20].mxu1 %vm847_vm3, %v1293_v0 }
 0x6a8   : > { %3776 = vmatprep.mubr.msk.bf16.mxu1 %vm4563_vm1, %v4562_v3 }
 0x6ab   : > { %3771 = vmatmul.mubr.msk.bf16.vlgmr.msra.gmra.mrb[16].mxu0 %vm847_vm3, %v1343_v1 }
 0x6ac   : > { %3782 = vmatprep.mubr.msk.bf16.mxu0 %vm4563_vm1, %v4562_v3 }
 0x772   : > { %v5152_v2 = vpop.f32.mrb[16].mxu1 }
 0x773   : > { %v3754_v4 = vpop.f32.mrb[17].mxu1 }
 0x774   : > { %v1241_v7 = vpop.f32.mrb[18].mxu1 }
 0x775   : > { %v3755_v8 = vpop.f32.mrb[19].mxu1 }
 0x776   : > { %v5154_v13 = vpop.f32.mrb[12].mxu0 }
 0x777   : > { %v4097_v14 = vpack.i.bf16 %v5154_v13, %v5152_v2  ;;  %v3760_v15 = vpop.f32.mrb[13].mxu0 }
 0x778   : > { %v1289_v18 = vpop.f32.mrb[14].mxu0 }
 0x779   : > { %v3761_v19 = vpop.f32.mrb[15].mxu0 }
 0x77a   : > { %v1336_v21 = vpop.f32.mrb[20].mxu1 }
 0x77b   : > { %v1392_v22 = vmul.f32 0.35355338, %v1336_v21  ;;  %v3766_v23 = vpop.f32.mrb[21].mxu1 }
 0x77c   : > { %v1339_v24 = vpop.f32.mrb[22].mxu1 }
 0x77d   : > { %v3767_v25 = vpop.f32.mrb[23].mxu1  ;;  %v1394_v27 = vadd.f32 %v5072_v26, %v1392_v22 }
 0x77e   : > { %v1386_v28 = vpop.f32.mrb[16].mxu0 }
 0x77f   : > { %v1393_v29 = vmul.f32 0.35355338, %v1386_v28  ;;  %v3772_v30 = vpop.f32.mrb[17].mxu0  ;;  %v1396_v31 = vsel %vm847_vm3, %v1394_v27, -inf }
 0x780   : > { %v1389_v32 = vpop.f32.mrb[18].mxu0  ;;  %1397 = vmax.xlane.f32.xlu0 %v1396_v31 }
 0x781   : > { %v3773_v34 = vpop.f32.mrb[19].mxu0  ;;  %v1395_v35 = vadd.f32 %v5075_v33, %v1393_v29 }
 0x783   : > { %v1399_v36 = vsel %vm847_vm3, %v1395_v35, -inf }
 0x784   : > { %1400 = vmax.xlane.f32.xlu1 %v1399_v36 }
 0x795   : > { %1420 = vrot.lane.b32.xlu1 %v5052_v17, %s4571_s5 }
 0x799   : > { %1518 = vrot.lane.b32.xlu1 %v5052_v17, %s4572_s9 }
 0x79d   : > { %1568 = vrot.lane.b32.xlu1 %v5056_v20, %s4572_s9 }
 0x7a1   : > { %1566 = vrot.lane.b32.xlu1 %v5056_v20, %s4573_s28 }
 0x80d   : > { %v1398_v37 = vpop.xlane.xlu0 %1397 }
 0x80e   : > { %v1402_v38 = vsub.f32 %v1394_v27, %v1398_v37 }
 0x810   : > { %v1404_v39 = vmul.f32 1.442695, %v1402_v38 }
 0x811   : > { %v1401_v40 = vpop.xlane.xlu1 %1400 }
 0x812   : > { %4159 = vpow2.f32 %v1404_v39  ;;  %v1403_v41 = vsub.f32 %v1395_v35, %v1401_v40 }
 0x814   : > { %v1406_v42 = vmul.f32 1.442695, %v1403_v41 }
 0x815   : > { %v1421_v43 = vpop.permute.xlu1 %1420 }
 0x816   : > { %4161 = vpow2.f32 %v1406_v42  ;;  %v1426_v44 = vsel %vm976_vm4, %v1421_v43, 0 }
 0x817   : > { %3775 = vmatpush3.bf16.msra.mxu1 %v1426_v44 }
 0x818   : > { %3786 = vmatprep.subr.bf16.mxu1 %v4562_v3 }
 0x819   : > { %v1519_v54 = vpop.permute.xlu1 %1518 }
 0x81a   : > { %v1524_v58 = vsel %vm847_vm3, %v1519_v54, 0  ;;  %v4129_v54 = vld [vmem:[%s5008_s20] sm:$0xff]  }
 0x81c   : > { %v4160_v45 = vpop.eup %4159 }
 0x81d   : > { %v1408_v46 = vsel %vm847_vm3, %v4160_v45, 0.0  ;;  %v1569_v60 = vpop.permute.xlu1 %1568 }
 0x81e   : > { %1409 = vadd.xlane.f32.xlu0 %v1408_v46  ;;  %v1574_v62 = vsel %vm847_vm3, %v1569_v60, 0 }
 0x820   : > { %v4162_v47 = vpop.eup %4161 }
 0x821   : > { %v1411_v48 = vsel %vm847_vm3, %v4162_v47, 0.0  ;;  %v1567_v0 = vpop.permute.xlu1 %1566 }
 0x822   : > { %1412 = vadd.xlane.f32.xlu0 %v1411_v48 }
 0x838   : > { %1468 = vrot.lane.b32.xlu0 %v5056_v20, %s4571_s5 }
 0x83c   : > { %1516 = vrot.lane.b32.xlu0 %v5052_v17, %s4573_s28 }
 0x8ab   : > { %v1410_v49 = vpop.xlane.xlu0 %1409 }
 0x8ac   : > { %4163 = vrcp.f32 %v1410_v49 }
 0x8af   : > { %v1413_v50 = vpop.xlane.xlu0 %1412 }
 0x8b0   : > { %4165 = vrcp.f32 %v1413_v50 }
 0x8b3   : > { %v1469_v51 = vpop.permute.xlu0 %1468 }
 0x8b4   : > { %v1474_v52 = vsel %vm976_vm4, %v1469_v51, 0 }
 0x8b5   : > { %3781 = vmatpush3.bf16.msra.mxu0 %v1474_v52 }
 0x8b6   : > { %v4164_v53 = vpop.eup %4163  ;;  %3792 = vmatprep.subr.bf16.mxu0 %v4562_v3 }
 0x8b7   : > { %v1416_v55 = vmul.f32 %v4164_v53, %v4160_v45  ;;  %v1517_v63 = vpop.permute.xlu0 %1516 }
 0x8b9   : > { %v1418_v56 = vpack.c.bf16 %v1416_v55, %v1416_v55  ;;  %v4130_v55 = vld [vmem:[%s5008_s20 + $0x8] sm:$0xff]  }
 0x8ba   : > { %v4166_v57 = vpop.eup %4165 }
 0x8bb   : > { %v1417_v59 = vmul.f32 %v4166_v57, %v4162_v47  ;;  %3777 = vmatmul.mubr.msk.bf16.vlgmr.msra.gmra.mrb[24].mxu1 %vm847_vm3, %v1418_v56 }
 0x8bc   : > { %3787 = vmatpush3.bf16.xpose.msra.mxu1 %v1524_v58  ;;  %3788 = vmatprep.mubr.msk.bf16.mxu1 %vm4563_vm1, %v4562_v3 }
 0x8bd   : > { %v1419_v61 = vpack.c.bf16 %v1417_v59, %v1417_v59  ;;  %3798 = vmatprep.subr.bf16.mxu1 %v4562_v3 }
 0x8bf   : > { %3783 = vmatmul.mubr.msk.bf16.vlgmr.msra.gmra.mrb[20].mxu0 %vm847_vm3, %v1419_v61 }
 0x8c0   : > { %3793 = vmatpush3.bf16.xpose.msra.mxu0 %v1574_v62  ;;  %3794 = vmatprep.mubr.msk.bf16.mxu0 %vm4563_vm1, %v4562_v3 }
 0x8c1   : > { %3804 = vmatprep.subr.bf16.mxu0 %v4562_v3 }
 0x8c3   : > { %3789 = vmatmul.mubr.msk.bf16.vlgmr.msra.gmra.mrb[28].mxu1 %vm847_vm3, %v1517_v63 }
 0x8c4   : > { %3800 = vmatprep.mubr.msk.bf16.mxu1 %vm4563_vm1, %v4562_v3 }
 0x8c7   : > { %3795 = vmatmul.mubr.msk.bf16.vlgmr.msra.gmra.mrb[24].mxu0 %vm847_vm3, %v1567_v0 }
 0x8c8   : > { %3806 = vmatprep.mubr.msk.bf16.mxu0 %vm4563_vm1, %v4562_v3 }
 0x98e   : > { %v1462_v1 = vpop.f32.mrb[24].mxu1 }
 0x98f   : > { %v3778_v4 = vpop.f32.mrb[25].mxu1 }
 0x990   : > { %v1465_v7 = vpop.f32.mrb[26].mxu1 }
 0x991   : > { %v3779_v8 = vpop.f32.mrb[27].mxu1 }
 0x992   : > { %v1510_v15 = vpop.f32.mrb[20].mxu0 }
 0x993   : > { %v4102_v18 = vpack.i.bf16 %v1510_v15, %v1462_v1  ;;  %v3784_v19 = vpop.f32.mrb[21].mxu0 }
 0x994   : > { %v1513_v21 = vpop.f32.mrb[22].mxu0 }
 0x995   : > { %v3785_v22 = vpop.f32.mrb[23].mxu0 }
 0x996   : > { %v1560_v23 = vpop.f32.mrb[28].mxu1 }
 0x997   : > { %v1616_v24 = vmul.f32 0.35355338, %v1560_v23  ;;  %v3790_v25 = vpop.f32.mrb[29].mxu1 }
 0x998   : > { %v1563_v27 = vpop.f32.mrb[30].mxu1 }
 0x999   : > { %v3791_v28 = vpop.f32.mrb[31].mxu1  ;;  %v1618_v29 = vadd.f32 %v5072_v26, %v1616_v24 }
 0x99a   : > { %v1610_v30 = vpop.f32.mrb[24].mxu0 }
 0x99b   : > { %v1617_v31 = vmul.f32 0.35355338, %v1610_v30  ;;  %v3796_v32 = vpop.f32.mrb[25].mxu0  ;;  %v1620_v34 = vsel %vm847_vm3, %v1618_v29, -inf }
 0x99c   : > { %v1613_v35 = vpop.f32.mrb[26].mxu0  ;;  %1621 = vmax.xlane.f32.xlu0 %v1620_v34 }
 0x99d   : > { %v3797_v36 = vpop.f32.mrb[27].mxu0  ;;  %v1619_v37 = vadd.f32 %v5075_v33, %v1617_v31 }
 0x99f   : > { %v1623_v38 = vsel %vm847_vm3, %v1619_v37, -inf }
 0x9a0   : > { %1624 = vmax.xlane.f32.xlu1 %v1623_v38 }
 0x9b1   : > { %1644 = vrot.lane.b32.xlu1 %v5052_v17, %s4574_s18 }
 0x9b5   : > { %4098 = vrot.lane.b32.xlu1 %v4097_v14, %s4575_s21 }
 0x9b9   : > { %4103 = vrot.lane.b32.xlu1 %v4102_v18, %s4576_s16 }
 0xa29   : > { %v1622_v26 = vpop.xlane.xlu0 %1621 }
 0xa2a   : > { %v1626_v39 = vsub.f32 %v1618_v29, %v1622_v26 }
 0xa2c   : > { %v1628_v40 = vmul.f32 1.442695, %v1626_v39 }
 0xa2d   : > { %v1625_v41 = vpop.xlane.xlu1 %1624 }
 0xa2e   : > { %4167 = vpow2.f32 %v1628_v40  ;;  %v1627_v33 = vsub.f32 %v1619_v37, %v1625_v41 }
 0xa30   : > { %v1630_v42 = vmul.f32 1.442695, %v1627_v33 }
 0xa31   : > { %v1645_v43 = vpop.permute.xlu1 %1644 }
 0xa32   : > { %4169 = vpow2.f32 %v1630_v42  ;;  %v1650_v17 = vsel %vm976_vm4, %v1645_v43, 0 }
 0xa33   : > { %3799 = vmatpush3.bf16.msra.mxu1 %v1650_v17 }
 0xa34   : > { %3810 = vmatprep.subr.bf16.mxu1 %v4562_v3 }
 0xa35   : > { %v4099_v1 = vpop.permute.xlu1 %4098 }
 0xa36   : > { %v4101_v7 = vunpack.i.h.bf16 %v4099_v1  ;;  %v4100_v8 = vunpack.i.l.bf16 %v4099_v1 }
 0xa38   : > { %v4168_v44 = vpop.eup %4167  ;;  %v1765_v21 = vsel %vm847_vm3, %v5114_v16, %v4101_v7  ;;  %v1764_v22 = vsel %vm847_vm3, %v5112_v12, %v4100_v8  ;;  %v1775_v16 = vsub.s32 1, %v5043_v9 }
 0xa39   : > { %v1632_v2 = vsel %vm847_vm3, %v4168_v44, 0.0  ;;  %v4104_v4 = vpop.permute.xlu1 %4103 }
 0xa3a   : > { %1633 = vadd.xlane.f32.xlu0 %v1632_v2  ;;  %v4106_v15 = vunpack.i.h.bf16 %v4104_v4  ;;  %v4105_v18 = vunpack.i.l.bf16 %v4104_v4  ;;  %v1776_v12 = vrot.slane %v5047_v11, %v1775_v16 }
 0xa3c   : > { %v4170_v13 = vpop.eup %4169  ;;  %v1768_v25 = vsel %vm1766_vm5, %v1765_v21, %v4106_v15  ;;  %v1767_v27 = vsel %vm1766_vm5, %v1764_v22, %v4105_v18  ;;  %v1946_v15 = vsub.s32 5, %v5043_v9 }
 0xa3d   : > { %v1635_v14 = vsel %vm847_vm3, %v4170_v13, 0.0 }
 0xa3e   : > { %1636 = vadd.xlane.f32.xlu0 %v1635_v14  ;;  %v4131_v14 = vld [vmem:[%s623_s8] sm:$0xff]   ;;  %v1947_v18 = vrot.slane %v5047_v11, %v1946_v15 }
 0xa54   : > { %1692 = vrot.lane.b32.xlu0 %v5056_v20, %s4574_s18 }
 0xac7   : > { %v1634_v45 = vpop.xlane.xlu0 %1633 }
 0xac8   : > { %4171 = vrcp.f32 %v1634_v45  ;;  %v4132_v45 = vld [vmem:[%s623_s8 + $0x8] sm:$0xff]  }
 0xacb   : > { %v1637_v46 = vpop.xlane.xlu0 %1636 }
 0xacc   : > { %4173 = vrcp.f32 %v1637_v46  ;;  %v760_v46 = vld [vmem:[#allocation5] sm:$0xff] }
 0xacf   : > { %v1693_v47 = vpop.permute.xlu0 %1692 }
 0xad0   : > { %v1698_v48 = vsel %vm976_vm4, %v1693_v47, 0  ;;  %v761_v47 = vld [vmem:[#allocation5 + $0x8] sm:$0xff] }
 0xad1   : > { %3805 = vmatpush3.bf16.msra.mxu0 %v1698_v48  ;;  %v1943_v48 = vpack.c.bf16 %v761_v47, %v760_v46 }
 0xad2   : > { %v4172_v49 = vpop.eup %4171  ;;  %3818 = vmatprep.subr.bf16.mxu0 %v4562_v3 }
 0xad3   : > { %v1640_v50 = vmul.f32 %v4172_v49, %v4168_v44  ;;  %v4133_v49 = vld [vmem:[%s5013_s25] sm:$0xff]  }
 0xad5   : > { %v1642_v51 = vpack.c.bf16 %v1640_v50, %v1640_v50  ;;  %v4134_v50 = vld [vmem:[%s5013_s25 + $0x8] sm:$0xff]  }
 0xad6   : > { %v4174_v52 = vpop.eup %4173 }
 0xad7   : > { %v1641_v53 = vmul.f32 %v4174_v52, %v4170_v13  ;;  %3801 = vmatmul.mubr.msk.bf16.vlgmr.msra.gmra.mrb[32].mxu1 %vm847_vm3, %v1642_v51 }
 0xad8   : > { %3814 = vmatprep.mubr.msk.bf16.mxu1 %vm4563_vm1, %v4562_v3  ;;  %3811 = vmatpush3.bf16.msra.mxu1 %v4129_v54 }
 0xad9   : > { %v1643_v20 = vpack.c.bf16 %v1641_v53, %v1641_v53  ;;  %3812 = vmatprep.subr.bf16.mxu1 %v4562_v3 }
 0xadb   : > { %3807 = vmatmul.mubr.msk.bf16.vlgmr.msra.gmra.mrb[28].mxu0 %vm847_vm3, %v1643_v20 }
 0xadc   : > { %3822 = vmatprep.mubr.msk.bf16.mxu0 %vm4563_vm1, %v4562_v3  ;;  %3813 = vmatpush3.bf16.msra.mxu1 %v4130_v55 }
 0xadd   : > { %3826 = vmatprep.subr.bf16.mxu1 %v4562_v3  ;;  %3819 = vmatpush3.bf16.msra.mxu0 %v4133_v49 }
 0xade   : > { %3820 = vmatprep.subr.bf16.mxu0 %v4562_v3 }
 0xae1   : > { %3821 = vmatpush3.bf16.msra.mxu0 %v4134_v50 }
 0xae2   : > { %3834 = vmatprep.subr.bf16.mxu0 %v4562_v3 }
 0xbaa   : > { %v1686_v56 = vpop.f32.mrb[32].mxu1 }
 0xbab   : > { %v3802_v57 = vpop.f32.mrb[33].mxu1 }
 0xbac   : > { %v1689_v58 = vpop.f32.mrb[34].mxu1 }
 0xbad   : > { %v3803_v59 = vpop.f32.mrb[35].mxu1  ;;  %v1870_v58 = vsub.s32 3, %v5043_v9 }
 0xbae   : > { %v1734_v60 = vpop.f32.mrb[28].mxu0 }
 0xbaf   : > { %v4107_v61 = vpack.i.bf16 %v1734_v60, %v1686_v56  ;;  %v3808_v62 = vpop.f32.mrb[29].mxu0  ;;  %v1864_v56 = vsub.s32 2, %v5043_v9 }
 0xbb0   : > { %v1737_v63 = vpop.f32.mrb[30].mxu0 }
 0xbb1   : > { %v3809_v0 = vpop.f32.mrb[31].mxu0  ;;  %4108 = vrot.lane.b32.xlu0 %v4107_v61, %s4577_s27  ;;  %v1865_v57 = vrot.slane %v5047_v11, %v1864_v56 }
 0xbb2   : > { %v1871_v0 = vrot.slane %v5047_v11, %v1870_v58 }
 0xc23   : > { %v4109_v19 = vpop.permute.xlu0 %4108 }
 0xc24   : > { %v4111_v23 = vunpack.i.h.bf16 %v4109_v19  ;;  %v4110_v24 = vunpack.i.l.bf16 %v4109_v19 }
 0xc26   : > { %v1771_v28 = vsel %vm1769_vm6, %v1768_v25, %v4111_v23  ;;  %v1770_v29 = vsel %vm1769_vm6, %v1767_v27, %v4110_v24 }
 0xc27   : > { %v1772_v30 = vpack.c.bf16 %v1771_v28, %v1770_v29 }
 0xc29   : > { %3815 = vmatmul.mubr.msk.bf16.vlgmr.msra.gmra.mrb[36].mxu1 %vm793_vm2, %v1772_v30 }
 0xc2a   : > { %3830 = vmatprep.mubr.msk.bf16.mxu1 %vm4563_vm1, %v4562_v3  ;;  %3827 = vmatpush3.bf16.msra.mxu1 %v4131_v14 }
 0xc2b   : > { %3828 = vmatprep.subr.bf16.mxu1 %v4562_v3 }
 0xc2e   : > { %3829 = vmatpush3.bf16.msra.mxu1 %v4132_v45 }
 0xc2f   : > { %3840 = vmatprep.subr.bf16.mxu1 %v4562_v3 }
 0xc31   : > { %3831 = vmatmul.mubr.msk.bf16.vlgmr.msra.gmra.mrb[40].mxu1 %vm793_vm2, %v1943_v48 }
 0xc32   : > { %3842 = vmatprep.mubr.msk.bf16.mxu1 %vm4563_vm1, %v4562_v3 }
 0xcfc   : > { %v1826_v31 = vpop.f32.mrb[36].mxu1 }
 0xcfd   : > { %v1827_v32 = vadd.f32 %v1826_v31, %v1776_v12  ;;  %v3816_v34 = vpop.f32.mrb[37].mxu1 }
 0xcfe   : > { %v1829_v35 = vpop.f32.mrb[38].mxu1 }
 0xcff   : > { %v1830_v36 = vadd.f32 %v1829_v35, %v1776_v12  ;;  %v3817_v37 = vpop.f32.mrb[39].mxu1  ;;  %v1833_v38 = vadd.f32 %v1827_v32, %v5030_v5  ;;  %v1881_v12 = vsub.s32 4, %v5043_v9 }
 0xd01   : > { %v1835_v26 = vsel %vm793_vm2, %v1833_v38, 0.0  ;;  %v1834_v39 = vadd.f32 %v1830_v36, %v5032_v6  ;;  %v1882_v31 = vrot.slane %v5047_v11, %v1881_v12  ;;  %v3616_v11 = vld [vmem:[#allocation8] sm:$0xff]  }
 0xd02   : > { %1836 = vadd.xlane.f32.xlu1 %v1835_v26 }
 0xd03   : > { %v1838_v40 = vsel %vm793_vm2, %v1834_v39, 0.0 }
 0xd04   : > { %1839 = vadd.xlane.f32.xlu0 %v1838_v40  ;;  %v1997_v19 = vpop.f32.mrb[40].mxu1  ;;  %v5301_v40 = vunpack.c.l.bf16 %v3616_v11 }
 0xd05   : > { %v1998_v21 = vadd.f32 %v1997_v19, %v1947_v18  ;;  %v3832_v22 = vpop.f32.mrb[41].mxu1 }
 0xd06   : > { %v2000_v23 = vpop.f32.mrb[42].mxu1 }
 0xd07   : > { %v5275_v24 = vpack.c.bf16 %v1998_v21, %v1998_v21  ;;  %v2001_v25 = vadd.f32 %v2000_v23, %v1947_v18  ;;  %v3833_v27 = vpop.f32.mrb[43].mxu1 }
 0xd09   : > { %v5277_v28 = vpack.c.bf16 %v2001_v25, %v2001_v25  ;;  %v2016_v29 = vsel %vm847_vm3, %v5275_v24, 0 }
 0xd0b   : > { %v2062_v30 = vsel %vm847_vm3, %v5277_v28, 0 }
 0xd0c   : > { %3841 = vmatpush3.bf16.xpose.msra.mxu1 %v2062_v30 }
 0xd0d   : > { %3852 = vmatprep.subr.bf16.mxu1 %v4562_v3 }
 0xd8f   : > { %v1837_v41 = vpop.xlane.xlu1 %1836 }
 0xd90   : > { %v1842_v33 = vmul.f32 0.03125, %v1837_v41 }
 0xd91   : > { %v1840_v42 = vpop.xlane.xlu0 %1839 }
 0xd92   : > { %v1844_v43 = vsub.f32 %v1833_v38, %v1842_v33  ;;  %v1843_v17 = vmul.f32 0.03125, %v1840_v42 }
 0xd94   : > { %v1845_v44 = vsub.f32 %v1834_v39, %v1843_v17  ;;  %v1846_v2 = vmul.f32 %v1844_v43, %v1844_v43 }
 0xd96   : > { %v1848_v13 = vsel %vm793_vm2, %v1846_v2, 0.0  ;;  %v1847_v5 = vmul.f32 %v1845_v44, %v1845_v44 }
 0xd97   : > { %1849 = vadd.xlane.f32.xlu0 %v1848_v13 }
 0xd98   : > { %v1851_v6 = vsel %vm793_vm2, %v1847_v5, 0.0 }
 0xd99   : > { %1852 = vadd.xlane.f32.xlu1 %v1851_v6 }
 0xe24   : > { %v1850_v51 = vpop.xlane.xlu0 %1849 }
 0xe25   : > { %v1854_v52 = vmul.f32 0.03125, %v1850_v51 }
 0xe26   : > { %v1853_v53 = vpop.xlane.xlu1 %1852 }
 0xe27   : > { %v1856_v20 = vadd.f32 1e-05, %v1854_v52  ;;  %v1855_v54 = vmul.f32 0.03125, %v1853_v53 }
 0xe29   : > { %4175 = vrsqrt.f32 %v1856_v20  ;;  %v1857_v55 = vadd.f32 1e-05, %v1855_v54 }
 0xe2b   : > { %4177 = vrsqrt.f32 %v1857_v55 }
 0xe33   : > { %v4176_v59 = vpop.eup %4175 }
 0xe34   : > { %v1860_v60 = vmul.f32 %v4176_v59, %v1844_v43  ;;  %v5303_v43 = vunpack.c.h.bf16 %v3616_v11 }
 0xe35   : > { %v4178_v61 = vpop.eup %4177 }
 0xe36   : > { %v1866_v62 = vmul.f32 %v1865_v57, %v1860_v60  ;;  %v1861_v63 = vmul.f32 %v4178_v61, %v1845_v44 }
 0xe38   : > { %v1867_v1 = vmul.f32 %v1865_v57, %v1861_v63  ;;  %v5264_v4 = vadd.f32 %v1871_v0, %v1866_v62 }
 0xe3a   : > { %v5266_v7 = vadd.f32 %v1871_v0, %v1867_v1 }
 0xe3c   : > { %v1878_v8 = vpack.c.bf16 %v5266_v7, %v5264_v4 }
 0xe3e   : > { %3823 = vmatmul.mubr.msk.bf16.vlgmr.msra.gmra.mrb[32].mxu0 %vm793_vm2, %v1878_v8 }
 0xe3f   : > { %3836 = vmatprep.mubr.msk.bf16.mxu0 %vm4563_vm1, %v4562_v3  ;;  %3835 = vmatpush3.bf16.xpose.msra.mxu0 %v2016_v29 }
 0xe40   : > { %3846 = vmatprep.subr.bf16.mxu0 %v4562_v3 }
 0xf11   : > { %v1932_v32 = vpop.f32.mrb[32].mxu0 }
 0xf12   : > { %v1933_v34 = vadd.f32 %v1932_v32, %v1882_v31  ;;  %v3824_v35 = vpop.f32.mrb[33].mxu0 }
 0xf13   : > { %v1935_v36 = vpop.f32.mrb[34].mxu0 }
 0xf14   : > { %v5289_v37 = vpack.c.bf16 %v1933_v34, %v1933_v34  ;;  %v1936_v38 = vadd.f32 %v1935_v36, %v1882_v31  ;;  %v3825_v26 = vpop.f32.mrb[35].mxu0 }
 0xf16   : > { %v5291_v39 = vpack.c.bf16 %v1936_v38, %v1936_v38  ;;  %3837 = vmatmul.mubr.msk.bf16.vlgmr.msra.gmra.mrb[36].mxu0 %vm847_vm3, %v5289_v37 }
 0xf17   : > { %3848 = vmatprep.mubr.msk.bf16.mxu0 %vm4563_vm1, %v4562_v3 }
 0xf18   : > { %3843 = vmatmul.mubr.msk.bf16.vlgmr.msra.gmra.mrb[44].mxu1 %vm847_vm3, %v5291_v39 }
 0xf19   : > { %3854 = vmatprep.mubr.msk.bf16.mxu1 %vm4563_vm1, %v4562_v3 }
 0xfe9   : > { %v2052_v41 = vpop.f32.mrb[36].mxu0 }
 0xfea   : > { %v2104_v33 = vmul.f32 0.35355338, %v2052_v41  ;;  %v3838_v42 = vpop.f32.mrb[37].mxu0 }
 0xfeb   : > { %v2055_v17 = vpop.f32.mrb[38].mxu0  ;;  %v2098_v44 = vpop.f32.mrb[44].mxu1 }
 0xfec   : > { %v2105_v2 = vmul.f32 0.35355338, %v2098_v44  ;;  %v3839_v13 = vpop.f32.mrb[39].mxu0  ;;  %v3844_v5 = vpop.f32.mrb[45].mxu1  ;;  %v2106_v6 = vadd.f32 %v5301_v40, %v2104_v33 }
 0xfed   : > { %v2101_v14 = vpop.f32.mrb[46].mxu1 }
 0xfee   : > { %v3845_v45 = vpop.f32.mrb[47].mxu1  ;;  %v2108_v46 = vsel %vm847_vm3, %v2106_v6, -inf  ;;  %v2107_v47 = vadd.f32 %v5303_v43, %v2105_v2 }
 0xfef   : > { %2109 = vmax.xlane.f32.xlu0 %v2108_v46 }
 0xff0   : > { %v2111_v48 = vsel %vm847_vm3, %v2107_v47, -inf }
 0xff1   : > { %2112 = vmax.xlane.f32.xlu1 %v2111_v48 }
0x1002   : > { %2182 = vrot.lane.b32.xlu1 %v5277_v28, %s4564_s15 }
0x1005   : > { %2133 = vrot.lane.b32.xlu0 %v5275_v24, %s4564_s15 }
0x107c   : > { %v2110_v49 = vpop.xlane.xlu0 %2109 }
0x107d   : > { %v2114_v50 = vsub.f32 %v2106_v6, %v2110_v49 }
0x107e   : > { %v2113_v51 = vpop.xlane.xlu1 %2112 }
0x107f   : > { %v2116_v52 = vmul.f32 1.442695, %v2114_v50  ;;  %v2115_v53 = vsub.f32 %v2107_v47, %v2113_v51 }
0x1080   : > { %v2134_v20 = vpop.permute.xlu0 %2133 }
0x1081   : > { %4179 = vpow2.f32 %v2116_v52  ;;  %v2118_v54 = vmul.f32 1.442695, %v2115_v53  ;;  %v2139_v55 = vsel %vm976_vm4, %v2134_v20, 0 }
0x1082   : > { %3847 = vmatpush3.bf16.msra.mxu0 %v2139_v55  ;;  %v2183_v57 = vpop.permute.xlu1 %2182 }
0x1083   : > { %4181 = vpow2.f32 %v2118_v54  ;;  %v2188_v59 = vsel %vm976_vm4, %v2183_v57, 0  ;;  %3858 = vmatprep.subr.bf16.mxu0 %v4562_v3 }
0x1084   : > { %3853 = vmatpush3.bf16.msra.mxu1 %v2188_v59 }
0x1085   : > { %3864 = vmatprep.subr.bf16.mxu1 %v4562_v3 }
0x108b   : > { %v4180_v60 = vpop.eup %4179 }
0x108c   : > { %v2120_v61 = vsel %vm847_vm3, %v4180_v60, 0.0 }
0x108d   : > { %v4182_v62 = vpop.eup %4181  ;;  %2121 = vadd.xlane.f32.xlu0 %v2120_v61 }
0x108e   : > { %v2123_v63 = vsel %vm847_vm3, %v4182_v62, 0.0 }
0x108f   : > { %2124 = vadd.xlane.f32.xlu1 %v2123_v63 }
0x10a0   : > { %2233 = vrot.lane.b32.xlu1 %v5275_v24, %s4567_s13 }
0x10a3   : > { %2284 = vrot.lane.b32.xlu0 %v5277_v28, %s4567_s13 }
0x10a4   : > { %2231 = vrot.lane.b32.xlu1 %v5289_v37, %s4567_s13 }
0x10a7   : > { %2282 = vrot.lane.b32.xlu0 %v5291_v39, %s4567_s13 }
0x111a   : > { %v2122_v0 = vpop.xlane.xlu0 %2121 }
0x111b   : > { %4183 = vrcp.f32 %v2122_v0 }
0x111c   : > { %v2125_v1 = vpop.xlane.xlu1 %2124 }
0x111d   : > { %4185 = vrcp.f32 %v2125_v1 }
0x111e   : > { %v2285_v23 = vpop.permute.xlu0 %2284 }
0x111f   : > { %v2290_v29 = vsel %vm847_vm3, %v2285_v23, 0 }
0x1120   : > { %v2234_v19 = vpop.permute.xlu1 %2233 }
0x1121   : > { %v2239_v25 = vsel %vm847_vm3, %v2234_v19, 0 }
0x1122   : > { %v2283_v31 = vpop.permute.xlu0 %2282 }
0x1124   : > { %v2232_v30 = vpop.permute.xlu1 %2231 }
0x1125   : > { %v4184_v8 = vpop.eup %4183 }
0x1126   : > { %v2128_v15 = vmul.f32 %v4184_v8, %v4180_v60 }
0x1127   : > { %v4186_v18 = vpop.eup %4185 }
0x1128   : > { %v2129_v21 = vmul.f32 %v4186_v18, %v4182_v62  ;;  %v2130_v22 = vpack.c.bf16 %v2128_v15, %v2128_v15 }
0x112a   : > { %3849 = vmatmul.mubr.msk.bf16.vlgmr.msra.gmra.mrb[40].mxu0 %vm847_vm3, %v2130_v22  ;;  %v2131_v27 = vpack.c.bf16 %v2129_v21, %v2129_v21 }
0x112b   : > { %3859 = vmatpush3.bf16.xpose.msra.mxu0 %v2239_v25  ;;  %3860 = vmatprep.mubr.msk.bf16.mxu0 %vm4563_vm1, %v4562_v3 }
0x112c   : > { %3855 = vmatmul.mubr.msk.bf16.vlgmr.msra.gmra.mrb[48].mxu1 %vm847_vm3, %v2131_v27  ;;  %3870 = vmatprep.subr.bf16.mxu0 %v4562_v3 }
0x112d   : > { %3865 = vmatpush3.bf16.xpose.msra.mxu1 %v2290_v29  ;;  %3866 = vmatprep.mubr.msk.bf16.mxu1 %vm4563_vm1, %v4562_v3 }
0x112e   : > { %3876 = vmatprep.subr.bf16.mxu1 %v4562_v3 }
0x1132   : > { %3861 = vmatmul.mubr.msk.bf16.vlgmr.msra.gmra.mrb[44].mxu0 %vm847_vm3, %v2232_v30 }
0x1133   : > { %3872 = vmatprep.mubr.msk.bf16.mxu0 %vm4563_vm1, %v4562_v3 }
0x1134   : > { %3867 = vmatmul.mubr.msk.bf16.vlgmr.msra.gmra.mrb[52].mxu1 %vm847_vm3, %v2283_v31 }
0x1135   : > { %3878 = vmatprep.mubr.msk.bf16.mxu1 %vm4563_vm1, %v4562_v3 }
0x11fd   : > { %v5343_v32 = vpop.f32.mrb[40].mxu0 }
0x11fe   : > { %v3850_v34 = vpop.f32.mrb[41].mxu0 }
0x11ff   : > { %v2178_v35 = vpop.f32.mrb[42].mxu0  ;;  %v5345_v36 = vpop.f32.mrb[48].mxu1 }
0x1200   : > { %v3851_v38 = vpop.f32.mrb[43].mxu0  ;;  %v3856_v26 = vpop.f32.mrb[49].mxu1 }
0x1201   : > { %v2227_v11 = vpop.f32.mrb[50].mxu1 }
0x1202   : > { %v3857_v41 = vpop.f32.mrb[51].mxu1 }
0x1205   : > { %v2275_v33 = vpop.f32.mrb[44].mxu0 }
0x1206   : > { %v2332_v42 = vmul.f32 0.35355338, %v2275_v33  ;;  %v3862_v17 = vpop.f32.mrb[45].mxu0 }
0x1207   : > { %v2278_v44 = vpop.f32.mrb[46].mxu0  ;;  %v2326_v2 = vpop.f32.mrb[52].mxu1 }
0x1208   : > { %v2333_v13 = vmul.f32 0.35355338, %v2326_v2  ;;  %v3863_v5 = vpop.f32.mrb[47].mxu0  ;;  %v3868_v6 = vpop.f32.mrb[53].mxu1  ;;  %v2334_v14 = vadd.f32 %v5301_v40, %v2332_v42 }
0x1209   : > { %v2329_v45 = vpop.f32.mrb[54].mxu1 }
0x120a   : > { %v3869_v46 = vpop.f32.mrb[55].mxu1  ;;  %v2336_v47 = vsel %vm847_vm3, %v2334_v14, -inf  ;;  %v2335_v48 = vadd.f32 %v5303_v43, %v2333_v13 }
0x120b   : > { %2337 = vmax.xlane.f32.xlu1 %v2336_v47 }
0x120c   : > { %v2339_v49 = vsel %vm847_vm3, %v2335_v48, -inf }
0x120d   : > { %2340 = vmax.xlane.f32.xlu0 %v2339_v49 }
0x121c   : > { %2408 = vrot.lane.b32.xlu1 %v5277_v28, %s4566_s1 }
0x1223   : > { %2360 = vrot.lane.b32.xlu0 %v5275_v24, %s4566_s1 }
0x1298   : > { %v2338_v50 = vpop.xlane.xlu1 %2337 }
0x1299   : > { %v2342_v51 = vsub.f32 %v2334_v14, %v2338_v50 }
0x129a   : > { %v2341_v52 = vpop.xlane.xlu0 %2340 }
0x129b   : > { %v2344_v53 = vmul.f32 1.442695, %v2342_v51  ;;  %v2343_v20 = vsub.f32 %v2335_v48, %v2341_v52 }
0x129c   : > { %v2409_v54 = vpop.permute.xlu1 %2408 }
0x129d   : > { %4187 = vpow2.f32 %v2344_v53  ;;  %v2346_v55 = vmul.f32 1.442695, %v2343_v20  ;;  %v2414_v57 = vsel %vm976_vm4, %v2409_v54, 0 }
0x129e   : > { %3877 = vmatpush3.bf16.msra.mxu1 %v2414_v57  ;;  %v2361_v59 = vpop.permute.xlu0 %2360 }
0x129f   : > { %4189 = vpow2.f32 %v2346_v55  ;;  %v2366_v60 = vsel %vm976_vm4, %v2361_v59, 0  ;;  %3888 = vmatprep.subr.bf16.mxu1 %v4562_v3 }
0x12a0   : > { %3871 = vmatpush3.bf16.msra.mxu0 %v2366_v60 }
0x12a1   : > { %3882 = vmatprep.subr.bf16.mxu0 %v4562_v3 }
0x12a7   : > { %v4188_v61 = vpop.eup %4187 }
0x12a8   : > { %v2348_v62 = vsel %vm847_vm3, %v4188_v61, 0.0 }
0x12a9   : > { %v4190_v63 = vpop.eup %4189  ;;  %2349 = vadd.xlane.f32.xlu0 %v2348_v62 }
0x12aa   : > { %v2351_v0 = vsel %vm847_vm3, %v4190_v63, 0.0 }
0x12ab   : > { %2352 = vadd.xlane.f32.xlu1 %v2351_v0 }
0x12bc   : > { %2458 = vrot.lane.b32.xlu1 %v5275_v24, %s4570_s24 }
0x12bf   : > { %2508 = vrot.lane.b32.xlu0 %v5277_v28, %s4570_s24 }
0x12c0   : > { %2456 = vrot.lane.b32.xlu1 %v5289_v37, %s4570_s24 }
0x12c3   : > { %2506 = vrot.lane.b32.xlu0 %v5291_v39, %s4570_s24 }
0x1336   : > { %v2350_v1 = vpop.xlane.xlu0 %2349 }
0x1337   : > { %4191 = vrcp.f32 %v2350_v1 }
0x1338   : > { %v2353_v8 = vpop.xlane.xlu1 %2352 }
0x1339   : > { %4193 = vrcp.f32 %v2353_v8 }
0x133a   : > { %v2509_v25 = vpop.permute.xlu0 %2508 }
0x133b   : > { %v2514_v30 = vsel %vm847_vm3, %v2509_v25, 0 }
0x133c   : > { %v2459_v21 = vpop.permute.xlu1 %2458 }
0x133d   : > { %v2464_v27 = vsel %vm847_vm3, %v2459_v21, 0 }
0x133e   : > { %v2507_v34 = vpop.permute.xlu0 %2506 }
0x1340   : > { %v2457_v31 = vpop.permute.xlu1 %2456 }
0x1341   : > { %v4192_v15 = vpop.eup %4191 }
0x1342   : > { %v2356_v18 = vmul.f32 %v4192_v15, %v4188_v61 }
0x1343   : > { %v4194_v19 = vpop.eup %4193 }
0x1344   : > { %v2357_v22 = vmul.f32 %v4194_v19, %v4190_v63  ;;  %v2358_v23 = vpack.c.bf16 %v2356_v18, %v2356_v18 }
0x1346   : > { %3873 = vmatmul.mubr.msk.bf16.vlgmr.msra.gmra.mrb[48].mxu0 %vm847_vm3, %v2358_v23  ;;  %v2359_v29 = vpack.c.bf16 %v2357_v22, %v2357_v22 }
0x1347   : > { %3883 = vmatpush3.bf16.xpose.msra.mxu0 %v2464_v27  ;;  %3884 = vmatprep.mubr.msk.bf16.mxu0 %vm4563_vm1, %v4562_v3 }
0x1348   : > { %3879 = vmatmul.mubr.msk.bf16.vlgmr.msra.gmra.mrb[56].mxu1 %vm847_vm3, %v2359_v29  ;;  %3894 = vmatprep.subr.bf16.mxu0 %v4562_v3 }
0x1349   : > { %3889 = vmatpush3.bf16.xpose.msra.mxu1 %v2514_v30  ;;  %3890 = vmatprep.mubr.msk.bf16.mxu1 %vm4563_vm1, %v4562_v3 }
0x134a   : > { %3900 = vmatprep.subr.bf16.mxu1 %v4562_v3 }
0x134e   : > { %3885 = vmatmul.mubr.msk.bf16.vlgmr.msra.gmra.mrb[52].mxu0 %vm847_vm3, %v2457_v31 }
0x134f   : > { %3896 = vmatprep.mubr.msk.bf16.mxu0 %vm4563_vm1, %v4562_v3 }
0x1350   : > { %3891 = vmatmul.mubr.msk.bf16.vlgmr.msra.gmra.mrb[60].mxu1 %vm847_vm3, %v2507_v34 }
0x1351   : > { %3902 = vmatprep.mubr.msk.bf16.mxu1 %vm4563_vm1, %v4562_v3 }
0x1419   : > { %v5385_v35 = vpop.f32.mrb[48].mxu0 }
0x141a   : > { %v3874_v38 = vpop.f32.mrb[49].mxu0 }
0x141b   : > { %v2405_v26 = vpop.f32.mrb[50].mxu0  ;;  %v5387_v11 = vpop.f32.mrb[56].mxu1 }
0x141c   : > { %v4112_v41 = vpack.i.bf16 %v5387_v11, %v5385_v35  ;;  %v3875_v33 = vpop.f32.mrb[51].mxu0  ;;  %v3880_v42 = vpop.f32.mrb[57].mxu1 }
0x141d   : > { %v2453_v17 = vpop.f32.mrb[58].mxu1 }
0x141e   : > { %v3881_v44 = vpop.f32.mrb[59].mxu1 }
0x1421   : > { %v2500_v2 = vpop.f32.mrb[52].mxu0 }
0x1422   : > { %v2556_v13 = vmul.f32 0.35355338, %v2500_v2  ;;  %v3886_v5 = vpop.f32.mrb[53].mxu0 }
0x1423   : > { %v2503_v6 = vpop.f32.mrb[54].mxu0  ;;  %v2550_v14 = vpop.f32.mrb[60].mxu1 }
0x1424   : > { %v2557_v45 = vmul.f32 0.35355338, %v2550_v14  ;;  %v3887_v46 = vpop.f32.mrb[55].mxu0  ;;  %v3892_v47 = vpop.f32.mrb[61].mxu1  ;;  %v2558_v48 = vadd.f32 %v5301_v40, %v2556_v13 }
0x1425   : > { %v2553_v49 = vpop.f32.mrb[62].mxu1 }
0x1426   : > { %v3893_v50 = vpop.f32.mrb[63].mxu1  ;;  %v2560_v51 = vsel %vm847_vm3, %v2558_v48, -inf  ;;  %v2559_v52 = vadd.f32 %v5303_v43, %v2557_v45 }
0x1427   : > { %2561 = vmax.xlane.f32.xlu1 %v2560_v51 }
0x1428   : > { %v2563_v53 = vsel %vm847_vm3, %v2559_v52, -inf }
0x1429   : > { %2564 = vmax.xlane.f32.xlu0 %v2563_v53 }
0x1438   : > { %2632 = vrot.lane.b32.xlu1 %v5277_v28, %s4569_s12 }
0x143f   : > { %2584 = vrot.lane.b32.xlu0 %v5275_v24, %s4569_s12 }
0x14b4   : > { %v2562_v20 = vpop.xlane.xlu1 %2561 }
0x14b5   : > { %v2566_v54 = vsub.f32 %v2558_v48, %v2562_v20 }
0x14b6   : > { %v2565_v55 = vpop.xlane.xlu0 %2564 }
0x14b7   : > { %v2568_v57 = vmul.f32 1.442695, %v2566_v54  ;;  %v2567_v59 = vsub.f32 %v2559_v52, %v2565_v55 }
0x14b8   : > { %v2633_v60 = vpop.permute.xlu1 %2632 }
0x14b9   : > { %4195 = vpow2.f32 %v2568_v57  ;;  %v2570_v61 = vmul.f32 1.442695, %v2567_v59  ;;  %v2638_v62 = vsel %vm976_vm4, %v2633_v60, 0 }
0x14ba   : > { %3901 = vmatpush3.bf16.msra.mxu1 %v2638_v62  ;;  %v2585_v63 = vpop.permute.xlu0 %2584 }
0x14bb   : > { %4197 = vpow2.f32 %v2570_v61  ;;  %v2590_v0 = vsel %vm976_vm4, %v2585_v63, 0  ;;  %3912 = vmatprep.subr.bf16.mxu1 %v4562_v3 }
0x14bc   : > { %3895 = vmatpush3.bf16.msra.mxu0 %v2590_v0 }
0x14bd   : > { %3906 = vmatprep.subr.bf16.mxu0 %v4562_v3 }
0x14c3   : > { %v4196_v1 = vpop.eup %4195 }
0x14c4   : > { %v2572_v8 = vsel %vm847_vm3, %v4196_v1, 0.0 }
0x14c5   : > { %v4198_v15 = vpop.eup %4197  ;;  %2573 = vadd.xlane.f32.xlu0 %v2572_v8 }
0x14c6   : > { %v2575_v18 = vsel %vm847_vm3, %v4198_v15, 0.0 }
0x14c7   : > { %2576 = vadd.xlane.f32.xlu1 %v2575_v18 }
0x14d8   : > { %2682 = vrot.lane.b32.xlu1 %v5275_v24, %s4573_s28 }
0x14db   : > { %2732 = vrot.lane.b32.xlu0 %v5277_v28, %s4573_s28 }
0x14dc   : > { %2680 = vrot.lane.b32.xlu1 %v5289_v37, %s4573_s28 }
0x14df   : > { %2730 = vrot.lane.b32.xlu0 %v5291_v39, %s4573_s28 }
0x1552   : > { %v2574_v19 = vpop.xlane.xlu0 %2573 }
0x1553   : > { %4199 = vrcp.f32 %v2574_v19 }
0x1554   : > { %v2577_v21 = vpop.xlane.xlu1 %2576 }
0x1555   : > { %4201 = vrcp.f32 %v2577_v21 }
0x1556   : > { %v2733_v31 = vpop.permute.xlu0 %2732 }
0x1557   : > { %v2738_v37 = vsel %vm847_vm3, %v2733_v31, 0 }
0x1558   : > { %v2683_v27 = vpop.permute.xlu1 %2682 }
0x1559   : > { %v2688_v34 = vsel %vm847_vm3, %v2683_v27, 0 }
0x155a   : > { %v2731_v26 = vpop.permute.xlu0 %2730 }
0x155c   : > { %v2681_v39 = vpop.permute.xlu1 %2680 }
0x155d   : > { %v4200_v22 = vpop.eup %4199 }
0x155e   : > { %v2580_v23 = vmul.f32 %v4200_v22, %v4196_v1 }
0x155f   : > { %v4202_v25 = vpop.eup %4201 }
0x1560   : > { %v2581_v29 = vmul.f32 %v4202_v25, %v4198_v15  ;;  %v2582_v30 = vpack.c.bf16 %v2580_v23, %v2580_v23 }
0x1562   : > { %3897 = vmatmul.mubr.msk.bf16.vlgmr.msra.gmra.mrb[56].mxu0 %vm847_vm3, %v2582_v30  ;;  %v2583_v38 = vpack.c.bf16 %v2581_v29, %v2581_v29  ;;  %v4135_v29 = vld [vmem:[%s632_s4] sm:$0xff]   ;;  %v4136_v30 = vld [vmem:[%s632_s4 + $0x8] sm:$0xff]  }
0x1563   : > { %3907 = vmatpush3.bf16.xpose.msra.mxu0 %v2688_v34  ;;  %3908 = vmatprep.mubr.msk.bf16.mxu0 %vm4563_vm1, %v4562_v3 }
0x1564   : > { %3903 = vmatmul.mubr.msk.bf16.vlgmr.msra.gmra.mrb[64].mxu1 %vm847_vm3, %v2583_v38  ;;  %3918 = vmatprep.subr.bf16.mxu0 %v4562_v3 }
0x1565   : > { %3913 = vmatpush3.bf16.xpose.msra.mxu1 %v2738_v37  ;;  %3914 = vmatprep.mubr.msk.bf16.mxu1 %vm4563_vm1, %v4562_v3 }
0x1566   : > { %3924 = vmatprep.subr.bf16.mxu1 %v4562_v3 }
0x156a   : > { %3909 = vmatmul.mubr.msk.bf16.vlgmr.msra.gmra.mrb[60].mxu0 %vm847_vm3, %v2681_v39 }
0x156b   : > { %3920 = vmatprep.mubr.msk.bf16.mxu0 %vm4563_vm1, %v4562_v3 }
0x156c   : > { %3915 = vmatmul.mubr.msk.bf16.vlgmr.msra.gmra.mrb[68].mxu1 %vm847_vm3, %v2731_v26 }
0x156d   : > { %3926 = vmatprep.mubr.msk.bf16.mxu1 %vm4563_vm1, %v4562_v3 }
0x1635   : > { %v2626_v33 = vpop.f32.mrb[56].mxu0 }
0x1636   : > { %v3898_v42 = vpop.f32.mrb[57].mxu0 }
0x1637   : > { %v2629_v17 = vpop.f32.mrb[58].mxu0  ;;  %v2674_v44 = vpop.f32.mrb[64].mxu1 }
0x1638   : > { %v4117_v2 = vpack.i.bf16 %v2674_v44, %v2626_v33  ;;  %v3899_v13 = vpop.f32.mrb[59].mxu0  ;;  %v3904_v5 = vpop.f32.mrb[65].mxu1 }
0x1639   : > { %v2677_v6 = vpop.f32.mrb[66].mxu1 }
0x163a   : > { %v3905_v14 = vpop.f32.mrb[67].mxu1 }
0x163d   : > { %v2724_v45 = vpop.f32.mrb[60].mxu0 }
0x163e   : > { %v2780_v46 = vmul.f32 0.35355338, %v2724_v45  ;;  %v3910_v47 = vpop.f32.mrb[61].mxu0 }
0x163f   : > { %v2727_v48 = vpop.f32.mrb[62].mxu0  ;;  %v2774_v49 = vpop.f32.mrb[68].mxu1 }
0x1640   : > { %v2781_v50 = vmul.f32 0.35355338, %v2774_v49  ;;  %v3911_v51 = vpop.f32.mrb[63].mxu0  ;;  %v3916_v52 = vpop.f32.mrb[69].mxu1  ;;  %v2782_v53 = vadd.f32 %v5301_v40, %v2780_v46 }
0x1641   : > { %v2777_v20 = vpop.f32.mrb[70].mxu1 }
0x1642   : > { %v3917_v54 = vpop.f32.mrb[71].mxu1  ;;  %v2784_v55 = vsel %vm847_vm3, %v2782_v53, -inf  ;;  %v2783_v57 = vadd.f32 %v5303_v43, %v2781_v50 }
0x1643   : > { %2785 = vmax.xlane.f32.xlu1 %v2784_v55 }
0x1644   : > { %v2787_v59 = vsel %vm847_vm3, %v2783_v57, -inf }
0x1645   : > { %2788 = vmax.xlane.f32.xlu0 %v2787_v59 }
0x16d0   : > { %v2786_v60 = vpop.xlane.xlu1 %2785 }
0x16d1   : > { %v2790_v61 = vsub.f32 %v2782_v53, %v2786_v60 }
0x16d2   : > { %v2789_v62 = vpop.xlane.xlu0 %2788 }
0x16d3   : > { %v2792_v63 = vmul.f32 1.442695, %v2790_v61  ;;  %v2791_v0 = vsub.f32 %v2783_v57, %v2789_v62 }
0x16d5   : > { %4203 = vpow2.f32 %v2792_v63  ;;  %v2794_v1 = vmul.f32 1.442695, %v2791_v0 }
0x16d7   : > { %4205 = vpow2.f32 %v2794_v1 }
0x16df   : > { %v4204_v8 = vpop.eup %4203 }
0x16e0   : > { %v2796_v40 = vsel %vm847_vm3, %v4204_v8, 0.0 }
0x16e1   : > { %v4206_v15 = vpop.eup %4205  ;;  %2797 = vadd.xlane.f32.xlu0 %v2796_v40 }
0x16e2   : > { %v2799_v18 = vsel %vm847_vm3, %v4206_v15, 0.0 }
0x16e3   : > { %2800 = vadd.xlane.f32.xlu1 %v2799_v18 }
0x16f4   : > { %2856 = vrot.lane.b32.xlu1 %v5277_v28, %s4572_s9 }
0x16f7   : > { %2808 = vrot.lane.b32.xlu0 %v5275_v24, %s4572_s9 }
0x16f8   : > { %4113 = vrot.lane.b32.xlu1 %v4112_v41, %s4575_s21 }
0x16fb   : > { %4118 = vrot.lane.b32.xlu0 %v4117_v2, %s4576_s16 }
0x176e   : > { %v2798_v43 = vpop.xlane.xlu0 %2797 }
0x176f   : > { %4207 = vrcp.f32 %v2798_v43 }
0x1770   : > { %v2801_v19 = vpop.xlane.xlu1 %2800 }
0x1771   : > { %4209 = vrcp.f32 %v2801_v19 }
0x1772   : > { %v2809_v21 = vpop.permute.xlu0 %2808 }
0x1773   : > { %v2814_v22 = vsel %vm976_vm4, %v2809_v21, 0 }
0x1774   : > { %v2857_v23 = vpop.permute.xlu1 %2856  ;;  %3919 = vmatpush3.bf16.msra.mxu0 %v2814_v22 }
0x1775   : > { %v2862_v28 = vsel %vm976_vm4, %v2857_v23, 0  ;;  %3930 = vmatprep.subr.bf16.mxu0 %v4562_v3 }
0x1776   : > { %3925 = vmatpush3.bf16.msra.mxu1 %v2862_v28  ;;  %v4119_v5 = vpop.permute.xlu0 %4118  ;;  %v4137_v28 = vld [vmem:[%s641_s29] sm:$0xff]  }
0x1777   : > { %3938 = vmatprep.subr.bf16.mxu1 %v4562_v3  ;;  %v4121_v45 = vunpack.i.h.bf16 %v4119_v5  ;;  %v4120_v46 = vunpack.i.l.bf16 %v4119_v5 }
0x1778   : > { %v4114_v44 = vpop.permute.xlu1 %4113 }
0x1779   : > { %v4208_v24 = vpop.eup %4207  ;;  %v4116_v2 = vunpack.i.h.bf16 %v4114_v44  ;;  %v4115_v13 = vunpack.i.l.bf16 %v4114_v44 }
0x177a   : > { %v2804_v35 = vmul.f32 %v4208_v24, %v4204_v8  ;;  %v4138_v24 = vld [vmem:[%s641_s29 + $0x8] sm:$0xff]  }
0x177b   : > { %v4210_v11 = vpop.eup %4209  ;;  %v2929_v6 = vsel %vm847_vm3, %v5345_v36, %v4116_v2  ;;  %v2928_v14 = vsel %vm847_vm3, %v5343_v32, %v4115_v13  ;;  %v2937_v32 = vsub.s32 6, %v5043_v9  ;;  %v4219_v36 = vld [vmem:[%s5023_s17] sm:$0xff] }
0x177c   : > { %v2805_v41 = vmul.f32 %v4210_v11, %v4206_v15  ;;  %v2806_v25 = vpack.c.bf16 %v2804_v35, %v2804_v35  ;;  %v2930_v50 = vsel %vm1766_vm5, %v2928_v14, %v4120_v46  ;;  %v2931_v51 = vsel %vm1766_vm5, %v2929_v6, %v4121_v45  ;;  %v4139_v35 = vld [vmem:[%s5018_s19] sm:$0xff]   ;;  %v4140_v11 = vld [vmem:[%s5018_s19 + $0x8] sm:$0xff]   ;;  %v4141_v14 = vld [vmem:[%s5018_s19 + $0x10] sm:$0xff]  }
0x177d   : > { %v2938_v54 = vrot.slane %v4219_v36, %v2937_v32  ;;  %v4142_v45 = vld [vmem:[%s5018_s19 + $0x18] sm:$0xff]  }
0x177e   : > { %3921 = vmatmul.mubr.msk.bf16.vlgmr.msra.gmra.mrb[64].mxu0 %vm847_vm3, %v2806_v25  ;;  %v2807_v27 = vpack.c.bf16 %v2805_v41, %v2805_v41 }
0x177f   : > { %3934 = vmatprep.mubr.msk.bf16.mxu0 %vm4563_vm1, %v4562_v3  ;;  %3931 = vmatpush3.bf16.msra.mxu0 %v4135_v29 }
0x1780   : > { %3927 = vmatmul.mubr.msk.bf16.vlgmr.msra.gmra.mrb[72].mxu1 %vm847_vm3, %v2807_v27  ;;  %3932 = vmatprep.subr.bf16.mxu0 %v4562_v3 }
0x1781   : > { %3942 = vmatprep.mubr.msk.bf16.mxu1 %vm4563_vm1, %v4562_v3  ;;  %3939 = vmatpush3.bf16.msra.mxu1 %v4137_v28 }
0x1782   : > { %3940 = vmatprep.subr.bf16.mxu1 %v4562_v3 }
0x1783   : > { %3933 = vmatpush3.bf16.msra.mxu0 %v4136_v30 }
0x1784   : > { %3946 = vmatprep.subr.bf16.mxu0 %v4562_v3 }
0x1785   : > { %3941 = vmatpush3.bf16.msra.mxu1 %v4138_v24 }
0x1851   : > { %v2850_v31 = vpop.f32.mrb[64].mxu0 }
0x1852   : > { %v3922_v34 = vpop.f32.mrb[65].mxu0 }
0x1853   : > { %v2853_v38 = vpop.f32.mrb[66].mxu0  ;;  %v2898_v37 = vpop.f32.mrb[72].mxu1  ;;  %v3025_v34 = vsub.s32 7, %v5043_v9 }
0x1854   : > { %v4122_v39 = vpack.i.bf16 %v2898_v37, %v2850_v31  ;;  %v3923_v26 = vpop.f32.mrb[67].mxu0  ;;  %v3928_v33 = vpop.f32.mrb[73].mxu1 }
0x1855   : > { %v2901_v42 = vpop.f32.mrb[74].mxu1  ;;  %v3026_v37 = vrot.slane %v4219_v36, %v3025_v34  ;;  %v763_v26 = vld [vmem:[%s5023_s17 + $0x8] sm:$0xff] }
0x1856   : > { %4123 = vrot.lane.b32.xlu1 %v4122_v39, %s4577_s27  ;;  %v3929_v17 = vpop.f32.mrb[75].mxu1  ;;  %v3032_v42 = vrot.slane %v763_v26, %v779_v10  ;;  %v3043_v46 = vrot.slane %v763_v26, %v1775_v16  ;;  %v3114_v32 = vrot.slane %v763_v26, %v1864_v56  ;;  %v3215_v24 = vrot.slane %v763_v26, %v1870_v58 }
0x18c8   : > { %v4124_v47 = vpop.permute.xlu1 %4123 }
0x18c9   : > { %v4126_v48 = vunpack.i.h.bf16 %v4124_v47  ;;  %v4125_v49 = vunpack.i.l.bf16 %v4124_v47 }
0x18cb   : > { %v2933_v52 = vsel %vm1769_vm6, %v2931_v51, %v4126_v48  ;;  %v2932_v53 = vsel %vm1769_vm6, %v2930_v50, %v4125_v49 }
0x18cc   : > { %v2934_v20 = vpack.c.bf16 %v2933_v52, %v2932_v53 }
0x18ce   : > { %3935 = vmatmul.mubr.msk.bf16.vlgmr.msra.gmra.mrb[68].mxu0 %vm793_vm2, %v2934_v20 }
0x18cf   : > { %3954 = vmatprep.mubr.msk.bf16.mxu0 %vm4563_vm1, %v4562_v3  ;;  %3947 = vmatpush3.bf16.msra.mxu0 %v4139_v35 }
0x18d0   : > { %3948 = vmatprep.subr.bf16.mxu0 %v4562_v3 }
0x18d3   : > { %3949 = vmatpush3.bf16.msra.mxu0 %v4140_v11  ;;  %v3221_v11 = vrot.slane %v763_v26, %v1881_v12 }
0x18d4   : > { %3950 = vmatprep.subr.bf16.mxu0 %v4562_v3 }
0x18d7   : > { %3951 = vmatpush3.bf16.msra.mxu0 %v4141_v14 }
0x18d8   : > { %3952 = vmatprep.subr.bf16.mxu0 %v4562_v3 }
0x18db   : > { %3953 = vmatpush3.bf16.msra.mxu0 %v4142_v45 }
0x19a1   : > { %v2988_v55 = vpop.f32.mrb[68].mxu0 }
0x19a2   : > { %v2989_v57 = vadd.f32 %v2988_v55, %v2938_v54  ;;  %v3936_v59 = vpop.f32.mrb[69].mxu0 }
0x19a3   : > { %v2991_v60 = vpop.f32.mrb[70].mxu0 }
0x19a4   : > { %v2992_v61 = vadd.f32 %v2991_v60, %v2938_v54  ;;  %v3937_v62 = vpop.f32.mrb[71].mxu0  ;;  %v2995_v63 = vadd.f32 %v2989_v57, %v5264_v4 }
0x19a6   : > { %v2997_v0 = vsel %vm793_vm2, %v2995_v63, 0.0  ;;  %v2996_v1 = vadd.f32 %v2992_v61, %v5266_v7 }
0x19a7   : > { %2998 = vadd.xlane.f32.xlu0 %v2997_v0 }
0x19a8   : > { %v3000_v8 = vsel %vm793_vm2, %v2996_v1, 0.0 }
0x19a9   : > { %3001 = vadd.xlane.f32.xlu1 %v3000_v8 }
0x1a34   : > { %v2999_v40 = vpop.xlane.xlu0 %2998 }
0x1a35   : > { %v3003_v15 = vmul.f32 0.03125, %v2999_v40 }
0x1a36   : > { %v3002_v18 = vpop.xlane.xlu1 %3001 }
0x1a37   : > { %v3005_v43 = vsub.f32 %v2995_v63, %v3003_v15  ;;  %v3004_v19 = vmul.f32 0.03125, %v3002_v18 }
0x1a39   : > { %v3006_v21 = vsub.f32 %v2996_v1, %v3004_v19  ;;  %v3007_v22 = vmul.f32 %v3005_v43, %v3005_v43 }
0x1a3b   : > { %v3009_v4 = vsel %vm793_vm2, %v3007_v22, 0.0  ;;  %v3008_v23 = vmul.f32 %v3006_v21, %v3006_v21 }
0x1a3c   : > { %3010 = vadd.xlane.f32.xlu0 %v3009_v4 }
0x1a3d   : > { %v3012_v7 = vsel %vm793_vm2, %v3008_v23, 0.0 }
0x1a40   : > { %3013 = vadd.xlane.f32.xlu0 %v3012_v7 }
0x1ac9   : > { %v3011_v41 = vpop.xlane.xlu0 %3010 }
0x1aca   : > { %v3015_v25 = vmul.f32 0.03125, %v3011_v41 }
0x1acc   : > { %v3017_v27 = vadd.f32 1e-05, %v3015_v25 }
0x1acd   : > { %v3014_v29 = vpop.xlane.xlu0 %3013 }
0x1ace   : > { %4211 = vrsqrt.f32 %v3017_v27  ;;  %v3016_v30 = vmul.f32 0.03125, %v3014_v29 }
0x1ad0   : > { %v3018_v31 = vadd.f32 1e-05, %v3016_v30 }
0x1ad2   : > { %4213 = vrsqrt.f32 %v3018_v31 }
0x1ad8   : > { %v4212_v38 = vpop.eup %4211 }
0x1ad9   : > { %v3021_v39 = vmul.f32 %v4212_v38, %v3005_v43 }
0x1adb   : > { %v3027_v17 = vmul.f32 %v3026_v37, %v3021_v39 }
0x1adc   : > { %v4214_v33 = vpop.eup %4213 }
0x1add   : > { %v3022_v44 = vmul.f32 %v4214_v33, %v3006_v21  ;;  %v3033_v13 = vadd.f32 %v3032_v42, %v3027_v17 }
0x1adf   : > { %v3028_v2 = vmul.f32 %v3026_v37, %v3022_v44 }
0x1ae1   : > { %v3034_v5 = vadd.f32 %v3032_v42, %v3028_v2 }
0x1ae3   : > { %v3039_v6 = vpack.c.bf16 %v3034_v5, %v3033_v13 }
0x1ae5   : > { %3943 = vmatmul.mubr.msk.bf16.vlgmr.msra.gmra.mrb[76].mxu1 %vm793_vm2, %v3039_v6 }
0x1bb8   : > { %v3093_v47 = vpop.f32.mrb[76].mxu1 }
0x1bb9   : > { %v3094_v48 = vadd.f32 %v3093_v47, %v3043_v46  ;;  %v3944_v10 = vpop.f32.mrb[77].mxu1 }
0x1bba   : > { %v3096_v49 = vpop.f32.mrb[78].mxu1 }
0x1bbb   : > { %v3097_v50 = vadd.f32 %v3096_v49, %v3043_v46  ;;  %v3945_v51 = vpop.f32.mrb[79].mxu1  ;;  %v3100_v52 = vmax.f32 %v3094_v48, 0.0 }
0x1bbd   : > { %v3101_v53 = vmax.f32 %v3097_v50, 0.0 }
0x1bbf   : > { %v3110_v20 = vpack.c.bf16 %v3101_v53, %v3100_v52 }
0x1bc1   : > { %3955 = vmatmul.mubr.msk.bf16.vlgmr.msra.gmra.mrb[72].mxu0 %vm3139_vm7, %v3110_v20 }
0x1c94   : > { %v3177_v3 = vpop.f32.mrb[72].mxu0 }
0x1c95   : > { %v3178_v36 = vadd.f32 %v3177_v3, %v3114_v32  ;;  %v3956_v54 = vpop.f32.mrb[73].mxu0 }
0x1c96   : > { %v3180_v55 = vpop.f32.mrb[74].mxu0 }
0x1c97   : > { %v3181_v57 = vadd.f32 %v3180_v55, %v3114_v32  ;;  %v3957_v16 = vpop.f32.mrb[75].mxu0  ;;  %v3184_v59 = vadd.f32 %v3178_v36, %v3033_v13 }
0x1c99   : > { %v3186_v60 = vsel %vm793_vm2, %v3184_v59, 0.0  ;;  %v3185_v61 = vadd.f32 %v3181_v57, %v3034_v5 }
0x1c9a   : > { %3187 = vadd.xlane.f32.xlu1 %v3186_v60 }
0x1c9b   : > { %v3189_v62 = vsel %vm793_vm2, %v3185_v61, 0.0 }
0x1c9c   : > { %3190 = vadd.xlane.f32.xlu0 %v3189_v62 }
0x1d27   : > { %v3188_v63 = vpop.xlane.xlu1 %3187 }
0x1d28   : > { %v3192_v0 = vmul.f32 0.03125, %v3188_v63 }
0x1d29   : > { %v3191_v1 = vpop.xlane.xlu0 %3190 }
0x1d2a   : > { %v3194_v8 = vsub.f32 %v3184_v59, %v3192_v0  ;;  %v3193_v40 = vmul.f32 0.03125, %v3191_v1 }
0x1d2c   : > { %v3195_v56 = vsub.f32 %v3185_v61, %v3193_v40  ;;  %v3196_v15 = vmul.f32 %v3194_v8, %v3194_v8 }
0x1d2e   : > { %v3198_v18 = vsel %vm793_vm2, %v3196_v15, 0.0  ;;  %v3197_v43 = vmul.f32 %v3195_v56, %v3195_v56 }
0x1d2f   : > { %3199 = vadd.xlane.f32.xlu1 %v3198_v18 }
0x1d30   : > { %v3201_v19 = vsel %vm793_vm2, %v3197_v43, 0.0 }
0x1d31   : > { %3202 = vadd.xlane.f32.xlu0 %v3201_v19 }
0x1dbc   : > { %v3200_v21 = vpop.xlane.xlu1 %3199 }
0x1dbd   : > { %v3204_v22 = vmul.f32 0.03125, %v3200_v21 }
0x1dbe   : > { %v3203_v4 = vpop.xlane.xlu0 %3202 }
0x1dbf   : > { %v3206_v23 = vadd.f32 1e-05, %v3204_v22  ;;  %v3205_v7 = vmul.f32 0.03125, %v3203_v4 }
0x1dc1   : > { %4215 = vrsqrt.f32 %v3206_v23  ;;  %v3207_v28 = vadd.f32 1e-05, %v3205_v7 }
0x1dc3   : > { %4217 = vrsqrt.f32 %v3207_v28 }
0x1dcb   : > { %v4216_v35 = vpop.eup %4215 }
0x1dcc   : > { %v3210_v41 = vmul.f32 %v4216_v35, %v3194_v8  ;;  %3227 = sbr.rel (%p3595_p0) target bundleno = 7637 (0x1dd5), region = 112 }
0x1dcd   : > { %v4218_v25 = vpop.eup %4217 }
0x1dce   : > { %v3216_v27 = vmul.f32 %v3215_v24, %v3210_v41  ;;  %v3211_v29 = vmul.f32 %v4218_v25, %v3195_v56 }
0x1dd0   : > { %v3222_v30 = vadd.f32 %v3221_v11, %v3216_v27  ;;  %v3217_v31 = vmul.f32 %v3215_v24, %v3211_v29 }
0x1dd2   : > { %v3223_v34 = vadd.f32 %v3221_v11, %v3217_v31  ;;  %3228 = vst.msk [vmem:[#allocation14] sm:$0xff] (!%p3595_p0), %vm793_vm2, %v3222_v30 }
0x1dd4   : > { %3229 = vst.msk [vmem:[#allocation14 + $0x8] sm:$0xff] %vm793_vm2, %v3223_v34 }
0x1dd5 PF: > { %s5662_s8 = sld [smem:[#allocation21_spill]] }
0x1ddb   : > { %p3596_p8 = scmp.ne.s32.totalorder %s5662_s8, 1 }
0x1ddc   : > { %v3236_v9 = vsel (!%p3596_p8), %vm793_vm2, %v3222_v30, 0.0  ;;  %v3239_v58 = vsel (!%p3596_p8), %vm793_vm2, %v3223_v34, 0.0  ;;  %s5663_s25 = sld [smem:[#allocation35_spill]] (!%p3596_p8) }
0x1ddd   : > { %3233 = sbr.rel (%p3596_p8) target bundleno = 7962 (0x1f1a), region = 116  ;;  %3237 = vadd.xlane.f32.xlu0 (!%p3596_p8), %v3236_v9 }
0x1de1   : > { %3240 = vadd.xlane.f32.xlu0 (!%p3596_p8), %v3239_v58 }
0x1de2   : > { %s5664_s7 = smov (!%p3596_p8), %s5663_s25  ;;  %v3597_v48 = vld [vmem:[%s5663_s25] ss:$0 sm:$0xff] (!%p3596_p8) }
0x1de3   : > { %v3598_v49 = vld [vmem:[%s5664_s7 + $0x1] ss:$0 sm:$0xff] (!%p3596_p8) }
0x1e6a   : > { %v3238_v12 = vpop.xlane.xlu0 %3237 }
0x1e6b   : > { %v3242_v38 = vmul.f32 0.03125, %v3238_v12 }
0x1e6d   : > { %v3244_v37 = vsub.f32 %v3222_v30, %v3242_v38 }
0x1e6e   : > { %v3241_v39 = vpop.xlane.xlu0 %3240 }
0x1e6f   : > { %v3243_v26 = vmul.f32 0.03125, %v3241_v39  ;;  %v3246_v33 = vmul.f32 %v3244_v37, %v3244_v37 }
0x1e71   : > { %v3245_v42 = vsub.f32 %v3223_v34, %v3243_v26  ;;  %v3248_v17 = vsel %vm793_vm2, %v3246_v33, 0.0 }
0x1e72   : > { %3249 = vadd.xlane.f32.xlu1 %v3248_v17 }
0x1e73   : > { %v3247_v44 = vmul.f32 %v3245_v42, %v3245_v42 }
0x1e75   : > { %v3251_v2 = vsel %vm793_vm2, %v3247_v44, 0.0 }
0x1e76   : > { %3252 = vadd.xlane.f32.xlu1 %v3251_v2 }
0x1eff   : > { %v3250_v13 = vpop.xlane.xlu1 %3249 }
0x1f00   : > { %v3254_v5 = vmul.f32 0.03125, %v3250_v13 }
0x1f02   : > { %v3256_v6 = vadd.f32 1e-05, %v3254_v5 }
0x1f03   : > { %v3253_v14 = vpop.xlane.xlu1 %3252 }
0x1f04   : > { %4220 = vrsqrt.f32 %v3256_v6  ;;  %v3255_v45 = vmul.f32 0.03125, %v3253_v14 }
0x1f06   : > { %v3257_v46 = vadd.f32 1e-05, %v3255_v45 }
0x1f08   : > { %4222 = vrsqrt.f32 %v3257_v46 }
0x1f0e   : > { %v4221_v47 = vpop.eup %4220 }
0x1f0f   : > { %v3260_v10 = vmul.f32 %v4221_v47, %v3244_v37 }
0x1f11   : > { %v3266_v50 = vmul.f32 %v3597_v48, %v3260_v10 }
0x1f12   : > { %v4223_v51 = vpop.eup %4222 }
0x1f13   : > { %v3272_v52 = vadd.f32 %v3598_v49, %v3266_v50  ;;  %v3261_v53 = vmul.f32 %v4223_v51, %v3245_v42 }
0x1f15   : > { %3274 = vst.msk [vmem:[#allocation14] sm:$0xff] %vm793_vm2, %v3272_v52  ;;  %v3267_v20 = vmul.f32 %v3597_v48, %v3261_v53 }
0x1f17   : > { %v3273_v32 = vadd.f32 %v3598_v49, %v3267_v20 }
0x1f19   : > { %3275 = vst.msk [vmem:[#allocation14 + $0x8] sm:$0xff] %vm793_vm2, %v3273_v32 }
0x1f1a PF: > { %p4021_p6 = scmp.eq.s32.totalorder %s4679_s14, 1  ;;  %s4578_s19 = smov [#allocation14]  }
0x1f1b   : > { %s3285_s4 = sshll.u32 %s4578_s19, 4  ;;  %s3286_s4 = int_to_ptr.vmem [resolvable:$true] %s3285_s4 }
0x1f1c   : > { %s4456_s29 = scalar_lea.vmem %s3286_s4, 256  ;;  %p4463_p12 = scmp.lt.s32.totalorder %s3286_s4, %s3286_s4 }
0x1f1d   : > { %p4457_p4 = scmp.ne.s32.totalorder %s3286_s4, %s4456_s29  ;;  %p4464_p2 = scmp.lt.s32.totalorder %s4456_s29, %s4456_s29 }
0x1f1f   : > { %p4458_p5 = pnand %p4457_p4, %p4021_p6  ;;  %p4465_p9 = por %p4464_p2, %p4463_p12 }
0x1f21   : > { %p4459_p10 = pneg %p4458_p5 }
0x1f23   : > { %p4466_p3 = pnand %p4465_p9, %p4459_p10 }
0x1f25   : > { %4469 = shalt.err (!%p4466_p3)
}
0x1f26   : > { %s5665_s30 = sld [smem:[#allocation36_spill]] }
0x1f2c   : > { %s5666_s1 = smov %s5665_s30  ;;  %s4470_s13 = scalar_lea.hbm %s5665_s30, 256 }
0x1f2d   : > { %p4471_p11 = scmp.ne.s32.totalorder %s5666_s1, %s4470_s13  ;;  %p4476_p1 = scmp.lt.u32.totalorder %s4470_s13, %s5666_s1 }
0x1f2f   : > { %p4472_p7 = pnand %p4471_p11, %p4021_p6 }
0x1f31   : > { %p4473_p13 = pneg %p4472_p7 }
0x1f33   : > { %p4478_p0 = pnand %p4476_p1, %p4473_p13 }
0x1f35   : > { %4481 = shalt.err (!%p4478_p0)
}
0x1f36   : > { %s4579_s9 = smov 128  }
0x1f37   : > { %3983 = dma.vmem_to_hbm [thread:$0]  (%p4021_p6), %s3286_s4, 256, %s5666_s1, [#allocation4], %s4579_s9, %s4579_s9, %s4575_s21  }
0x1f38   : > { %4523 = dma.done.wait (%p4021_p6), [#allocation4], 256  }
0x1f39   : > { %4525 = vsyncadd (%p4021_p6), [#allocation4], 4294967040 }
0x1f3a PF: > { %s5667_s16 = sld [smem:[#allocation23_spill]]  ;;  %s5668_s27 = sld [smem:[#allocation20_spill]] }
0x1f3b   : > { %s5669_s10 = sld [smem:[#allocation25_spill]]  ;;  %s5670_s28 = sld [smem:[#allocation22_spill]] }
0x1f3c   : > { %s5671_s29 = sld [smem:[#allocation24_spill]]  ;;  %s5672_s25 = smov %s4532_s26 }
0x1f40   : > { %s27_s30 = sadd.s32 1, %s5667_s16   ;;  %s5673_s26 = smov %s5668_s27 }
0x1f41   : > { %p24_p8 = scmp.ge.s32.totalorder %s27_s30, 4   ;;  %s5674_s27 = smov %s5669_s10 }
0x1f43   :  { %26 = sbr.rel (!%p24_p8) target bundleno = 18 (0x12), region = 186 }
0x1f4a   :  { %3301 = vsyncpa [#allocation3], 1 }
0x1f4b   :  { %3303 = vsyncpa [#allocation3 + $0x1], 1 }
0x1f4c   :  { %3304 = vsyncpa [#allocation6], 1 }
0x1f4d   :  { %3305 = vsyncpa [#allocation9], 1 }
0x1f4e   :  { %3306 = vsyncpa [#allocation4], 1 }
0x1f4f   :  { %3308 = vsyncpa [#allocation4 + $0x1], 1 }

</bundles_post_ra>
